<compile_context>
chip_gen: v7x
topology: tpu7x:2x2x1
jax: 0.10.0
libtpu: 0.0.40
codegen_flags: <defaults>
</compile_context>

<pallas_src>
import functools

import jax
import jax.numpy as jnp
from jax import lax
from jax.experimental import pallas as pl
from jax.experimental.pallas import tpu as pltpu

_LANES = 128


def _leaky(x):
    return jnp.where(x > 0, x, 0.01 * x)


# ----------------------------------------------------------------------------
# In-kernel building blocks (all operate on VMEM-resident values; the weight
# slab is sliced with static offsets baked in via the `layout` closure).
# ----------------------------------------------------------------------------

def _edge_mlp_adj(w_ref, lay, parts, b, n):
    """Wcompute: edge MLP on |x_i - x_j| + masked row-softmax -> (B, N, N)."""
    two_nf, nf = lay["two_nf"], lay["nf"]
    vec = w_ref[lay["vec"]:lay["vec"] + 8, :]              # per-layer bias rows

    # conv2d_1 (+ folded BN) accumulated over activation parts (no concat).
    h = None
    for xp, off in zip(parts, lay["w1"]):
        cp = xp.shape[-1]
        d = jnp.abs(xp[:, :, None, :] - xp[:, None, :, :])         # (B,N,N,Cp)
        d = d.reshape(b * n * n, cp)                                # free merge
        hp = jnp.dot(d, w_ref[off:off + cp, 0:two_nf],
                     preferred_element_type=jnp.float32)
        h = hp if h is None else h + hp
    h = _leaky(h + vec[0:1, 0:two_nf])
    h = _leaky(jnp.dot(h, w_ref[lay["w2"]:lay["w2"] + two_nf, 0:two_nf],
                       preferred_element_type=jnp.float32) + vec[1:2, 0:two_nf])
    h = _leaky(jnp.dot(h, w_ref[lay["w3"]:lay["w3"] + two_nf, 0:nf],
                       preferred_element_type=jnp.float32) + vec[2:3, 0:nf])
    h = _leaky(jnp.dot(h, w_ref[lay["w4"]:lay["w4"] + nf, 0:nf],
                       preferred_element_type=jnp.float32) + vec[3:4, 0:nf])

    # conv2d_last (nf -> 1) as broadcast-mul + lane reduction, so the scores
    # land directly in (B*N, N) layout (no width-1 column, no relayout).
    # Its bias is dropped: a constant per softmax row cancels exactly.
    h = h.reshape(b * n, n, nf)
    scores = jnp.sum(h * vec[4:5, 0:nf], axis=-1)                   # (B*N, N)

    # Diagonal (self-edge) mask generated in-kernel, single select.
    i_idx = lax.broadcasted_iota(jnp.int32, (b, n, n), 1).reshape(b * n, n)
    j_idx = lax.broadcasted_iota(jnp.int32, (b, n, n), 2).reshape(b * n, n)
    scores = jnp.where(i_idx != j_idx, scores, -1e30)
    scores = scores - jnp.max(scores, axis=-1, keepdims=True)
    e = jnp.exp(scores)
    adj = e * pl.reciprocal(jnp.sum(e, axis=-1, keepdims=True), approx=True)
    return adj.reshape(b, n, n)


def _gconv(w_ref, lay, parts, adj, b, n, leaky_out):
    """Gconv (J=2): [x, adj@x] @ W (+ folded BN) == x@W_top + adj@(x@W_bot)."""
    c_out = lay["c_out"]
    vec = w_ref[lay["vec"]:lay["vec"] + 8, :]
    yt = None
    yb = None
    for xp, t_off, b_off in zip(parts, lay["wtop"], lay["wbot"]):
        cp = xp.shape[-1]
        x2 = xp.reshape(b * n, cp)
        t = jnp.dot(x2, w_ref[t_off:t_off + cp, 0:c_out],
                    preferred_element_type=jnp.float32)
        u = jnp.dot(x2, w_ref[b_off:b_off + cp, 0:c_out],
                    preferred_element_type=jnp.float32)
        yt = t if yt is None else yt + t
        yb = u if yb is None else yb + u
    # adj @ (x @ W_bot)  ==  (adj @ x) @ W_bot, but at the narrow c_out width.
    ax = jnp.einsum("bij,bjc->bic", adj, yb.reshape(b, n, c_out),
                    preferred_element_type=jnp.float32)
    y = yt.reshape(b, n, c_out) + ax + vec[5:6, 0:c_out]
    return _leaky(y) if leaky_out else y


def _active_update(w_ref, act, parts, oracles, hid, b, n):
    """Active block: scores + masked softmax + argmax decision + label add."""
    c = act["c"]
    vec = w_ref[act["vec"]:act["vec"] + 8, :]
    h = None
    for xp, off in zip(parts, act["w1"]):
        cp = xp.shape[-1]
        hp = jnp.dot(xp.reshape(b * n, cp), w_ref[off:off + cp, 0:c],
                     preferred_element_type=jnp.float32)
        h = hp if h is None else h + hp
    h = _leaky(h + vec[0:1, 0:c])                                   # conv1 + BN

    # conv_active_2 (c -> 1) as a lane reduction; scores are a lane-major
    # (B, N) slab (nodes on lanes), so the softmax reductions run on the XLU.
    # Its bias is dropped: constant per softmax row cancels exactly.
    s = jnp.sum(h.reshape(b, n, c) * vec[1:2, 0:c], axis=-1)        # (B, N)
    s = jnp.where(hid > 0.0, s, -1e30)        # mask already-revealed nodes
    s = s - jnp.max(s, axis=-1, keepdims=True)
    e = jnp.exp(s)
    xa = e * pl.reciprocal(jnp.sum(e, axis=-1, keepdims=True), approx=True)
    xa = xa * hid

    # Eval-mode decision: first-index argmax over nodes (max + min-index).
    # TODO(synk): training / active_random=1 uses torch.multinomial sampling,
    # which has no in-kernel equivalent; eval-mode argmax is implemented.
    col = lax.broadcasted_iota(jnp.int32, (b, n), 1).astype(jnp.float32)
    m = jnp.max(xa, axis=-1, keepdims=True)
    cand = jnp.where(xa == m, col, float(n))
    decision = jnp.min(cand, axis=-1, keepdims=True)                # (B, 1)
    mapping_bp = jnp.where(col == decision, xa, 0.0)[:, :, None]    # (B, N, 1)
    # Label injection only touches the first n_way channels of the first part
    # (oracles is pre-padded to that part's width in the wrapper).
    return parts[0] + mapping_bp * oracles


def _gnn_active_kernel(x_ref, oracle_ref, hid_ref, w_ref, o_ref, *, layout, b, n):
    x0 = x_ref[...]                         # (B, N, F_in)
    oracles = oracle_ref[...]               # (B, N, F_in)  (one-hot, zero-padded)
    hid = hid_ref[...]                      # (B, N)

    # layer 0
    lay = layout["layer0"]
    adj = _edge_mlp_adj(w_ref, lay, [x0], b, n)
    x1 = _gconv(w_ref, lay, [x0], adj, b, n, leaky_out=True)

    # active labeling (fused: scores, decision, label injection)
    x0 = _active_update(w_ref, layout["active"], [x0, x1], oracles, hid, b, n)

    # layer 1
    lay = layout["layer1"]
    adj = _edge_mlp_adj(w_ref, lay, [x0, x1], b, n)
    x2 = _gconv(w_ref, lay, [x0, x1], adj, b, n, leaky_out=True)

    # last layer (no BN, no leaky relu)
    lay = layout["last"]
    adj = _edge_mlp_adj(w_ref, lay, [x0, x1, x2], b, n)
    out = _gconv(w_ref, lay, [x0, x1, x2], adj, b, n, leaky_out=False)

    o_ref[...] = out[:, 0, :]               # (B, n_way): logits at node 0


# ----------------------------------------------------------------------------
# Wrapper: one pallas_call for the whole forward pass.
# ----------------------------------------------------------------------------

def gnn_active_forward(w_slab, x, oracles_yi, hidden_labels, *, layout):
    B, N, F_in = x.shape
    n_way = oracles_yi.shape[-1]
    # Label injection must stay inside the first activation part (raw input).
    assert n_way <= F_in
    oracles_pad = jnp.zeros((B, N, F_in), jnp.float32).at[..., :n_way].set(
        oracles_yi.astype(jnp.float32))
    hid = hidden_labels.astype(jnp.float32)

    kern = functools.partial(_gnn_active_kernel, layout=layout, b=B, n=N)
    vmem = pl.BlockSpec(memory_space=pltpu.MemorySpace.VMEM)
    # TODO(synk): on v7x (2 TensorCores/chip) a 2-way "parallel" batch split of
    # this block would keep both cores busy; left single-block since that is a
    # pure win on single-TC v5e/v6e and the problem is µs-scale anyway.
    return pl.pallas_call(
        kern,
        out_shape=jax.ShapeDtypeStruct((B, n_way), jnp.float32),
        in_specs=[vmem, vmem, vmem, vmem],
        out_specs=vmem,
    )(x.astype(jnp.float32), oracles_pad, hid, w_slab)


# ----------------------------------------------------------------------------
# Parameter construction: eval-mode BN folded, everything packed into ONE
# 128-lane slab with 8-row-aligned sections; static row offsets go in `layout`.
# ----------------------------------------------------------------------------

class _Slab:
    def __init__(self):
        self._blocks = []
        self.n_rows = 0

    def add(self, arr2d):
        """Add a 2-D weight block at an 8-row-aligned offset; returns offset."""
        arr2d = jnp.asarray(arr2d, jnp.float32)
        off = self.n_rows
        self._blocks.append((off, arr2d))
        self.n_rows += ((arr2d.shape[0] + 7) // 8) * 8
        return off

    def add_rows(self, rows):
        """Pack up to 8 1-D vectors as consecutive rows of one 8-row block."""
        assert len(rows) <= 8
        off = self.n_rows
        for i, r in enumerate(rows):
            self._blocks.append((off + i, jnp.asarray(r, jnp.float32).reshape(1, -1)))
        self.n_rows += 8
        return off

    def build(self):
        slab = jnp.zeros((self.n_rows, _LANES), jnp.float32)
        for off, arr in self._blocks:
            r, c = arr.shape
            slab = slab.at[off:off + r, :c].set(arr)
        return slab


def _linear_init(key, fan_in, fan_out):
    k1, k2 = jax.random.split(key)
    bound = 1.0 / float(fan_in) ** 0.5
    w = jax.random.uniform(k1, (fan_in, fan_out), jnp.float32, -bound, bound)
    b = jax.random.uniform(k2, (fan_out,), jnp.float32, -bound, bound)
    return w, b


def _bn_scale_shift(key, c, eps=1e-5):
    k1, k2, k3, k4 = jax.random.split(key, 4)
    gamma = jax.random.uniform(k1, (c,), jnp.float32, 0.5, 1.5)
    beta = 0.1 * jax.random.normal(k2, (c,), jnp.float32)
    mean = 0.1 * jax.random.normal(k3, (c,), jnp.float32)
    var = jax.random.uniform(k4, (c,), jnp.float32, 0.5, 1.5)
    scale = gamma / jnp.sqrt(var + eps)
    return scale, beta - mean * scale


def _fold(w, b, scale, shift):
    # linear followed by eval-mode BN:  y = x @ (w*scale) + (b*scale + shift)
    return w * scale[None, :], b * scale + shift


def _build_gnn_layer(key, slab, part_widths, nf, c_out, bn_out):
    in_f = sum(part_widths)
    k_w, k_g = jax.random.split(key)

    # Wcompute: 4x (conv1x1 + BN folded), plus conv2d_last (nf -> 1).
    ks = jax.random.split(k_w, 9)
    dims = [(in_f, 2 * nf), (2 * nf, 2 * nf), (2 * nf, nf), (nf, nf)]
    ws, ts = [], []
    for i, (ci, co) in enumerate(dims):
        w, b = _linear_init(ks[2 * i], ci, co)
        s, t = _bn_scale_shift(ks[2 * i + 1], co)
        wf, tf = _fold(w, b, s, t)
        ws.append(wf)
        ts.append(tf)
    wl, _bl = _linear_init(ks[8], nf, 1)   # bias cancels in the row softmax

    # Gconv fc over [x, adj@x] (J=2), BN folded when bn_out.
    kg1, kg2 = jax.random.split(k_g)
    wg, bg = _linear_init(kg1, 2 * in_f, c_out)
    if bn_out:
        s, t = _bn_scale_shift(kg2, c_out)
        wg, shift = _fold(wg, bg, s, t)
    else:
        shift = bg
    w_top, w_bot = wg[:in_f], wg[in_f:]

    lay = {"two_nf": 2 * nf, "nf": nf, "c_out": c_out,
           "w1": [], "wtop": [], "wbot": []}
    o = 0
    for p in part_widths:                         # conv1 fan-in split by part
        lay["w1"].append(slab.add(ws[0][o:o + p]))
        o += p
    lay["w2"] = slab.add(ws[1])
    lay["w3"] = slab.add(ws[2])
    lay["w4"] = slab.add(ws[3])
    o = 0
    for p in part_widths:                         # Gconv fan-in split by part
        lay["wtop"].append(slab.add(w_top[o:o + p]))
        lay["wbot"].append(slab.add(w_bot[o:o + p]))
        o += p
    lay["vec"] = slab.add_rows([ts[0], ts[1], ts[2], ts[3], wl[:, 0], shift])
    return lay


def _build_active(key, slab, part_widths):
    c = sum(part_widths)
    k1, k2, k3 = jax.random.split(key, 3)
    w1, b1 = _linear_init(k1, c, c)
    s, t = _bn_scale_shift(k2, c)
    w1f, t1f = _fold(w1, b1, s, t)
    w2, _b2 = _linear_init(k3, c, 1)       # bias cancels in the node softmax
    act = {"c": c, "w1": []}
    o = 0
    for p in part_widths:
        act["w1"].append(slab.add(w1f[o:o + p]))
        o += p
    act["vec"] = slab.add_rows([t1f, w2[:, 0]])
    return act


def init_gnn_active(key, input_features, nf, n_way):
    half = nf // 2
    ks = jax.random.split(key, 4)
    slab = _Slab()
    layout = {
        "layer0": _build_gnn_layer(ks[0], slab, [input_features], nf, half, True),
        "active": _build_active(ks[1], slab, [input_features, half]),
        "layer1": _build_gnn_layer(ks[2], slab, [input_features, half], nf, half, True),
        "last": _build_gnn_layer(ks[3], slab, [input_features, half, half], nf,
                                 n_way, False),
    }
    return slab.build(), layout


# ----------------------------------------------------------------------------
# Main
# ----------------------------------------------------------------------------

if __name__ == "__main__":
    B, N = 2, 8                 # batch, number of graph nodes (B*N*N = 128 rows)
    F_IN = 6                    # input_features
    NF = 8                      # nf (so nf//2 = 4)
    N_WAY = 5                   # args.train_N_way

    key = jax.random.PRNGKey(0)
    kx, ko, kh, kp = jax.random.split(key, 4)

    w_slab, layout = init_gnn_active(kp, F_IN, NF, N_WAY)

    x = jax.random.normal(kx, (B, N, F_IN), jnp.float32)
    oracle_labels = jax.random.randint(ko, (B, N), 0, N_WAY)
    oracles_yi = jax.nn.one_hot(oracle_labels, N_WAY, dtype=jnp.float32)
    hidden_labels = (jax.random.uniform(kh, (B, N)) > 0.5).astype(jnp.float32)
    # invariant: at least one hidden (unmasked) node per row so the masked
    # softmax in the active block never hits the all-masked 0/0 case.
    hidden_labels = hidden_labels.at[:, 0].set(1.0)

    fwd = jax.jit(functools.partial(gnn_active_forward, layout=layout))
    out = fwd(w_slab, x, oracles_yi, hidden_labels)
    out = jax.block_until_ready(out)

    assert out.shape == (B, N_WAY), out.shape
    assert bool(jnp.all(jnp.isfinite(out)))
    print("KERNEL_OK")
</pallas_src>

<mosaic_0001>
module attributes {stable_mosaic.version = 11 : i64} {
  func.func @_gnn_active_kernel(%arg0: memref<2x8x6xf32, #tpu.memory_space<vmem>>, %arg1: memref<2x8x6xf32, #tpu.memory_space<vmem>>, %arg2: memref<2x8xf32, #tpu.memory_space<vmem>>, %arg3: memref<312x128xf32, #tpu.memory_space<vmem>>, %arg4: memref<2x5xf32, #tpu.memory_space<vmem>>) attributes {dimension_semantics = [], scalar_prefetch = 0 : i64, scratch_operands = 0 : i64, tpu.core_type = #tpu.core_type<tc>} {
    %c0 = arith.constant 0 : index
    %c0_0 = arith.constant 0 : index
    %c0_1 = arith.constant 0 : index
    %0 = vector.load %arg0[%c0, %c0_0, %c0_1] : memref<2x8x6xf32, #tpu.memory_space<vmem>>, vector<2x8x6xf32>
    %c0_2 = arith.constant 0 : index
    %c0_3 = arith.constant 0 : index
    %c0_4 = arith.constant 0 : index
    %1 = vector.load %arg1[%c0_2, %c0_3, %c0_4] : memref<2x8x6xf32, #tpu.memory_space<vmem>>, vector<2x8x6xf32>
    %c0_5 = arith.constant 0 : index
    %c0_6 = arith.constant 0 : index
    %2 = vector.load %arg2[%c0_5, %c0_6] : memref<2x8xf32, #tpu.memory_space<vmem>>, vector<2x8xf32>
    %c64 = arith.constant 64 : index
    %c0_7 = arith.constant 0 : index
    %3 = vector.load %arg3[%c64, %c0_7] : memref<312x128xf32, #tpu.memory_space<vmem>>, vector<8x128xf32>
    %4 = vector.shape_cast %0 : vector<2x8x6xf32> to vector<2x8x1x6xf32>
    %5 = vector.shape_cast %0 : vector<2x8x6xf32> to vector<2x1x8x6xf32>
    %6 = vector.broadcast %4 : vector<2x8x1x6xf32> to vector<2x8x8x6xf32>
    %7 = vector.broadcast %5 : vector<2x1x8x6xf32> to vector<2x8x8x6xf32>
    %8 = arith.subf %6, %7 : vector<2x8x8x6xf32>
    %9 = math.absf %8 : vector<2x8x8x6xf32>
    %10 = vector.shape_cast %9 : vector<2x8x8x6xf32> to vector<128x6xf32>
    %c0_8 = arith.constant 0 : index
    %c0_9 = arith.constant 0 : index
    %11 = vector.load %arg3[%c0_8, %c0_9] : memref<312x128xf32, #tpu.memory_space<vmem>>, vector<6x16xf32>
    %cst = arith.constant dense<0.000000e+00> : vector<128x16xf32>
    %12 = tpu.matmul %10, %11, %cst {dimension_numbers = #tpu.dot_dimension_numbers<[1], [0], [0], [1], [0, 0, 1, 1], [], []>} : vector<128x6xf32>, vector<6x16xf32>, vector<128x16xf32> -> vector<128x16xf32>
    %13 = vector.extract_strided_slice %3 {offsets = [0, 0], sizes = [1, 16], strides = [1, 1]} : vector<8x128xf32> to vector<1x16xf32>
    %14 = vector.broadcast %13 : vector<1x16xf32> to vector<128x16xf32>
    %15 = arith.addf %12, %14 : vector<128x16xf32>
    %cst_10 = arith.constant 0.000000e+00 : f32
    %16 = vector.broadcast %cst_10 : f32 to vector<128x16xf32>
    %17 = arith.cmpf ogt, %15, %16 : vector<128x16xf32>
    %cst_11 = arith.constant 0.00999999977 : f32
    %18 = vector.broadcast %cst_11 : f32 to vector<128x16xf32>
    %19 = arith.mulf %18, %15 : vector<128x16xf32>
    %20 = arith.select %17, %15, %19 : vector<128x16xi1>, vector<128x16xf32>
    %c8 = arith.constant 8 : index
    %c0_12 = arith.constant 0 : index
    %21 = vector.load %arg3[%c8, %c0_12] : memref<312x128xf32, #tpu.memory_space<vmem>>, vector<16x16xf32>
    %cst_13 = arith.constant dense<0.000000e+00> : vector<128x16xf32>
    %22 = tpu.matmul %20, %21, %cst_13 {dimension_numbers = #tpu.dot_dimension_numbers<[1], [0], [0], [1], [0, 0, 1, 1], [], []>} : vector<128x16xf32>, vector<16x16xf32>, vector<128x16xf32> -> vector<128x16xf32>
    %23 = vector.extract_strided_slice %3 {offsets = [1, 0], sizes = [1, 16], strides = [1, 1]} : vector<8x128xf32> to vector<1x16xf32>
    %24 = vector.broadcast %23 : vector<1x16xf32> to vector<128x16xf32>
    %25 = arith.addf %22, %24 : vector<128x16xf32>
    %cst_14 = arith.constant 0.000000e+00 : f32
    %26 = vector.broadcast %cst_14 : f32 to vector<128x16xf32>
    %27 = arith.cmpf ogt, %25, %26 : vector<128x16xf32>
    %cst_15 = arith.constant 0.00999999977 : f32
    %28 = vector.broadcast %cst_15 : f32 to vector<128x16xf32>
    %29 = arith.mulf %28, %25 : vector<128x16xf32>
    %30 = arith.select %27, %25, %29 : vector<128x16xi1>, vector<128x16xf32>
    %c24 = arith.constant 24 : index
    %c0_16 = arith.constant 0 : index
    %31 = vector.load %arg3[%c24, %c0_16] : memref<312x128xf32, #tpu.memory_space<vmem>>, vector<16x8xf32>
    %cst_17 = arith.constant dense<0.000000e+00> : vector<128x8xf32>
    %32 = tpu.matmul %30, %31, %cst_17 {dimension_numbers = #tpu.dot_dimension_numbers<[1], [0], [0], [1], [0, 0, 1, 1], [], []>} : vector<128x16xf32>, vector<16x8xf32>, vector<128x8xf32> -> vector<128x8xf32>
    %33 = vector.extract_strided_slice %3 {offsets = [2, 0], sizes = [1, 8], strides = [1, 1]} : vector<8x128xf32> to vector<1x8xf32>
    %34 = vector.broadcast %33 : vector<1x8xf32> to vector<128x8xf32>
    %35 = arith.addf %32, %34 : vector<128x8xf32>
    %cst_18 = arith.constant 0.000000e+00 : f32
    %36 = vector.broadcast %cst_18 : f32 to vector<128x8xf32>
    %37 = arith.cmpf ogt, %35, %36 : vector<128x8xf32>
    %cst_19 = arith.constant 0.00999999977 : f32
    %38 = vector.broadcast %cst_19 : f32 to vector<128x8xf32>
    %39 = arith.mulf %38, %35 : vector<128x8xf32>
    %40 = arith.select %37, %35, %39 : vector<128x8xi1>, vector<128x8xf32>
    %c40 = arith.constant 40 : index
    %c0_20 = arith.constant 0 : index
    %41 = vector.load %arg3[%c40, %c0_20] : memref<312x128xf32, #tpu.memory_space<vmem>>, vector<8x8xf32>
    %cst_21 = arith.constant dense<0.000000e+00> : vector<128x8xf32>
    %42 = tpu.matmul %40, %41, %cst_21 {dimension_numbers = #tpu.dot_dimension_numbers<[1], [0], [0], [1], [0, 0, 1, 1], [], []>} : vector<128x8xf32>, vector<8x8xf32>, vector<128x8xf32> -> vector<128x8xf32>
    %43 = vector.extract_strided_slice %3 {offsets = [3, 0], sizes = [1, 8], strides = [1, 1]} : vector<8x128xf32> to vector<1x8xf32>
    %44 = vector.broadcast %43 : vector<1x8xf32> to vector<128x8xf32>
    %45 = arith.addf %42, %44 : vector<128x8xf32>
    %cst_22 = arith.constant 0.000000e+00 : f32
    %46 = vector.broadcast %cst_22 : f32 to vector<128x8xf32>
    %47 = arith.cmpf ogt, %45, %46 : vector<128x8xf32>
    %cst_23 = arith.constant 0.00999999977 : f32
    %48 = vector.broadcast %cst_23 : f32 to vector<128x8xf32>
    %49 = arith.mulf %48, %45 : vector<128x8xf32>
    %50 = arith.select %47, %45, %49 : vector<128x8xi1>, vector<128x8xf32>
    %51 = vector.shape_cast %50 : vector<128x8xf32> to vector<16x8x8xf32>
    %52 = vector.extract_strided_slice %3 {offsets = [4, 0], sizes = [1, 8], strides = [1, 1]} : vector<8x128xf32> to vector<1x8xf32>
    %53 = vector.shape_cast %52 : vector<1x8xf32> to vector<1x1x8xf32>
    %54 = vector.broadcast %53 : vector<1x1x8xf32> to vector<16x8x8xf32>
    %55 = arith.mulf %51, %54 : vector<16x8x8xf32>
    %cst_24 = arith.constant dense<0.000000e+00> : vector<16x8xf32>
    %56 = vector.multi_reduction <add>, %55, %cst_24 [2] : vector<16x8x8xf32> to vector<16x8xf32>
    %57 = tpu.iota {dimensions = array<i32: 1>} : vector<2x8x8xi32>
    %58 = vector.shape_cast %57 : vector<2x8x8xi32> to vector<16x8xi32>
    %59 = tpu.iota {dimensions = array<i32: 2>} : vector<2x8x8xi32>
    %60 = vector.shape_cast %59 : vector<2x8x8xi32> to vector<16x8xi32>
    %61 = arith.cmpi ne, %58, %60 : vector<16x8xi32>
    %cst_25 = arith.constant -1.000000e+30 : f32
    %62 = vector.broadcast %cst_25 : f32 to vector<16x8xf32>
    %63 = arith.select %61, %56, %62 : vector<16x8xi1>, vector<16x8xf32>
    %cst_26 = arith.constant dense<0xFF800000> : vector<16xf32>
    %64 = vector.multi_reduction <maximumf>, %63, %cst_26 [1] : vector<16x8xf32> to vector<16xf32>
    %65 = vector.shape_cast %64 : vector<16xf32> to vector<16x1xf32>
    %66 = vector.broadcast %65 : vector<16x1xf32> to vector<16x8xf32>
    %67 = arith.subf %63, %66 : vector<16x8xf32>
    %68 = math.exp %67 : vector<16x8xf32>
    %cst_27 = arith.constant dense<0.000000e+00> : vector<16xf32>
    %69 = vector.multi_reduction <add>, %68, %cst_27 [1] : vector<16x8xf32> to vector<16xf32>
    %70 = vector.shape_cast %69 : vector<16xf32> to vector<16x1xf32>
    %71 = tpu.reciprocal %70 {approx = true} : vector<16x1xf32> -> vector<16x1xf32>
    %72 = vector.broadcast %71 : vector<16x1xf32> to vector<16x8xf32>
    %73 = arith.mulf %68, %72 : vector<16x8xf32>
    %74 = vector.shape_cast %73 : vector<16x8xf32> to vector<2x8x8xf32>
    %c64_28 = arith.constant 64 : index
    %c0_29 = arith.constant 0 : index
    %75 = vector.load %arg3[%c64_28, %c0_29] : memref<312x128xf32, #tpu.memory_space<vmem>>, vector<8x128xf32>
    %76 = vector.shape_cast %0 : vector<2x8x6xf32> to vector<16x6xf32>
    %c48 = arith.constant 48 : index
    %c0_30 = arith.constant 0 : index
    %77 = vector.load %arg3[%c48, %c0_30] : memref<312x128xf32, #tpu.memory_space<vmem>>, vector<6x4xf32>
    %cst_31 = arith.constant dense<0.000000e+00> : vector<16x4xf32>
    %78 = tpu.matmul %76, %77, %cst_31 {dimension_numbers = #tpu.dot_dimension_numbers<[1], [0], [0], [1], [0, 0, 1, 1], [], []>} : vector<16x6xf32>, vector<6x4xf32>, vector<16x4xf32> -> vector<16x4xf32>
    %c56 = arith.constant 56 : index
    %c0_32 = arith.constant 0 : index
    %79 = vector.load %arg3[%c56, %c0_32] : memref<312x128xf32, #tpu.memory_space<vmem>>, vector<6x4xf32>
    %cst_33 = arith.constant dense<0.000000e+00> : vector<16x4xf32>
    %80 = tpu.matmul %76, %79, %cst_33 {dimension_numbers = #tpu.dot_dimension_numbers<[1], [0], [0], [1], [0, 0, 1, 1], [], []>} : vector<16x6xf32>, vector<6x4xf32>, vector<16x4xf32> -> vector<16x4xf32>
    %81 = vector.shape_cast %80 : vector<16x4xf32> to vector<2x8x4xf32>
    "tpu.trace_start"() <{level = 10 : i32, message = "bij,bjc->bic"}> : () -> ()
    %cst_34 = arith.constant dense<0.000000e+00> : vector<2x8x4xf32>
    %82 = tpu.matmul %74, %81, %cst_34 {dimension_numbers = #tpu.dot_dimension_numbers<[2], [1], [1], [2], [0, 0, 0, 1, 1, 2], [0], [0]>} : vector<2x8x8xf32>, vector<2x8x4xf32>, vector<2x8x4xf32> -> vector<2x8x4xf32>
    "tpu.trace_stop"() : () -> ()
    %83 = vector.shape_cast %78 : vector<16x4xf32> to vector<2x8x4xf32>
    %84 = arith.addf %83, %82 : vector<2x8x4xf32>
    %85 = vector.extract_strided_slice %75 {offsets = [5, 0], sizes = [1, 4], strides = [1, 1]} : vector<8x128xf32> to vector<1x4xf32>
    %86 = vector.shape_cast %85 : vector<1x4xf32> to vector<1x1x4xf32>
    %87 = vector.broadcast %86 : vector<1x1x4xf32> to vector<2x8x4xf32>
    %88 = arith.addf %84, %87 : vector<2x8x4xf32>
    %cst_35 = arith.constant 0.000000e+00 : f32
    %89 = vector.broadcast %cst_35 : f32 to vector<2x8x4xf32>
    %90 = arith.cmpf ogt, %88, %89 : vector<2x8x4xf32>
    %cst_36 = arith.constant 0.00999999977 : f32
    %91 = vector.broadcast %cst_36 : f32 to vector<2x8x4xf32>
    %92 = arith.mulf %91, %88 : vector<2x8x4xf32>
    %93 = arith.select %90, %88, %92 : vector<2x8x4xi1>, vector<2x8x4xf32>
    %c88 = arith.constant 88 : index
    %c0_37 = arith.constant 0 : index
    %94 = vector.load %arg3[%c88, %c0_37] : memref<312x128xf32, #tpu.memory_space<vmem>>, vector<8x128xf32>
    %95 = vector.shape_cast %0 : vector<2x8x6xf32> to vector<16x6xf32>
    %c72 = arith.constant 72 : index
    %c0_38 = arith.constant 0 : index
    %96 = vector.load %arg3[%c72, %c0_38] : memref<312x128xf32, #tpu.memory_space<vmem>>, vector<6x10xf32>
    %cst_39 = arith.constant dense<0.000000e+00> : vector<16x10xf32>
    %97 = tpu.matmul %95, %96, %cst_39 {dimension_numbers = #tpu.dot_dimension_numbers<[1], [0], [0], [1], [0, 0, 1, 1], [], []>} : vector<16x6xf32>, vector<6x10xf32>, vector<16x10xf32> -> vector<16x10xf32>
    %98 = vector.shape_cast %93 : vector<2x8x4xf32> to vector<16x4xf32>
    %c80 = arith.constant 80 : index
    %c0_40 = arith.constant 0 : index
    %99 = vector.load %arg3[%c80, %c0_40] : memref<312x128xf32, #tpu.memory_space<vmem>>, vector<4x10xf32>
    %cst_41 = arith.constant dense<0.000000e+00> : vector<16x10xf32>
    %100 = tpu.matmul %98, %99, %cst_41 {dimension_numbers = #tpu.dot_dimension_numbers<[1], [0], [0], [1], [0, 0, 1, 1], [], []>} : vector<16x4xf32>, vector<4x10xf32>, vector<16x10xf32> -> vector<16x10xf32>
    %101 = arith.addf %97, %100 : vector<16x10xf32>
    %102 = vector.extract_strided_slice %94 {offsets = [0, 0], sizes = [1, 10], strides = [1, 1]} : vector<8x128xf32> to vector<1x10xf32>
    %103 = vector.broadcast %102 : vector<1x10xf32> to vector<16x10xf32>
    %104 = arith.addf %101, %103 : vector<16x10xf32>
    %cst_42 = arith.constant 0.000000e+00 : f32
    %105 = vector.broadcast %cst_42 : f32 to vector<16x10xf32>
    %106 = arith.cmpf ogt, %104, %105 : vector<16x10xf32>
    %cst_43 = arith.constant 0.00999999977 : f32
    %107 = vector.broadcast %cst_43 : f32 to vector<16x10xf32>
    %108 = arith.mulf %107, %104 : vector<16x10xf32>
    %109 = arith.select %106, %104, %108 : vector<16x10xi1>, vector<16x10xf32>
    %110 = vector.shape_cast %109 : vector<16x10xf32> to vector<2x8x10xf32>
    %111 = vector.extract_strided_slice %94 {offsets = [1, 0], sizes = [1, 10], strides = [1, 1]} : vector<8x128xf32> to vector<1x10xf32>
    %112 = vector.shape_cast %111 : vector<1x10xf32> to vector<1x1x10xf32>
    %113 = vector.broadcast %112 : vector<1x1x10xf32> to vector<2x8x10xf32>
    %114 = arith.mulf %110, %113 : vector<2x8x10xf32>
    %cst_44 = arith.constant dense<0.000000e+00> : vector<2x8xf32>
    %115 = vector.multi_reduction <add>, %114, %cst_44 [2] : vector<2x8x10xf32> to vector<2x8xf32>
    %cst_45 = arith.constant 0.000000e+00 : f32
    %116 = vector.broadcast %cst_45 : f32 to vector<2x8xf32>
    %117 = arith.cmpf ogt, %2, %116 : vector<2x8xf32>
    %cst_46 = arith.constant -1.000000e+30 : f32
    %118 = vector.broadcast %cst_46 : f32 to vector<2x8xf32>
    %119 = arith.select %117, %115, %118 : vector<2x8xi1>, vector<2x8xf32>
    %cst_47 = arith.constant dense<0xFF800000> : vector<2xf32>
    %120 = vector.multi_reduction <maximumf>, %119, %cst_47 [1] : vector<2x8xf32> to vector<2xf32>
    %121 = vector.shape_cast %120 : vector<2xf32> to vector<2x1xf32>
    %122 = vector.broadcast %121 : vector<2x1xf32> to vector<2x8xf32>
    %123 = arith.subf %119, %122 : vector<2x8xf32>
    %124 = math.exp %123 : vector<2x8xf32>
    %cst_48 = arith.constant dense<0.000000e+00> : vector<2xf32>
    %125 = vector.multi_reduction <add>, %124, %cst_48 [1] : vector<2x8xf32> to vector<2xf32>
    %126 = vector.shape_cast %125 : vector<2xf32> to vector<2x1xf32>
    %127 = tpu.reciprocal %126 {approx = true} : vector<2x1xf32> -> vector<2x1xf32>
    %128 = vector.broadcast %127 : vector<2x1xf32> to vector<2x8xf32>
    %129 = arith.mulf %124, %128 : vector<2x8xf32>
    %130 = arith.mulf %129, %2 : vector<2x8xf32>
    %131 = tpu.iota {dimensions = array<i32: 1>} : vector<2x8xi32>
    %132 = arith.sitofp %131 : vector<2x8xi32> to vector<2x8xf32>
    %cst_49 = arith.constant dense<0xFF800000> : vector<2xf32>
    %133 = vector.multi_reduction <maximumf>, %130, %cst_49 [1] : vector<2x8xf32> to vector<2xf32>
    %134 = vector.shape_cast %133 : vector<2xf32> to vector<2x1xf32>
    %135 = vector.broadcast %134 : vector<2x1xf32> to vector<2x8xf32>
    %136 = arith.cmpf oeq, %130, %135 : vector<2x8xf32>
    %cst_50 = arith.constant 8.000000e+00 : f32
    %137 = vector.broadcast %cst_50 : f32 to vector<2x8xf32>
    %138 = arith.select %136, %132, %137 : vector<2x8xi1>, vector<2x8xf32>
    %cst_51 = arith.constant dense<0x7F800000> : vector<2xf32>
    %139 = vector.multi_reduction <minimumf>, %138, %cst_51 [1] : vector<2x8xf32> to vector<2xf32>
    %140 = vector.shape_cast %139 : vector<2xf32> to vector<2x1xf32>
    %141 = vector.broadcast %140 : vector<2x1xf32> to vector<2x8xf32>
    %142 = arith.cmpf oeq, %132, %141 : vector<2x8xf32>
    %cst_52 = arith.constant 0.000000e+00 : f32
    %143 = vector.broadcast %cst_52 : f32 to vector<2x8xf32>
    %144 = arith.select %142, %130, %143 : vector<2x8xi1>, vector<2x8xf32>
    %145 = vector.shape_cast %144 : vector<2x8xf32> to vector<2x8x1xf32>
    %146 = vector.broadcast %145 : vector<2x8x1xf32> to vector<2x8x6xf32>
    %147 = arith.mulf %146, %1 : vector<2x8x6xf32>
    %148 = arith.addf %0, %147 : vector<2x8x6xf32>
    %c184 = arith.constant 184 : index
    %c0_53 = arith.constant 0 : index
    %149 = vector.load %arg3[%c184, %c0_53] : memref<312x128xf32, #tpu.memory_space<vmem>>, vector<8x128xf32>
    %150 = vector.shape_cast %148 : vector<2x8x6xf32> to vector<2x8x1x6xf32>
    %151 = vector.shape_cast %148 : vector<2x8x6xf32> to vector<2x1x8x6xf32>
    %152 = vector.broadcast %150 : vector<2x8x1x6xf32> to vector<2x8x8x6xf32>
    %153 = vector.broadcast %151 : vector<2x1x8x6xf32> to vector<2x8x8x6xf32>
    %154 = arith.subf %152, %153 : vector<2x8x8x6xf32>
    %155 = math.absf %154 : vector<2x8x8x6xf32>
    %156 = vector.shape_cast %155 : vector<2x8x8x6xf32> to vector<128x6xf32>
    %c96 = arith.constant 96 : index
    %c0_54 = arith.constant 0 : index
    %157 = vector.load %arg3[%c96, %c0_54] : memref<312x128xf32, #tpu.memory_space<vmem>>, vector<6x16xf32>
    %cst_55 = arith.constant dense<0.000000e+00> : vector<128x16xf32>
    %158 = tpu.matmul %156, %157, %cst_55 {dimension_numbers = #tpu.dot_dimension_numbers<[1], [0], [0], [1], [0, 0, 1, 1], [], []>} : vector<128x6xf32>, vector<6x16xf32>, vector<128x16xf32> -> vector<128x16xf32>
    %159 = vector.shape_cast %93 : vector<2x8x4xf32> to vector<2x8x1x4xf32>
    %160 = vector.shape_cast %93 : vector<2x8x4xf32> to vector<2x1x8x4xf32>
    %161 = vector.broadcast %159 : vector<2x8x1x4xf32> to vector<2x8x8x4xf32>
    %162 = vector.broadcast %160 : vector<2x1x8x4xf32> to vector<2x8x8x4xf32>
    %163 = arith.subf %161, %162 : vector<2x8x8x4xf32>
    %164 = math.absf %163 : vector<2x8x8x4xf32>
    %165 = vector.shape_cast %164 : vector<2x8x8x4xf32> to vector<128x4xf32>
    %c104 = arith.constant 104 : index
    %c0_56 = arith.constant 0 : index
    %166 = vector.load %arg3[%c104, %c0_56] : memref<312x128xf32, #tpu.memory_space<vmem>>, vector<4x16xf32>
    %cst_57 = arith.constant dense<0.000000e+00> : vector<128x16xf32>
    %167 = tpu.matmul %165, %166, %cst_57 {dimension_numbers = #tpu.dot_dimension_numbers<[1], [0], [0], [1], [0, 0, 1, 1], [], []>} : vector<128x4xf32>, vector<4x16xf32>, vector<128x16xf32> -> vector<128x16xf32>
    %168 = arith.addf %158, %167 : vector<128x16xf32>
    %169 = vector.extract_strided_slice %149 {offsets = [0, 0], sizes = [1, 16], strides = [1, 1]} : vector<8x128xf32> to vector<1x16xf32>
    %170 = vector.broadcast %169 : vector<1x16xf32> to vector<128x16xf32>
    %171 = arith.addf %168, %170 : vector<128x16xf32>
    %cst_58 = arith.constant 0.000000e+00 : f32
    %172 = vector.broadcast %cst_58 : f32 to vector<128x16xf32>
    %173 = arith.cmpf ogt, %171, %172 : vector<128x16xf32>
    %cst_59 = arith.constant 0.00999999977 : f32
    %174 = vector.broadcast %cst_59 : f32 to vector<128x16xf32>
    %175 = arith.mulf %174, %171 : vector<128x16xf32>
    %176 = arith.select %173, %171, %175 : vector<128x16xi1>, vector<128x16xf32>
    %c112 = arith.constant 112 : index
    %c0_60 = arith.constant 0 : index
    %177 = vector.load %arg3[%c112, %c0_60] : memref<312x128xf32, #tpu.memory_space<vmem>>, vector<16x16xf32>
    %cst_61 = arith.constant dense<0.000000e+00> : vector<128x16xf32>
    %178 = tpu.matmul %176, %177, %cst_61 {dimension_numbers = #tpu.dot_dimension_numbers<[1], [0], [0], [1], [0, 0, 1, 1], [], []>} : vector<128x16xf32>, vector<16x16xf32>, vector<128x16xf32> -> vector<128x16xf32>
    %179 = vector.extract_strided_slice %149 {offsets = [1, 0], sizes = [1, 16], strides = [1, 1]} : vector<8x128xf32> to vector<1x16xf32>
    %180 = vector.broadcast %179 : vector<1x16xf32> to vector<128x16xf32>
    %181 = arith.addf %178, %180 : vector<128x16xf32>
    %cst_62 = arith.constant 0.000000e+00 : f32
    %182 = vector.broadcast %cst_62 : f32 to vector<128x16xf32>
    %183 = arith.cmpf ogt, %181, %182 : vector<128x16xf32>
    %cst_63 = arith.constant 0.00999999977 : f32
    %184 = vector.broadcast %cst_63 : f32 to vector<128x16xf32>
    %185 = arith.mulf %184, %181 : vector<128x16xf32>
    %186 = arith.select %183, %181, %185 : vector<128x16xi1>, vector<128x16xf32>
    %c128 = arith.constant 128 : index
    %c0_64 = arith.constant 0 : index
    %187 = vector.load %arg3[%c128, %c0_64] : memref<312x128xf32, #tpu.memory_space<vmem>>, vector<16x8xf32>
    %cst_65 = arith.constant dense<0.000000e+00> : vector<128x8xf32>
    %188 = tpu.matmul %186, %187, %cst_65 {dimension_numbers = #tpu.dot_dimension_numbers<[1], [0], [0], [1], [0, 0, 1, 1], [], []>} : vector<128x16xf32>, vector<16x8xf32>, vector<128x8xf32> -> vector<128x8xf32>
    %189 = vector.extract_strided_slice %149 {offsets = [2, 0], sizes = [1, 8], strides = [1, 1]} : vector<8x128xf32> to vector<1x8xf32>
    %190 = vector.broadcast %189 : vector<1x8xf32> to vector<128x8xf32>
    %191 = arith.addf %188, %190 : vector<128x8xf32>
    %cst_66 = arith.constant 0.000000e+00 : f32
    %192 = vector.broadcast %cst_66 : f32 to vector<128x8xf32>
    %193 = arith.cmpf ogt, %191, %192 : vector<128x8xf32>
    %cst_67 = arith.constant 0.00999999977 : f32
    %194 = vector.broadcast %cst_67 : f32 to vector<128x8xf32>
    %195 = arith.mulf %194, %191 : vector<128x8xf32>
    %196 = arith.select %193, %191, %195 : vector<128x8xi1>, vector<128x8xf32>
    %c144 = arith.constant 144 : index
    %c0_68 = arith.constant 0 : index
    %197 = vector.load %arg3[%c144, %c0_68] : memref<312x128xf32, #tpu.memory_space<vmem>>, vector<8x8xf32>
    %cst_69 = arith.constant dense<0.000000e+00> : vector<128x8xf32>
    %198 = tpu.matmul %196, %197, %cst_69 {dimension_numbers = #tpu.dot_dimension_numbers<[1], [0], [0], [1], [0, 0, 1, 1], [], []>} : vector<128x8xf32>, vector<8x8xf32>, vector<128x8xf32> -> vector<128x8xf32>
    %199 = vector.extract_strided_slice %149 {offsets = [3, 0], sizes = [1, 8], strides = [1, 1]} : vector<8x128xf32> to vector<1x8xf32>
    %200 = vector.broadcast %199 : vector<1x8xf32> to vector<128x8xf32>
    %201 = arith.addf %198, %200 : vector<128x8xf32>
    %cst_70 = arith.constant 0.000000e+00 : f32
    %202 = vector.broadcast %cst_70 : f32 to vector<128x8xf32>
    %203 = arith.cmpf ogt, %201, %202 : vector<128x8xf32>
    %cst_71 = arith.constant 0.00999999977 : f32
    %204 = vector.broadcast %cst_71 : f32 to vector<128x8xf32>
    %205 = arith.mulf %204, %201 : vector<128x8xf32>
    %206 = arith.select %203, %201, %205 : vector<128x8xi1>, vector<128x8xf32>
    %207 = vector.shape_cast %206 : vector<128x8xf32> to vector<16x8x8xf32>
    %208 = vector.extract_strided_slice %149 {offsets = [4, 0], sizes = [1, 8], strides = [1, 1]} : vector<8x128xf32> to vector<1x8xf32>
    %209 = vector.shape_cast %208 : vector<1x8xf32> to vector<1x1x8xf32>
    %210 = vector.broadcast %209 : vector<1x1x8xf32> to vector<16x8x8xf32>
    %211 = arith.mulf %207, %210 : vector<16x8x8xf32>
    %cst_72 = arith.constant dense<0.000000e+00> : vector<16x8xf32>
    %212 = vector.multi_reduction <add>, %211, %cst_72 [2] : vector<16x8x8xf32> to vector<16x8xf32>
    %213 = tpu.iota {dimensions = array<i32: 1>} : vector<2x8x8xi32>
    %214 = vector.shape_cast %213 : vector<2x8x8xi32> to vector<16x8xi32>
    %215 = tpu.iota {dimensions = array<i32: 2>} : vector<2x8x8xi32>
    %216 = vector.shape_cast %215 : vector<2x8x8xi32> to vector<16x8xi32>
    %217 = arith.cmpi ne, %214, %216 : vector<16x8xi32>
    %cst_73 = arith.constant -1.000000e+30 : f32
    %218 = vector.broadcast %cst_73 : f32 to vector<16x8xf32>
    %219 = arith.select %217, %212, %218 : vector<16x8xi1>, vector<16x8xf32>
    %cst_74 = arith.constant dense<0xFF800000> : vector<16xf32>
    %220 = vector.multi_reduction <maximumf>, %219, %cst_74 [1] : vector<16x8xf32> to vector<16xf32>
    %221 = vector.shape_cast %220 : vector<16xf32> to vector<16x1xf32>
    %222 = vector.broadcast %221 : vector<16x1xf32> to vector<16x8xf32>
    %223 = arith.subf %219, %222 : vector<16x8xf32>
    %224 = math.exp %223 : vector<16x8xf32>
    %cst_75 = arith.constant dense<0.000000e+00> : vector<16xf32>
    %225 = vector.multi_reduction <add>, %224, %cst_75 [1] : vector<16x8xf32> to vector<16xf32>
    %226 = vector.shape_cast %225 : vector<16xf32> to vector<16x1xf32>
    %227 = tpu.reciprocal %226 {approx = true} : vector<16x1xf32> -> vector<16x1xf32>
    %228 = vector.broadcast %227 : vector<16x1xf32> to vector<16x8xf32>
    %229 = arith.mulf %224, %228 : vector<16x8xf32>
    %230 = vector.shape_cast %229 : vector<16x8xf32> to vector<2x8x8xf32>
    %c184_76 = arith.constant 184 : index
    %c0_77 = arith.constant 0 : index
    %231 = vector.load %arg3[%c184_76, %c0_77] : memref<312x128xf32, #tpu.memory_space<vmem>>, vector<8x128xf32>
    %232 = vector.shape_cast %148 : vector<2x8x6xf32> to vector<16x6xf32>
    %c152 = arith.constant 152 : index
    %c0_78 = arith.constant 0 : index
    %233 = vector.load %arg3[%c152, %c0_78] : memref<312x128xf32, #tpu.memory_space<vmem>>, vector<6x4xf32>
    %cst_79 = arith.constant dense<0.000000e+00> : vector<16x4xf32>
    %234 = tpu.matmul %232, %233, %cst_79 {dimension_numbers = #tpu.dot_dimension_numbers<[1], [0], [0], [1], [0, 0, 1, 1], [], []>} : vector<16x6xf32>, vector<6x4xf32>, vector<16x4xf32> -> vector<16x4xf32>
    %c160 = arith.constant 160 : index
    %c0_80 = arith.constant 0 : index
    %235 = vector.load %arg3[%c160, %c0_80] : memref<312x128xf32, #tpu.memory_space<vmem>>, vector<6x4xf32>
    %cst_81 = arith.constant dense<0.000000e+00> : vector<16x4xf32>
    %236 = tpu.matmul %232, %235, %cst_81 {dimension_numbers = #tpu.dot_dimension_numbers<[1], [0], [0], [1], [0, 0, 1, 1], [], []>} : vector<16x6xf32>, vector<6x4xf32>, vector<16x4xf32> -> vector<16x4xf32>
    %237 = vector.shape_cast %93 : vector<2x8x4xf32> to vector<16x4xf32>
    %c168 = arith.constant 168 : index
    %c0_82 = arith.constant 0 : index
    %238 = vector.load %arg3[%c168, %c0_82] : memref<312x128xf32, #tpu.memory_space<vmem>>, vector<4x4xf32>
    %cst_83 = arith.constant dense<0.000000e+00> : vector<16x4xf32>
    %239 = tpu.matmul %237, %238, %cst_83 {dimension_numbers = #tpu.dot_dimension_numbers<[1], [0], [0], [1], [0, 0, 1, 1], [], []>} : vector<16x4xf32>, vector<4x4xf32>, vector<16x4xf32> -> vector<16x4xf32>
    %c176 = arith.constant 176 : index
    %c0_84 = arith.constant 0 : index
    %240 = vector.load %arg3[%c176, %c0_84] : memref<312x128xf32, #tpu.memory_space<vmem>>, vector<4x4xf32>
    %cst_85 = arith.constant dense<0.000000e+00> : vector<16x4xf32>
    %241 = tpu.matmul %237, %240, %cst_85 {dimension_numbers = #tpu.dot_dimension_numbers<[1], [0], [0], [1], [0, 0, 1, 1], [], []>} : vector<16x4xf32>, vector<4x4xf32>, vector<16x4xf32> -> vector<16x4xf32>
    %242 = arith.addf %234, %239 : vector<16x4xf32>
    %243 = arith.addf %236, %241 : vector<16x4xf32>
    %244 = vector.shape_cast %243 : vector<16x4xf32> to vector<2x8x4xf32>
    "tpu.trace_start"() <{level = 10 : i32, message = "bij,bjc->bic"}> : () -> ()
    %cst_86 = arith.constant dense<0.000000e+00> : vector<2x8x4xf32>
    %245 = tpu.matmul %230, %244, %cst_86 {dimension_numbers = #tpu.dot_dimension_numbers<[2], [1], [1], [2], [0, 0, 0, 1, 1, 2], [0], [0]>} : vector<2x8x8xf32>, vector<2x8x4xf32>, vector<2x8x4xf32> -> vector<2x8x4xf32>
    "tpu.trace_stop"() : () -> ()
    %246 = vector.shape_cast %242 : vector<16x4xf32> to vector<2x8x4xf32>
    %247 = arith.addf %246, %245 : vector<2x8x4xf32>
    %248 = vector.extract_strided_slice %231 {offsets = [5, 0], sizes = [1, 4], strides = [1, 1]} : vector<8x128xf32> to vector<1x4xf32>
    %249 = vector.shape_cast %248 : vector<1x4xf32> to vector<1x1x4xf32>
    %250 = vector.broadcast %249 : vector<1x1x4xf32> to vector<2x8x4xf32>
    %251 = arith.addf %247, %250 : vector<2x8x4xf32>
    %cst_87 = arith.constant 0.000000e+00 : f32
    %252 = vector.broadcast %cst_87 : f32 to vector<2x8x4xf32>
    %253 = arith.cmpf ogt, %251, %252 : vector<2x8x4xf32>
    %cst_88 = arith.constant 0.00999999977 : f32
    %254 = vector.broadcast %cst_88 : f32 to vector<2x8x4xf32>
    %255 = arith.mulf %254, %251 : vector<2x8x4xf32>
    %256 = arith.select %253, %251, %255 : vector<2x8x4xi1>, vector<2x8x4xf32>
    %c304 = arith.constant 304 : index
    %c0_89 = arith.constant 0 : index
    %257 = vector.load %arg3[%c304, %c0_89] : memref<312x128xf32, #tpu.memory_space<vmem>>, vector<8x128xf32>
    %258 = vector.shape_cast %148 : vector<2x8x6xf32> to vector<2x8x1x6xf32>
    %259 = vector.shape_cast %148 : vector<2x8x6xf32> to vector<2x1x8x6xf32>
    %260 = vector.broadcast %258 : vector<2x8x1x6xf32> to vector<2x8x8x6xf32>
    %261 = vector.broadcast %259 : vector<2x1x8x6xf32> to vector<2x8x8x6xf32>
    %262 = arith.subf %260, %261 : vector<2x8x8x6xf32>
    %263 = math.absf %262 : vector<2x8x8x6xf32>
    %264 = vector.shape_cast %263 : vector<2x8x8x6xf32> to vector<128x6xf32>
    %c192 = arith.constant 192 : index
    %c0_90 = arith.constant 0 : index
    %265 = vector.load %arg3[%c192, %c0_90] : memref<312x128xf32, #tpu.memory_space<vmem>>, vector<6x16xf32>
    %cst_91 = arith.constant dense<0.000000e+00> : vector<128x16xf32>
    %266 = tpu.matmul %264, %265, %cst_91 {dimension_numbers = #tpu.dot_dimension_numbers<[1], [0], [0], [1], [0, 0, 1, 1], [], []>} : vector<128x6xf32>, vector<6x16xf32>, vector<128x16xf32> -> vector<128x16xf32>
    %267 = vector.shape_cast %93 : vector<2x8x4xf32> to vector<2x8x1x4xf32>
    %268 = vector.shape_cast %93 : vector<2x8x4xf32> to vector<2x1x8x4xf32>
    %269 = vector.broadcast %267 : vector<2x8x1x4xf32> to vector<2x8x8x4xf32>
    %270 = vector.broadcast %268 : vector<2x1x8x4xf32> to vector<2x8x8x4xf32>
    %271 = arith.subf %269, %270 : vector<2x8x8x4xf32>
    %272 = math.absf %271 : vector<2x8x8x4xf32>
    %273 = vector.shape_cast %272 : vector<2x8x8x4xf32> to vector<128x4xf32>
    %c200 = arith.constant 200 : index
    %c0_92 = arith.constant 0 : index
    %274 = vector.load %arg3[%c200, %c0_92] : memref<312x128xf32, #tpu.memory_space<vmem>>, vector<4x16xf32>
    %cst_93 = arith.constant dense<0.000000e+00> : vector<128x16xf32>
    %275 = tpu.matmul %273, %274, %cst_93 {dimension_numbers = #tpu.dot_dimension_numbers<[1], [0], [0], [1], [0, 0, 1, 1], [], []>} : vector<128x4xf32>, vector<4x16xf32>, vector<128x16xf32> -> vector<128x16xf32>
    %276 = arith.addf %266, %275 : vector<128x16xf32>
    %277 = vector.shape_cast %256 : vector<2x8x4xf32> to vector<2x8x1x4xf32>
    %278 = vector.shape_cast %256 : vector<2x8x4xf32> to vector<2x1x8x4xf32>
    %279 = vector.broadcast %277 : vector<2x8x1x4xf32> to vector<2x8x8x4xf32>
    %280 = vector.broadcast %278 : vector<2x1x8x4xf32> to vector<2x8x8x4xf32>
    %281 = arith.subf %279, %280 : vector<2x8x8x4xf32>
    %282 = math.absf %281 : vector<2x8x8x4xf32>
    %283 = vector.shape_cast %282 : vector<2x8x8x4xf32> to vector<128x4xf32>
    %c208 = arith.constant 208 : index
    %c0_94 = arith.constant 0 : index
    %284 = vector.load %arg3[%c208, %c0_94] : memref<312x128xf32, #tpu.memory_space<vmem>>, vector<4x16xf32>
    %cst_95 = arith.constant dense<0.000000e+00> : vector<128x16xf32>
    %285 = tpu.matmul %283, %284, %cst_95 {dimension_numbers = #tpu.dot_dimension_numbers<[1], [0], [0], [1], [0, 0, 1, 1], [], []>} : vector<128x4xf32>, vector<4x16xf32>, vector<128x16xf32> -> vector<128x16xf32>
    %286 = arith.addf %276, %285 : vector<128x16xf32>
    %287 = vector.extract_strided_slice %257 {offsets = [0, 0], sizes = [1, 16], strides = [1, 1]} : vector<8x128xf32> to vector<1x16xf32>
    %288 = vector.broadcast %287 : vector<1x16xf32> to vector<128x16xf32>
    %289 = arith.addf %286, %288 : vector<128x16xf32>
    %cst_96 = arith.constant 0.000000e+00 : f32
    %290 = vector.broadcast %cst_96 : f32 to vector<128x16xf32>
    %291 = arith.cmpf ogt, %289, %290 : vector<128x16xf32>
    %cst_97 = arith.constant 0.00999999977 : f32
    %292 = vector.broadcast %cst_97 : f32 to vector<128x16xf32>
    %293 = arith.mulf %292, %289 : vector<128x16xf32>
    %294 = arith.select %291, %289, %293 : vector<128x16xi1>, vector<128x16xf32>
    %c216 = arith.constant 216 : index
    %c0_98 = arith.constant 0 : index
    %295 = vector.load %arg3[%c216, %c0_98] : memref<312x128xf32, #tpu.memory_space<vmem>>, vector<16x16xf32>
    %cst_99 = arith.constant dense<0.000000e+00> : vector<128x16xf32>
    %296 = tpu.matmul %294, %295, %cst_99 {dimension_numbers = #tpu.dot_dimension_numbers<[1], [0], [0], [1], [0, 0, 1, 1], [], []>} : vector<128x16xf32>, vector<16x16xf32>, vector<128x16xf32> -> vector<128x16xf32>
    %297 = vector.extract_strided_slice %257 {offsets = [1, 0], sizes = [1, 16], strides = [1, 1]} : vector<8x128xf32> to vector<1x16xf32>
    %298 = vector.broadcast %297 : vector<1x16xf32> to vector<128x16xf32>
    %299 = arith.addf %296, %298 : vector<128x16xf32>
    %cst_100 = arith.constant 0.000000e+00 : f32
    %300 = vector.broadcast %cst_100 : f32 to vector<128x16xf32>
    %301 = arith.cmpf ogt, %299, %300 : vector<128x16xf32>
    %cst_101 = arith.constant 0.00999999977 : f32
    %302 = vector.broadcast %cst_101 : f32 to vector<128x16xf32>
    %303 = arith.mulf %302, %299 : vector<128x16xf32>
    %304 = arith.select %301, %299, %303 : vector<128x16xi1>, vector<128x16xf32>
    %c232 = arith.constant 232 : index
    %c0_102 = arith.constant 0 : index
    %305 = vector.load %arg3[%c232, %c0_102] : memref<312x128xf32, #tpu.memory_space<vmem>>, vector<16x8xf32>
    %cst_103 = arith.constant dense<0.000000e+00> : vector<128x8xf32>
    %306 = tpu.matmul %304, %305, %cst_103 {dimension_numbers = #tpu.dot_dimension_numbers<[1], [0], [0], [1], [0, 0, 1, 1], [], []>} : vector<128x16xf32>, vector<16x8xf32>, vector<128x8xf32> -> vector<128x8xf32>
    %307 = vector.extract_strided_slice %257 {offsets = [2, 0], sizes = [1, 8], strides = [1, 1]} : vector<8x128xf32> to vector<1x8xf32>
    %308 = vector.broadcast %307 : vector<1x8xf32> to vector<128x8xf32>
    %309 = arith.addf %306, %308 : vector<128x8xf32>
    %cst_104 = arith.constant 0.000000e+00 : f32
    %310 = vector.broadcast %cst_104 : f32 to vector<128x8xf32>
    %311 = arith.cmpf ogt, %309, %310 : vector<128x8xf32>
    %cst_105 = arith.constant 0.00999999977 : f32
    %312 = vector.broadcast %cst_105 : f32 to vector<128x8xf32>
    %313 = arith.mulf %312, %309 : vector<128x8xf32>
    %314 = arith.select %311, %309, %313 : vector<128x8xi1>, vector<128x8xf32>
    %c248 = arith.constant 248 : index
    %c0_106 = arith.constant 0 : index
    %315 = vector.load %arg3[%c248, %c0_106] : memref<312x128xf32, #tpu.memory_space<vmem>>, vector<8x8xf32>
    %cst_107 = arith.constant dense<0.000000e+00> : vector<128x8xf32>
    %316 = tpu.matmul %314, %315, %cst_107 {dimension_numbers = #tpu.dot_dimension_numbers<[1], [0], [0], [1], [0, 0, 1, 1], [], []>} : vector<128x8xf32>, vector<8x8xf32>, vector<128x8xf32> -> vector<128x8xf32>
    %317 = vector.extract_strided_slice %257 {offsets = [3, 0], sizes = [1, 8], strides = [1, 1]} : vector<8x128xf32> to vector<1x8xf32>
    %318 = vector.broadcast %317 : vector<1x8xf32> to vector<128x8xf32>
    %319 = arith.addf %316, %318 : vector<128x8xf32>
    %cst_108 = arith.constant 0.000000e+00 : f32
    %320 = vector.broadcast %cst_108 : f32 to vector<128x8xf32>
    %321 = arith.cmpf ogt, %319, %320 : vector<128x8xf32>
    %cst_109 = arith.constant 0.00999999977 : f32
    %322 = vector.broadcast %cst_109 : f32 to vector<128x8xf32>
    %323 = arith.mulf %322, %319 : vector<128x8xf32>
    %324 = arith.select %321, %319, %323 : vector<128x8xi1>, vector<128x8xf32>
    %325 = vector.shape_cast %324 : vector<128x8xf32> to vector<16x8x8xf32>
    %326 = vector.extract_strided_slice %257 {offsets = [4, 0], sizes = [1, 8], strides = [1, 1]} : vector<8x128xf32> to vector<1x8xf32>
    %327 = vector.shape_cast %326 : vector<1x8xf32> to vector<1x1x8xf32>
    %328 = vector.broadcast %327 : vector<1x1x8xf32> to vector<16x8x8xf32>
    %329 = arith.mulf %325, %328 : vector<16x8x8xf32>
    %cst_110 = arith.constant dense<0.000000e+00> : vector<16x8xf32>
    %330 = vector.multi_reduction <add>, %329, %cst_110 [2] : vector<16x8x8xf32> to vector<16x8xf32>
    %331 = tpu.iota {dimensions = array<i32: 1>} : vector<2x8x8xi32>
    %332 = vector.shape_cast %331 : vector<2x8x8xi32> to vector<16x8xi32>
    %333 = tpu.iota {dimensions = array<i32: 2>} : vector<2x8x8xi32>
    %334 = vector.shape_cast %333 : vector<2x8x8xi32> to vector<16x8xi32>
    %335 = arith.cmpi ne, %332, %334 : vector<16x8xi32>
    %cst_111 = arith.constant -1.000000e+30 : f32
    %336 = vector.broadcast %cst_111 : f32 to vector<16x8xf32>
    %337 = arith.select %335, %330, %336 : vector<16x8xi1>, vector<16x8xf32>
    %cst_112 = arith.constant dense<0xFF800000> : vector<16xf32>
    %338 = vector.multi_reduction <maximumf>, %337, %cst_112 [1] : vector<16x8xf32> to vector<16xf32>
    %339 = vector.shape_cast %338 : vector<16xf32> to vector<16x1xf32>
    %340 = vector.broadcast %339 : vector<16x1xf32> to vector<16x8xf32>
    %341 = arith.subf %337, %340 : vector<16x8xf32>
    %342 = math.exp %341 : vector<16x8xf32>
    %cst_113 = arith.constant dense<0.000000e+00> : vector<16xf32>
    %343 = vector.multi_reduction <add>, %342, %cst_113 [1] : vector<16x8xf32> to vector<16xf32>
    %344 = vector.shape_cast %343 : vector<16xf32> to vector<16x1xf32>
    %345 = tpu.reciprocal %344 {approx = true} : vector<16x1xf32> -> vector<16x1xf32>
    %346 = vector.broadcast %345 : vector<16x1xf32> to vector<16x8xf32>
    %347 = arith.mulf %342, %346 : vector<16x8xf32>
    %348 = vector.shape_cast %347 : vector<16x8xf32> to vector<2x8x8xf32>
    %c304_114 = arith.constant 304 : index
    %c0_115 = arith.constant 0 : index
    %349 = vector.load %arg3[%c304_114, %c0_115] : memref<312x128xf32, #tpu.memory_space<vmem>>, vector<8x128xf32>
    %350 = vector.shape_cast %148 : vector<2x8x6xf32> to vector<16x6xf32>
    %c256 = arith.constant 256 : index
    %c0_116 = arith.constant 0 : index
    %351 = vector.load %arg3[%c256, %c0_116] : memref<312x128xf32, #tpu.memory_space<vmem>>, vector<6x5xf32>
    %cst_117 = arith.constant dense<0.000000e+00> : vector<16x5xf32>
    %352 = tpu.matmul %350, %351, %cst_117 {dimension_numbers = #tpu.dot_dimension_numbers<[1], [0], [0], [1], [0, 0, 1, 1], [], []>} : vector<16x6xf32>, vector<6x5xf32>, vector<16x5xf32> -> vector<16x5xf32>
    %c264 = arith.constant 264 : index
    %c0_118 = arith.constant 0 : index
    %353 = vector.load %arg3[%c264, %c0_118] : memref<312x128xf32, #tpu.memory_space<vmem>>, vector<6x5xf32>
    %cst_119 = arith.constant dense<0.000000e+00> : vector<16x5xf32>
    %354 = tpu.matmul %350, %353, %cst_119 {dimension_numbers = #tpu.dot_dimension_numbers<[1], [0], [0], [1], [0, 0, 1, 1], [], []>} : vector<16x6xf32>, vector<6x5xf32>, vector<16x5xf32> -> vector<16x5xf32>
    %355 = vector.shape_cast %93 : vector<2x8x4xf32> to vector<16x4xf32>
    %c272 = arith.constant 272 : index
    %c0_120 = arith.constant 0 : index
    %356 = vector.load %arg3[%c272, %c0_120] : memref<312x128xf32, #tpu.memory_space<vmem>>, vector<4x5xf32>
    %cst_121 = arith.constant dense<0.000000e+00> : vector<16x5xf32>
    %357 = tpu.matmul %355, %356, %cst_121 {dimension_numbers = #tpu.dot_dimension_numbers<[1], [0], [0], [1], [0, 0, 1, 1], [], []>} : vector<16x4xf32>, vector<4x5xf32>, vector<16x5xf32> -> vector<16x5xf32>
    %c280 = arith.constant 280 : index
    %c0_122 = arith.constant 0 : index
    %358 = vector.load %arg3[%c280, %c0_122] : memref<312x128xf32, #tpu.memory_space<vmem>>, vector<4x5xf32>
    %cst_123 = arith.constant dense<0.000000e+00> : vector<16x5xf32>
    %359 = tpu.matmul %355, %358, %cst_123 {dimension_numbers = #tpu.dot_dimension_numbers<[1], [0], [0], [1], [0, 0, 1, 1], [], []>} : vector<16x4xf32>, vector<4x5xf32>, vector<16x5xf32> -> vector<16x5xf32>
    %360 = arith.addf %352, %357 : vector<16x5xf32>
    %361 = arith.addf %354, %359 : vector<16x5xf32>
    %362 = vector.shape_cast %256 : vector<2x8x4xf32> to vector<16x4xf32>
    %c288 = arith.constant 288 : index
    %c0_124 = arith.constant 0 : index
    %363 = vector.load %arg3[%c288, %c0_124] : memref<312x128xf32, #tpu.memory_space<vmem>>, vector<4x5xf32>
    %cst_125 = arith.constant dense<0.000000e+00> : vector<16x5xf32>
    %364 = tpu.matmul %362, %363, %cst_125 {dimension_numbers = #tpu.dot_dimension_numbers<[1], [0], [0], [1], [0, 0, 1, 1], [], []>} : vector<16x4xf32>, vector<4x5xf32>, vector<16x5xf32> -> vector<16x5xf32>
    %c296 = arith.constant 296 : index
    %c0_126 = arith.constant 0 : index
    %365 = vector.load %arg3[%c296, %c0_126] : memref<312x128xf32, #tpu.memory_space<vmem>>, vector<4x5xf32>
    %cst_127 = arith.constant dense<0.000000e+00> : vector<16x5xf32>
    %366 = tpu.matmul %362, %365, %cst_127 {dimension_numbers = #tpu.dot_dimension_numbers<[1], [0], [0], [1], [0, 0, 1, 1], [], []>} : vector<16x4xf32>, vector<4x5xf32>, vector<16x5xf32> -> vector<16x5xf32>
    %367 = arith.addf %360, %364 : vector<16x5xf32>
    %368 = arith.addf %361, %366 : vector<16x5xf32>
    %369 = vector.shape_cast %368 : vector<16x5xf32> to vector<2x8x5xf32>
    "tpu.trace_start"() <{level = 10 : i32, message = "bij,bjc->bic"}> : () -> ()
    %cst_128 = arith.constant dense<0.000000e+00> : vector<2x8x5xf32>
    %370 = tpu.matmul %348, %369, %cst_128 {dimension_numbers = #tpu.dot_dimension_numbers<[2], [1], [1], [2], [0, 0, 0, 1, 1, 2], [0], [0]>} : vector<2x8x8xf32>, vector<2x8x5xf32>, vector<2x8x5xf32> -> vector<2x8x5xf32>
    "tpu.trace_stop"() : () -> ()
    %371 = vector.shape_cast %367 : vector<16x5xf32> to vector<2x8x5xf32>
    %372 = arith.addf %371, %370 : vector<2x8x5xf32>
    %373 = vector.extract_strided_slice %349 {offsets = [5, 0], sizes = [1, 5], strides = [1, 1]} : vector<8x128xf32> to vector<1x5xf32>
    %374 = vector.shape_cast %373 : vector<1x5xf32> to vector<1x1x5xf32>
    %375 = vector.broadcast %374 : vector<1x1x5xf32> to vector<2x8x5xf32>
    %376 = arith.addf %372, %375 : vector<2x8x5xf32>
    %377 = vector.extract_strided_slice %376 {offsets = [0, 0, 0], sizes = [2, 1, 5], strides = [1, 1, 1]} : vector<2x8x5xf32> to vector<2x1x5xf32>
    %378 = vector.shape_cast %377 : vector<2x1x5xf32> to vector<2x5xf32>
    %c0_129 = arith.constant 0 : index
    %c0_130 = arith.constant 0 : index
    %379 = vector.load %arg4[%c0_129, %c0_130] : memref<2x5xf32, #tpu.memory_space<vmem>>, vector<2x5xf32>
    tpu.vector_store %arg4[%c0_129, %c0_130], %378 {strides = array<i32>} : memref<2x5xf32, #tpu.memory_space<vmem>>, vector<2x5xf32>,
    return
  }
}

</mosaic_0001>

<bundles_post_ra>
// kernel: gnn_active_forward.1
= control target key start
LH: loop header
LB: loop body
LE: loop exit
PB: predicated region body
PF: predicated region fallthrough
CT: control target
= control target key end

     0   :  { %9 = vsyncpa [#allocation3], 0  ;;  %s9361_s0 = inlined_call_operand.vmem [shape: f32[2,8,6], index: 0, kind: input, shape index: {}]   ;;  %s9362_s1 = inlined_call_operand.vmem [shape: f32[2,8,6], index: 1, kind: input, shape index: {}]   ;;  %s9363_s2 = inlined_call_operand.vmem [shape: f32[2,8], index: 2, kind: input, shape index: {}]   ;;  %s9364_s3 = inlined_call_operand.hbm [shape: f32[312,128], index: 3, kind: input, shape index: {}]   ;;  %s9365_s4 = inlined_call_operand.hbm [shape: f32[2,5], index: 4, kind: output, shape index: {}]  }
   0x1   :  { %10 = vsyncpa [#allocation4], 0  ;;  %s7971_s15 = smov [#allocation2]   ;;  %s7923_s19 = scalar_lea.hbm %s9364_s3, 4992 }
   0x2   :  { %s22_s16 = sshll.u32 %s7971_s15, 4  ;;  %p7924_p0 = scmp.ne.s32.totalorder %s9364_s3, %s7923_s19  ;;  %s23_s16 = int_to_ptr.vmem [resolvable:$true] %s22_s16 }
   0x3   :  { %p7927_p1 = scmp.lt.u32.totalorder %s7923_s19, %s9364_s3 }
   0x5   :  { %p7929_p2 = pnand %p7927_p1, %p7924_p0 }
   0x7   :  { %7932 = shalt.err (!%p7929_p2)
}
   0x8   :  { %s7933_s24 = scalar_lea.vmem %s23_s16, 4992  ;;  %p7938_p4 = scmp.lt.s32.totalorder %s23_s16, %s23_s16 }
   0x9   :  { %p7934_p3 = scmp.ne.s32.totalorder %s23_s16, %s7933_s24  ;;  %p7939_p5 = scmp.lt.s32.totalorder %s7933_s24, %s7933_s24 }
   0xb   :  { %p7940_p6 = por %p7939_p5, %p7938_p4 }
   0xd   :  { %p7941_p7 = pnand %p7940_p6, %p7934_p3 }
   0xf   :  { %7944 = shalt.err (!%p7941_p7)
}
  0x10   :  { %s7972_s25 = smov 128   ;;  %s7973_s26 = smov 8  }
  0x11   :  { %28 = dma.hbm_to_vmem [thread:$0]  %s9364_s3, 4992, %s23_s16, [#allocation3], %s7972_s25, %s7972_s25, %s7973_s26  }
  0x12   :  { %7967 = dma.done.wait [#allocation3], 4992  }
  0x13   :  { %7968 = vsyncadd [#allocation3], 4294962304  ;;  %v44_v0 = vlaneseq  ;;  %v7974_v1 = vmov 1966171168   ;;  %vm304_vm0 = vcmask 1045504   ;;  %v8024_v7 = vld [vmem:[%s9361_s0] sm:$0xff] }
  0x14   :  { %v42_v2 = vunpack.c.l.s4 %v7974_v1  ;;  %v250_v6 = vld [vmem:[#allocation2] sm:$0x3f]  ;;  %v8029_v8 = vld [vmem:[%s9361_s0 + $0x8] sm:$0xff]  ;;  %v40_v11 = vcombine.high %v8024_v7, %v8024_v7  ;;  %vm255_vm1 = vcmask 48128   ;;  %vm507_vm4 = vcmask 130048  }
  0x15   :  { %v8016_v3 = vshrl.u32 %v44_v0, 7  ;;  %7293 = vmatprep.subr.msk.mxu0 %vm304_vm0, %v250_v6  ;;  %v89_v22 = vcombine.high %v8029_v8, %v8029_v8 }
  0x16   :  { %v43_v4 = vunpack.c.0.s8 %v42_v2  ;;  %7294 = vmatpush3.msk.msra.mxu0 %vm304_vm0, %v250_v6 }
  0x17   :  { %v8035_v10 = vsub.s32 0, %v8016_v3 }
  0x18   :  { %v8019_v5 = vsub.s32 %v43_v4, %v8016_v3 }
  0x19   :  { %9396 = vst [vmem:[#allocation8_spill] sm:$0xff] %v8035_v10 }
  0x1a   :  { %v47_v9 = vrot.slane %v8024_v7, %v8019_v5  ;;  %v96_v12 = vrot.slane %v8029_v8, %v8019_v5  ;;  %v54_v15 = vrot.slane %v40_v11, %v8019_v5  ;;  %v103_v46 = vrot.slane %v89_v22, %v8019_v5 }
  0x1c   :  { %v55_v13 = vcombine.high %v47_v9, %v47_v9  ;;  %v63_v14 = vrot.slane %v47_v9, %v8019_v5  ;;  %v70_v19 = vrot.slane %v54_v15, %v8019_v5  ;;  %v56_v20 = vcombine.high %v54_v15, %v54_v15 }
  0x1d   :  { %v112_v21 = vrot.slane %v96_v12, %v8019_v5  ;;  %v104_v30 = vcombine.high %v96_v12, %v96_v12  ;;  %v105_v55 = vcombine.high %v103_v46, %v103_v46  ;;  %v119_v59 = vrot.slane %v103_v46, %v8019_v5 }
  0x1e   :  { %v85_v16 = vcombine.high %v63_v14, %v63_v14  ;;  %v141_v17 = vrot.slane %v63_v14, %v8035_v10  ;;  %v77_v18 = vrot.slane %v55_v13, %v8019_v5  ;;  %v157_v27 = vrot.slane %v70_v19, %v8035_v10 }
  0x1f   :  { %v84_v28 = vrot.slane %v56_v20, %v8019_v5  ;;  %v86_v29 = vcombine.high %v70_v19, %v70_v19  ;;  %v126_v42 = vrot.slane %v104_v30, %v8019_v5  ;;  %v173_v49 = vrot.slane %v112_v21, %v8035_v10  ;;  %v750_v30 = vld [vmem:[#allocation2 + $0x20] sm:$0xff] }
  0x20   :  { %v218_v23 = vsub.f32 %v141_v17, %v8024_v7  ;;  %v145_v24 = vrot.slane %v77_v18, %v8035_v10  ;;  %v149_v25 = vrot.slane %v85_v16, %v8035_v10  ;;  %v87_v26 = vcombine.high %v77_v18, %v77_v18 }
  0x21   :  { %v222_v35 = vsub.f32 %v157_v27, %v8024_v7  ;;  %v161_v36 = vrot.slane %v84_v28, %v8035_v10  ;;  %v165_v37 = vrot.slane %v86_v29, %v8035_v10  ;;  %v88_v38 = vcombine.high %v84_v28, %v84_v28  ;;  %v502_v27 = vld [vmem:[#allocation2 + $0x10] sm:$0xff]  ;;  %v749_v29 = vld [vmem:[#allocation2 + $0x18] sm:$0xff] }
  0x22   :  { %v234_v31 = vand.u32 2147483647, %v218_v23  ;;  %v219_v32 = vsub.f32 %v145_v24, %v8024_v7  ;;  %v220_v33 = vsub.f32 %v149_v25, %v8024_v7  ;;  %v153_v34 = vrot.slane %v87_v26, %v8035_v10  ;;  %v501_v26 = vld [vmem:[#allocation2 + $0x8] sm:$0xff] }
  0x23   :  { %v223_v44 = vsub.f32 %v161_v36, %v8024_v7  ;;  %v169_v45 = vrot.slane %v88_v38, %v8035_v10  ;;  %v238_v47 = vand.u32 2147483647, %v222_v35  ;;  %v224_v48 = vsub.f32 %v165_v37, %v8024_v7 }
  0x24   :  { %7295 = vmatprep.mubr.msk.f32.mxu0 %vm255_vm1, %v234_v31  ;;  %v235_v39 = vand.u32 2147483647, %v219_v32  ;;  %v236_v40 = vand.u32 2147483647, %v220_v33  ;;  %v221_v41 = vsub.f32 %v153_v34, %v8024_v7  ;;  %v134_v50 = vcombine.high %v112_v21, %v112_v21 }
  0x25   :  { %v177_v51 = vrot.slane %v126_v42, %v8035_v10  ;;  %v239_v52 = vand.u32 2147483647, %v223_v44  ;;  %v225_v53 = vsub.f32 %v169_v45, %v8024_v7  ;;  %v136_v54 = vcombine.high %v126_v42, %v126_v42 }
  0x26   :  { %7296 = vmatmul.mubr.msk.f32.vlgmr.msra.gmra.mrb[0].mxu0 %vm255_vm1, %v235_v39  ;;  %v237_v43 = vand.u32 2147483647, %v221_v41  ;;  %v240_v56 = vand.u32 2147483647, %v224_v48  ;;  %v226_v57 = vsub.f32 %v173_v49, %v8029_v8  ;;  %v181_v58 = vrot.slane %v134_v50, %v8035_v10 }
  0x27   :  { %7298 = vmatprep.mubr.msk.f32.mxu0 %vm255_vm1, %v236_v40  ;;  %v241_v60 = vand.u32 2147483647, %v225_v53  ;;  %v227_v61 = vsub.f32 %v177_v51, %v8029_v8  ;;  %v185_v62 = vrot.slane %v136_v54, %v8035_v10  ;;  %v133_v63 = vrot.slane %v105_v55, %v8019_v5 }
  0x28   :  { %v242_v1 = vand.u32 2147483647, %v226_v57  ;;  %v228_v2 = vsub.f32 %v181_v58, %v8029_v8  ;;  %v189_v4 = vrot.slane %v119_v59, %v8035_v10  ;;  %v135_v6 = vcombine.high %v119_v59, %v119_v59 }
  0x29   :  { %v243_v9 = vand.u32 2147483647, %v227_v61  ;;  %v229_v11 = vsub.f32 %v185_v62, %v8029_v8  ;;  %v193_v12 = vrot.slane %v133_v63, %v8035_v10  ;;  %v137_v13 = vcombine.high %v133_v63, %v133_v63 }
  0x2a   :  { %7299 = vmatmul.mubr.msk.f32.gmra.mrb[2].mxu0 %vm255_vm1, %v237_v43  ;;  %v244_v14 = vand.u32 2147483647, %v228_v2  ;;  %v230_v15 = vsub.f32 %v189_v4, %v8029_v8  ;;  %v197_v16 = vrot.slane %v135_v6, %v8035_v10  ;;  %v7795_v28 = vpack.c.bf16 %v502_v27, %v501_v26 }
  0x2b   :  { %7301 = vmatprep.mubr.msk.f32.mxu0 %vm255_vm1, %v238_v47  ;;  %v245_v17 = vand.u32 2147483647, %v229_v11  ;;  %v231_v18 = vsub.f32 %v193_v12, %v8029_v8  ;;  %v201_v19 = vrot.slane %v137_v13, %v8035_v10  ;;  %v7799_v31 = vpack.c.bf16 %v750_v30, %v749_v29 }
  0x2c   :  { %v246_v20 = vand.u32 2147483647, %v230_v15  ;;  %v232_v21 = vsub.f32 %v197_v16, %v8029_v8  ;;  %7796 = vmatprep.subr.bf16.mxu1 %v7795_v28 }
  0x2d   :  { %v247_v22 = vand.u32 2147483647, %v231_v18  ;;  %v233_v23 = vsub.f32 %v201_v19, %v8029_v8  ;;  %7798 = vmatpush3.bf16.msra.mxu1 %v7795_v28  ;;  %7800 = vmatprep.subr.bf16.mxu0 %v7799_v31  ;;  %v8102_v8 = vld [vmem:[#allocation2 + $0x40] sm:$0xff] }
  0x2e   :  { %7302 = vmatmul.mubr.msk.f32.gmra.mrb[4].mxu0 %vm255_vm1, %v239_v52  ;;  %v248_v24 = vand.u32 2147483647, %v232_v21  ;;  %v8106_v32 = vrot.slane %v8102_v8, %v8035_v10 }
  0x2f   :  { %7304 = vmatprep.mubr.msk.f32.mxu0 %vm255_vm1, %v240_v56  ;;  %v249_v25 = vand.u32 2147483647, %v233_v23  ;;  %7802 = vmatpush3.bf16.msra.mxu0 %v7799_v31 }
  0x32   :  { %7305 = vmatmul.mubr.msk.f32.gmra.mrb[6].mxu0 %vm255_vm1, %v241_v60 }
  0x33   :  { %7307 = vmatprep.mubr.msk.f32.mxu0 %vm255_vm1, %v242_v1 }
  0x36   :  { %7308 = vmatmul.mubr.msk.f32.gmra.mrb[8].mxu0 %vm255_vm1, %v243_v9 }
  0x37   :  { %7310 = vmatprep.mubr.msk.f32.mxu0 %vm255_vm1, %v244_v14 }
  0x3a   :  { %7311 = vmatmul.mubr.msk.f32.gmra.mrb[10].mxu0 %vm255_vm1, %v245_v17 }
  0x3b   :  { %7313 = vmatprep.mubr.msk.f32.mxu0 %vm255_vm1, %v246_v20 }
  0x3e   :  { %7314 = vmatmul.mubr.msk.f32.gmra.mrb[12].mxu0 %vm255_vm1, %v247_v22 }
  0x3f   :  { %7316 = vmatprep.mubr.msk.f32.mxu0 %vm255_vm1, %v248_v24 }
  0x42   :  { %7317 = vmatmul.mubr.msk.f32.gmra.mrb[14].mxu0 %vm255_vm1, %v249_v25 }
  0xf9   :  { %v7297_v33 = vpop.f32.mrb[0].mxu0 }
  0xfa   :  { %v380_v34 = vadd.f32 %v7297_v33, %v8106_v32  ;;  %v374_v35 = vpop.f32.mrb[1].mxu0 }
  0xfb   :  { %v375_v36 = vadd.f32 %v374_v35, %v8106_v32 }
  0xfc   :  { %v470_v37 = vmul.f32 0.01, %v380_v34  ;;  %vm454_vm2 = vcmp.gt.f32.partialorder %v380_v34, 0.0 }
  0xfd   :  { %v7300_v38 = vpop.f32.mrb[2].mxu0  ;;  %vm453_vm3 = vcmp.gt.f32.partialorder %v375_v36, 0.0  ;;  %v469_v39 = vmul.f32 0.01, %v375_v36 }
  0xfe   :  { %v390_v40 = vadd.f32 %v7300_v38, %v8106_v32  ;;  %v384_v41 = vpop.f32.mrb[3].mxu0  ;;  %v486_v45 = vsel %vm454_vm2, %v380_v34, %v470_v37 }
  0xff   :  { %v385_v42 = vadd.f32 %v384_v41, %v8106_v32  ;;  %v485_v43 = vsel %vm453_vm3, %v375_v36, %v469_v39 }
 0x100   :  { %v472_v44 = vmul.f32 0.01, %v390_v40  ;;  %7323 = vmatprep.mubr.msk.f32.mxu1 %vm507_vm4, %v485_v43  ;;  %vm456_vm5 = vcmp.gt.f32.partialorder %v390_v40, 0.0 }
 0x101   :  { %vm455_vm6 = vcmp.gt.f32.partialorder %v385_v42, 0.0  ;;  %v471_v46 = vmul.f32 0.01, %v385_v42  ;;  %v7303_v47 = vpop.f32.mrb[4].mxu0  ;;  %7324 = vmatmul.mubr.msk.f32.vlgmr.msra.gmra.mrb[0].mxu1 %vm507_vm4, %v486_v45 }
 0x102   :  { %v400_v48 = vadd.f32 %v7303_v47, %v8106_v32  ;;  %v394_v49 = vpop.f32.mrb[5].mxu0  ;;  %v488_v53 = vsel %vm456_vm5, %v390_v40, %v472_v44  ;;  %v996_v40 = vld [vmem:[#allocation2 + $0x28] sm:$0xff] }
 0x103   :  { %v395_v50 = vadd.f32 %v394_v49, %v8106_v32  ;;  %v487_v51 = vsel %vm455_vm6, %v385_v42, %v471_v46  ;;  %7375 = vmatprep.subr.mxu1 %v996_v40 }
 0x104   :  { %v474_v52 = vmul.f32 0.01, %v400_v48  ;;  %7326 = vmatprep.mubr.msk.f32.mxu1 %vm507_vm4, %v487_v51  ;;  %vm458_vm7 = vcmp.gt.f32.partialorder %v400_v48, 0.0  ;;  %7376 = vmatpush3.msra.mxu1 %v996_v40 }
 0x105   :  { %vm457_vm8 = vcmp.gt.f32.partialorder %v395_v50, 0.0  ;;  %v473_v54 = vmul.f32 0.01, %v395_v50  ;;  %v7306_v55 = vpop.f32.mrb[6].mxu0  ;;  %7327 = vmatmul.mubr.msk.f32.gmra.mrb[2].mxu1 %vm507_vm4, %v488_v53 }
 0x106   :  { %v410_v56 = vadd.f32 %v7306_v55, %v8106_v32  ;;  %v404_v57 = vpop.f32.mrb[7].mxu0  ;;  %v490_v61 = vsel %vm458_vm7, %v400_v48, %v474_v52 }
 0x107   :  { %v405_v58 = vadd.f32 %v404_v57, %v8106_v32  ;;  %v489_v59 = vsel %vm457_vm8, %v395_v50, %v473_v54 }
 0x108   :  { %v476_v60 = vmul.f32 0.01, %v410_v56  ;;  %7329 = vmatprep.mubr.msk.f32.mxu1 %vm507_vm4, %v489_v59  ;;  %vm460_vm9 = vcmp.gt.f32.partialorder %v410_v56, 0.0 }
 0x109   :  { %vm459_vm10 = vcmp.gt.f32.partialorder %v405_v58, 0.0  ;;  %v475_v62 = vmul.f32 0.01, %v405_v58  ;;  %v7309_v63 = vpop.f32.mrb[8].mxu0  ;;  %7330 = vmatmul.mubr.msk.f32.gmra.mrb[4].mxu1 %vm507_vm4, %v490_v61 }
 0x10a   :  { %v420_v1 = vadd.f32 %v7309_v63, %v8106_v32  ;;  %v414_v2 = vpop.f32.mrb[9].mxu0  ;;  %v492_v11 = vsel %vm460_vm9, %v410_v56, %v476_v60 }
 0x10b   :  { %v415_v4 = vadd.f32 %v414_v2, %v8106_v32  ;;  %v491_v6 = vsel %vm459_vm10, %v405_v58, %v475_v62 }
 0x10c   :  { %v478_v9 = vmul.f32 0.01, %v420_v1  ;;  %7332 = vmatprep.mubr.msk.f32.mxu1 %vm507_vm4, %v491_v6  ;;  %vm462_vm11 = vcmp.gt.f32.partialorder %v420_v1, 0.0 }
 0x10d   :  { %vm461_vm12 = vcmp.gt.f32.partialorder %v415_v4, 0.0  ;;  %v477_v12 = vmul.f32 0.01, %v415_v4  ;;  %v7312_v13 = vpop.f32.mrb[10].mxu0  ;;  %7333 = vmatmul.mubr.msk.f32.gmra.mrb[6].mxu1 %vm507_vm4, %v492_v11 }
 0x10e   :  { %v430_v14 = vadd.f32 %v7312_v13, %v8106_v32  ;;  %v424_v15 = vpop.f32.mrb[11].mxu0  ;;  %v494_v19 = vsel %vm462_vm11, %v420_v1, %v478_v9 }
 0x10f   :  { %v425_v16 = vadd.f32 %v424_v15, %v8106_v32  ;;  %v493_v17 = vsel %vm461_vm12, %v415_v4, %v477_v12 }
 0x110   :  { %v480_v18 = vmul.f32 0.01, %v430_v14  ;;  %7335 = vmatprep.mubr.msk.f32.mxu1 %vm507_vm4, %v493_v17  ;;  %vm464_vm13 = vcmp.gt.f32.partialorder %v430_v14, 0.0 }
 0x111   :  { %vm463_vm14 = vcmp.gt.f32.partialorder %v425_v16, 0.0  ;;  %v479_v20 = vmul.f32 0.01, %v425_v16  ;;  %v7315_v21 = vpop.f32.mrb[12].mxu0  ;;  %7336 = vmatmul.mubr.msk.f32.gmra.mrb[8].mxu1 %vm507_vm4, %v494_v19 }
 0x112   :  { %v440_v22 = vadd.f32 %v7315_v21, %v8106_v32  ;;  %v434_v23 = vpop.f32.mrb[13].mxu0  ;;  %v496_v27 = vsel %vm464_vm13, %v430_v14, %v480_v18 }
 0x113   :  { %v435_v24 = vadd.f32 %v434_v23, %v8106_v32  ;;  %v495_v25 = vsel %vm463_vm14, %v425_v16, %v479_v20 }
 0x114   :  { %vm466_vm15 = vcmp.gt.f32.partialorder %v440_v22, 0.0  ;;  %v482_v26 = vmul.f32 0.01, %v440_v22  ;;  %7338 = vmatprep.mubr.msk.f32.mxu1 %vm507_vm4, %v495_v25 }
 0x115   :  { %vm465_vm2 = vcmp.gt.f32.partialorder %v435_v24, 0.0  ;;  %v481_v28 = vmul.f32 0.01, %v435_v24  ;;  %v7318_v29 = vpop.f32.mrb[14].mxu0  ;;  %7339 = vmatmul.mubr.msk.f32.gmra.mrb[10].mxu1 %vm507_vm4, %v496_v27 }
 0x116   :  { %v450_v30 = vadd.f32 %v7318_v29, %v8106_v32  ;;  %v444_v31 = vpop.f32.mrb[15].mxu0  ;;  %v498_v33 = vsel %vm466_vm15, %v440_v22, %v482_v26 }
 0x117   :  { %v445_v34 = vadd.f32 %v444_v31, %v8106_v32  ;;  %v497_v35 = vsel %vm465_vm2, %v435_v24, %v481_v28  ;;  %v8141_v32 = vsub.s32 1, %v8016_v3 }
 0x118   :  { %vm468_vm3 = vcmp.gt.f32.partialorder %v450_v30, 0.0  ;;  %v484_v36 = vmul.f32 0.01, %v450_v30  ;;  %7341 = vmatprep.mubr.msk.f32.mxu1 %vm507_vm4, %v497_v35 }
 0x119   :  { %vm467_vm5 = vcmp.gt.f32.partialorder %v445_v34, 0.0  ;;  %v483_v37 = vmul.f32 0.01, %v445_v34  ;;  %7342 = vmatmul.mubr.msk.f32.gmra.mrb[12].mxu1 %vm507_vm4, %v498_v33  ;;  %9397 = vst [vmem:[#allocation9_spill] sm:$0xff] %v8141_v32  ;;  %v8145_v41 = vrot.slane %v8102_v8, %v8141_v32 }
 0x11a   :  { %v500_v38 = vsel %vm468_vm3, %v450_v30, %v484_v36 }
 0x11b   :  { %v499_v39 = vsel %vm467_vm5, %v445_v34, %v483_v37 }
 0x11c   :  { %7344 = vmatprep.mubr.msk.f32.mxu1 %vm507_vm4, %v499_v39 }
 0x11d   :  { %7345 = vmatmul.mubr.msk.f32.gmra.mrb[14].mxu1 %vm507_vm4, %v500_v38 }
 0x1d4   :  { %v7325_v42 = vpop.f32.mrb[0].mxu1 }
 0x1d5   :  { %v628_v43 = vadd.f32 %v7325_v42, %v8145_v41  ;;  %v622_v44 = vpop.f32.mrb[1].mxu1 }
 0x1d6   :  { %v623_v45 = vadd.f32 %v622_v44, %v8145_v41 }
 0x1d7   :  { %v718_v46 = vmul.f32 0.01, %v628_v43  ;;  %vm702_vm6 = vcmp.gt.f32.partialorder %v628_v43, 0.0 }
 0x1d8   :  { %vm701_vm7 = vcmp.gt.f32.partialorder %v623_v45, 0.0  ;;  %v717_v47 = vmul.f32 0.01, %v623_v45  ;;  %v7328_v48 = vpop.f32.mrb[2].mxu1 }
 0x1d9   :  { %v638_v49 = vadd.f32 %v7328_v48, %v8145_v41  ;;  %v632_v50 = vpop.f32.mrb[3].mxu1  ;;  %v734_v53 = vsel %vm702_vm6, %v628_v43, %v718_v46 }
 0x1da   :  { %v633_v51 = vadd.f32 %v632_v50, %v8145_v41  ;;  %v733_v52 = vsel %vm701_vm7, %v623_v45, %v717_v47 }
 0x1db   :  { %v720_v54 = vmul.f32 0.01, %v638_v49  ;;  %7351 = vmatprep.mubr.msk.f32.mxu0 %vm507_vm4, %v733_v52  ;;  %vm704_vm8 = vcmp.gt.f32.partialorder %v638_v49, 0.0 }
 0x1dc   :  { %vm703_vm9 = vcmp.gt.f32.partialorder %v633_v51, 0.0  ;;  %v719_v55 = vmul.f32 0.01, %v633_v51  ;;  %v7331_v56 = vpop.f32.mrb[4].mxu1  ;;  %7352 = vmatmul.mubr.msk.f32.vlgmr.msra.gmra.mrb[16].mxu0 %vm507_vm4, %v734_v53 }
 0x1dd   :  { %v648_v57 = vadd.f32 %v7331_v56, %v8145_v41  ;;  %v642_v58 = vpop.f32.mrb[5].mxu1  ;;  %v736_v62 = vsel %vm704_vm8, %v638_v49, %v720_v54 }
 0x1de   :  { %v643_v59 = vadd.f32 %v642_v58, %v8145_v41  ;;  %v735_v60 = vsel %vm703_vm9, %v633_v51, %v719_v55 }
 0x1df   :  { %v722_v61 = vmul.f32 0.01, %v648_v57  ;;  %7354 = vmatprep.mubr.msk.f32.mxu0 %vm507_vm4, %v735_v60  ;;  %vm706_vm10 = vcmp.gt.f32.partialorder %v648_v57, 0.0 }
 0x1e0   :  { %vm705_vm11 = vcmp.gt.f32.partialorder %v643_v59, 0.0  ;;  %v721_v63 = vmul.f32 0.01, %v643_v59  ;;  %v7334_v1 = vpop.f32.mrb[6].mxu1  ;;  %7355 = vmatmul.mubr.msk.f32.gmra.mrb[18].mxu0 %vm507_vm4, %v736_v62 }
 0x1e1   :  { %v658_v2 = vadd.f32 %v7334_v1, %v8145_v41  ;;  %v652_v4 = vpop.f32.mrb[7].mxu1  ;;  %v738_v12 = vsel %vm706_vm10, %v648_v57, %v722_v61 }
 0x1e2   :  { %v653_v6 = vadd.f32 %v652_v4, %v8145_v41  ;;  %v737_v9 = vsel %vm705_vm11, %v643_v59, %v721_v63  ;;  %vm1001_vm11 = vcmask 64512  }
 0x1e3   :  { %v724_v11 = vmul.f32 0.01, %v658_v2  ;;  %7357 = vmatprep.mubr.msk.f32.mxu0 %vm507_vm4, %v737_v9  ;;  %vm708_vm12 = vcmp.gt.f32.partialorder %v658_v2, 0.0 }
 0x1e4   :  { %vm707_vm13 = vcmp.gt.f32.partialorder %v653_v6, 0.0  ;;  %v723_v13 = vmul.f32 0.01, %v653_v6  ;;  %v7337_v14 = vpop.f32.mrb[8].mxu1  ;;  %7358 = vmatmul.mubr.msk.f32.gmra.mrb[20].mxu0 %vm507_vm4, %v738_v12 }
 0x1e5   :  { %v668_v15 = vadd.f32 %v7337_v14, %v8145_v41  ;;  %v662_v16 = vpop.f32.mrb[9].mxu1  ;;  %v740_v20 = vsel %vm708_vm12, %v658_v2, %v724_v11 }
 0x1e6   :  { %v663_v17 = vadd.f32 %v662_v16, %v8145_v41  ;;  %v739_v18 = vsel %vm707_vm13, %v653_v6, %v723_v13 }
 0x1e7   :  { %v726_v19 = vmul.f32 0.01, %v668_v15  ;;  %7360 = vmatprep.mubr.msk.f32.mxu0 %vm507_vm4, %v739_v18  ;;  %vm710_vm14 = vcmp.gt.f32.partialorder %v668_v15, 0.0 }
 0x1e8   :  { %vm709_vm15 = vcmp.gt.f32.partialorder %v663_v17, 0.0  ;;  %v725_v21 = vmul.f32 0.01, %v663_v17  ;;  %v7340_v22 = vpop.f32.mrb[10].mxu1  ;;  %7361 = vmatmul.mubr.msk.f32.gmra.mrb[22].mxu0 %vm507_vm4, %v740_v20 }
 0x1e9   :  { %v678_v23 = vadd.f32 %v7340_v22, %v8145_v41  ;;  %v672_v24 = vpop.f32.mrb[11].mxu1  ;;  %v742_v28 = vsel %vm710_vm14, %v668_v15, %v726_v19 }
 0x1ea   :  { %v673_v25 = vadd.f32 %v672_v24, %v8145_v41  ;;  %v741_v26 = vsel %vm709_vm15, %v663_v17, %v725_v21 }
 0x1eb   :  { %v728_v27 = vmul.f32 0.01, %v678_v23  ;;  %7363 = vmatprep.mubr.msk.f32.mxu0 %vm507_vm4, %v741_v26  ;;  %vm712_vm2 = vcmp.gt.f32.partialorder %v678_v23, 0.0 }
 0x1ec   :  { %vm711_vm3 = vcmp.gt.f32.partialorder %v673_v25, 0.0  ;;  %v727_v29 = vmul.f32 0.01, %v673_v25  ;;  %v7343_v30 = vpop.f32.mrb[12].mxu1  ;;  %7364 = vmatmul.mubr.msk.f32.gmra.mrb[24].mxu0 %vm507_vm4, %v742_v28 }
 0x1ed   :  { %v688_v31 = vadd.f32 %v7343_v30, %v8145_v41  ;;  %v682_v33 = vpop.f32.mrb[13].mxu1  ;;  %v744_v37 = vsel %vm712_vm2, %v678_v23, %v728_v27 }
 0x1ee   :  { %v683_v34 = vadd.f32 %v682_v33, %v8145_v41  ;;  %v743_v35 = vsel %vm711_vm3, %v673_v25, %v727_v29 }
 0x1ef   :  { %v730_v36 = vmul.f32 0.01, %v688_v31  ;;  %7366 = vmatprep.mubr.msk.f32.mxu0 %vm507_vm4, %v743_v35  ;;  %vm714_vm5 = vcmp.gt.f32.partialorder %v688_v31, 0.0 }
 0x1f0   :  { %vm713_vm6 = vcmp.gt.f32.partialorder %v683_v34, 0.0  ;;  %v729_v38 = vmul.f32 0.01, %v683_v34  ;;  %v7346_v39 = vpop.f32.mrb[14].mxu1  ;;  %7367 = vmatmul.mubr.msk.f32.gmra.mrb[26].mxu0 %vm507_vm4, %v744_v37 }
 0x1f1   :  { %v698_v40 = vadd.f32 %v7346_v39, %v8145_v41  ;;  %v692_v42 = vpop.f32.mrb[15].mxu1  ;;  %v746_v46 = vsel %vm714_vm5, %v688_v31, %v730_v36 }
 0x1f2   :  { %v693_v43 = vadd.f32 %v692_v42, %v8145_v41  ;;  %v745_v44 = vsel %vm713_vm6, %v683_v34, %v729_v38  ;;  %v8182_v41 = vsub.s32 2, %v8016_v3 }
 0x1f3   :  { %vm716_vm7 = vcmp.gt.f32.partialorder %v698_v40, 0.0  ;;  %v732_v45 = vmul.f32 0.01, %v698_v40  ;;  %7369 = vmatprep.mubr.msk.f32.mxu0 %vm507_vm4, %v745_v44 }
 0x1f4   :  { %vm715_vm8 = vcmp.gt.f32.partialorder %v693_v43, 0.0  ;;  %v731_v47 = vmul.f32 0.01, %v693_v43  ;;  %7370 = vmatmul.mubr.msk.f32.gmra.mrb[28].mxu0 %vm507_vm4, %v746_v46  ;;  %9398 = vst [vmem:[#allocation10_spill] sm:$0xff] %v8182_v41  ;;  %v8186_v50 = vrot.slane %v8102_v8, %v8182_v41 }
 0x1f5   :  { %v748_v48 = vsel %vm716_vm7, %v698_v40, %v732_v45 }
 0x1f6   :  { %v747_v49 = vsel %vm715_vm8, %v693_v43, %v731_v47 }
 0x1f7   :  { %7372 = vmatprep.mubr.msk.f32.mxu0 %vm507_vm4, %v747_v49 }
 0x1f8   :  { %7373 = vmatmul.mubr.msk.f32.gmra.mrb[30].mxu0 %vm507_vm4, %v748_v48 }
 0x1f9   :  { %7403 = vmatprep.mubr.msk.f32.mxu0 %vm255_vm1, %v8024_v7 }
 0x2af   :  { %v7353_v51 = vpop.f32.mrb[16].mxu0 }
 0x2b0   :  { %v875_v52 = vadd.f32 %v7353_v51, %v8186_v50  ;;  %v869_v53 = vpop.f32.mrb[17].mxu0 }
 0x2b1   :  { %v870_v54 = vadd.f32 %v869_v53, %v8186_v50 }
 0x2b2   :  { %v965_v55 = vmul.f32 0.01, %v875_v52  ;;  %vm949_vm9 = vcmp.gt.f32.partialorder %v875_v52, 0.0 }
 0x2b3   :  { %vm948_vm10 = vcmp.gt.f32.partialorder %v870_v54, 0.0  ;;  %v964_v56 = vmul.f32 0.01, %v870_v54  ;;  %v7356_v57 = vpop.f32.mrb[18].mxu0 }
 0x2b4   :  { %v885_v58 = vadd.f32 %v7356_v57, %v8186_v50  ;;  %v879_v59 = vpop.f32.mrb[19].mxu0  ;;  %v981_v62 = vsel %vm949_vm9, %v875_v52, %v965_v55 }
 0x2b5   :  { %v880_v60 = vadd.f32 %v879_v59, %v8186_v50  ;;  %v980_v61 = vsel %vm948_vm10, %v870_v54, %v964_v56 }
 0x2b6   :  { %v967_v63 = vmul.f32 0.01, %v885_v58  ;;  %7377 = vmatprep.mubr.msk.f32.mxu1 %vm1001_vm11, %v980_v61  ;;  %vm951_vm12 = vcmp.gt.f32.partialorder %v885_v58, 0.0  ;;  %v8230_v61 = vsub.s32 4, %v8016_v3 }
 0x2b7   :  { %vm950_vm13 = vcmp.gt.f32.partialorder %v880_v60, 0.0  ;;  %v966_v1 = vmul.f32 0.01, %v880_v60  ;;  %v7359_v2 = vpop.f32.mrb[20].mxu0  ;;  %7378 = vmatmul.mubr.msk.f32.vlgmr.msra.gmra.mrb[16].mxu1 %vm1001_vm11, %v981_v62 }
 0x2b8   :  { %v895_v4 = vadd.f32 %v7359_v2, %v8186_v50  ;;  %v889_v6 = vpop.f32.mrb[21].mxu0  ;;  %v983_v13 = vsel %vm951_vm12, %v885_v58, %v967_v63  ;;  %9400 = vst [vmem:[#allocation12_spill] sm:$0xff] %v8230_v61 }
 0x2b9   :  { %v890_v9 = vadd.f32 %v889_v6, %v8186_v50  ;;  %v982_v11 = vsel %vm950_vm13, %v880_v60, %v966_v1 }
 0x2ba   :  { %v969_v12 = vmul.f32 0.01, %v895_v4  ;;  %7380 = vmatprep.mubr.msk.f32.mxu1 %vm1001_vm11, %v982_v11  ;;  %vm953_vm14 = vcmp.gt.f32.partialorder %v895_v4, 0.0 }
 0x2bb   :  { %vm952_vm15 = vcmp.gt.f32.partialorder %v890_v9, 0.0  ;;  %v968_v14 = vmul.f32 0.01, %v890_v9  ;;  %v7362_v15 = vpop.f32.mrb[22].mxu0  ;;  %7381 = vmatmul.mubr.msk.f32.gmra.mrb[18].mxu1 %vm1001_vm11, %v983_v13 }
 0x2bc   :  { %v905_v16 = vadd.f32 %v7362_v15, %v8186_v50  ;;  %v899_v17 = vpop.f32.mrb[23].mxu0  ;;  %v985_v21 = vsel %vm953_vm14, %v895_v4, %v969_v12  ;;  %v8236_v4 = vrot.slane %v8102_v8, %v8230_v61 }
 0x2bd   :  { %v900_v18 = vadd.f32 %v899_v17, %v8186_v50  ;;  %v984_v19 = vsel %vm952_vm15, %v890_v9, %v968_v14 }
 0x2be   :  { %v971_v20 = vmul.f32 0.01, %v905_v16  ;;  %7383 = vmatprep.mubr.msk.f32.mxu1 %vm1001_vm11, %v984_v19  ;;  %vm955_vm2 = vcmp.gt.f32.partialorder %v905_v16, 0.0 }
 0x2bf   :  { %vm954_vm3 = vcmp.gt.f32.partialorder %v900_v18, 0.0  ;;  %v970_v22 = vmul.f32 0.01, %v900_v18  ;;  %v7365_v23 = vpop.f32.mrb[24].mxu0  ;;  %7384 = vmatmul.mubr.msk.f32.gmra.mrb[20].mxu1 %vm1001_vm11, %v985_v21 }
 0x2c0   :  { %v915_v24 = vadd.f32 %v7365_v23, %v8186_v50  ;;  %v909_v25 = vpop.f32.mrb[25].mxu0  ;;  %v987_v29 = vsel %vm955_vm2, %v905_v16, %v971_v20 }
 0x2c1   :  { %v910_v26 = vadd.f32 %v909_v25, %v8186_v50  ;;  %v986_v27 = vsel %vm954_vm3, %v900_v18, %v970_v22 }
 0x2c2   :  { %v973_v28 = vmul.f32 0.01, %v915_v24  ;;  %7386 = vmatprep.mubr.msk.f32.mxu1 %vm1001_vm11, %v986_v27  ;;  %vm957_vm5 = vcmp.gt.f32.partialorder %v915_v24, 0.0 }
 0x2c3   :  { %vm956_vm6 = vcmp.gt.f32.partialorder %v910_v26, 0.0  ;;  %v972_v30 = vmul.f32 0.01, %v910_v26  ;;  %v7368_v31 = vpop.f32.mrb[26].mxu0  ;;  %7387 = vmatmul.mubr.msk.f32.gmra.mrb[22].mxu1 %vm1001_vm11, %v987_v29 }
 0x2c4   :  { %v925_v33 = vadd.f32 %v7368_v31, %v8186_v50  ;;  %v919_v34 = vpop.f32.mrb[27].mxu0  ;;  %v989_v38 = vsel %vm957_vm5, %v915_v24, %v973_v28 }
 0x2c5   :  { %v920_v35 = vadd.f32 %v919_v34, %v8186_v50  ;;  %v988_v36 = vsel %vm956_vm6, %v910_v26, %v972_v30 }
 0x2c6   :  { %v975_v37 = vmul.f32 0.01, %v925_v33  ;;  %7389 = vmatprep.mubr.msk.f32.mxu1 %vm1001_vm11, %v988_v36  ;;  %vm959_vm7 = vcmp.gt.f32.partialorder %v925_v33, 0.0 }
 0x2c7   :  { %vm958_vm8 = vcmp.gt.f32.partialorder %v920_v35, 0.0  ;;  %v974_v39 = vmul.f32 0.01, %v920_v35  ;;  %v7371_v40 = vpop.f32.mrb[28].mxu0  ;;  %7390 = vmatmul.mubr.msk.f32.gmra.mrb[24].mxu1 %vm1001_vm11, %v989_v38 }
 0x2c8   :  { %v935_v42 = vadd.f32 %v7371_v40, %v8186_v50  ;;  %v929_v43 = vpop.f32.mrb[29].mxu0  ;;  %v991_v47 = vsel %vm959_vm7, %v925_v33, %v975_v37 }
 0x2c9   :  { %v930_v44 = vadd.f32 %v929_v43, %v8186_v50  ;;  %v990_v45 = vsel %vm958_vm8, %v920_v35, %v974_v39 }
 0x2ca   :  { %v977_v46 = vmul.f32 0.01, %v935_v42  ;;  %7392 = vmatprep.mubr.msk.f32.mxu1 %vm1001_vm11, %v990_v45  ;;  %vm961_vm9 = vcmp.gt.f32.partialorder %v935_v42, 0.0 }
 0x2cb   :  { %vm960_vm10 = vcmp.gt.f32.partialorder %v930_v44, 0.0  ;;  %v976_v48 = vmul.f32 0.01, %v930_v44  ;;  %v7374_v49 = vpop.f32.mrb[30].mxu0  ;;  %7393 = vmatmul.mubr.msk.f32.gmra.mrb[26].mxu1 %vm1001_vm11, %v991_v47 }
 0x2cc   :  { %v945_v51 = vadd.f32 %v7374_v49, %v8186_v50  ;;  %v939_v52 = vpop.f32.mrb[31].mxu0  ;;  %v993_v56 = vsel %vm961_vm9, %v935_v42, %v977_v46 }
 0x2cd   :  { %v940_v53 = vadd.f32 %v939_v52, %v8186_v50  ;;  %v992_v54 = vsel %vm960_vm10, %v930_v44, %v976_v48  ;;  %v8223_v50 = vsub.s32 3, %v8016_v3 }
 0x2ce   :  { %v979_v55 = vmul.f32 0.01, %v945_v51  ;;  %7395 = vmatprep.mubr.msk.f32.mxu1 %vm1001_vm11, %v992_v54  ;;  %vm963_vm12 = vcmp.gt.f32.partialorder %v945_v51, 0.0 }
 0x2cf   :  { %vm962_vm13 = vcmp.gt.f32.partialorder %v940_v53, 0.0  ;;  %v978_v57 = vmul.f32 0.01, %v940_v53  ;;  %7396 = vmatmul.mubr.msk.f32.gmra.mrb[28].mxu1 %vm1001_vm11, %v993_v56  ;;  %9399 = vst [vmem:[#allocation11_spill] sm:$0xff] %v8223_v50  ;;  %v8227_v60 = vrot.slane %v8102_v8, %v8223_v50 }
 0x2d0   :  { %v995_v59 = vsel %vm963_vm12, %v945_v51, %v979_v55 }
 0x2d1   :  { %v994_v58 = vsel %vm962_vm13, %v940_v53, %v978_v57 }
 0x2d2   :  { %7398 = vmatprep.mubr.msk.f32.mxu1 %vm1001_vm11, %v994_v58 }
 0x2d3   :  { %7399 = vmatmul.mubr.msk.f32.gmra.mrb[30].mxu1 %vm1001_vm11, %v995_v59 }
 0x2d4   :  { %7408 = vmatprep.mubr.msk.f32.mxu1 %vm255_vm1, %v8024_v7 }
 0x38a   :  { %v7379_v62 = vpop.f32.mrb[16].mxu1 }
 0x38b   :  { %v1122_v63 = vadd.f32 %v7379_v62, %v8227_v60  ;;  %v1116_v1 = vpop.f32.mrb[17].mxu1 }
 0x38c   :  { %v1117_v2 = vadd.f32 %v1116_v1, %v8227_v60 }
 0x38d   :  { %v1212_v7 = vmul.f32 0.01, %v1122_v63  ;;  %vm1196_vm14 = vcmp.gt.f32.partialorder %v1122_v63, 0.0 }
 0x38e   :  { %vm1195_vm15 = vcmp.gt.f32.partialorder %v1117_v2, 0.0  ;;  %v1211_v6 = vmul.f32 0.01, %v1117_v2  ;;  %v7382_v9 = vpop.f32.mrb[18].mxu1 }
 0x38f   :  { %v1132_v11 = vadd.f32 %v7382_v9, %v8227_v60  ;;  %v1126_v12 = vpop.f32.mrb[19].mxu1  ;;  %v1228_v13 = vsel %vm1196_vm14, %v1122_v63, %v1212_v7 }
 0x390   :  { %v1127_v14 = vadd.f32 %v1126_v12, %v8227_v60  ;;  %v1248_v15 = vmul.f32 %v8236_v4, %v1228_v13  ;;  %v1227_v16 = vsel %vm1195_vm15, %v1117_v2, %v1211_v6 }
 0x391   :  { %v1214_v17 = vmul.f32 0.01, %v1132_v11  ;;  %vm1198_vm2 = vcmp.gt.f32.partialorder %v1132_v11, 0.0  ;;  %v1247_v20 = vmul.f32 %v8236_v4, %v1227_v16 }
 0x392   :  { %vm1197_vm3 = vcmp.gt.f32.partialorder %v1127_v14, 0.0  ;;  %v1213_v18 = vmul.f32 0.01, %v1127_v14  ;;  %v7385_v8 = vpop.f32.mrb[20].mxu1  ;;  %v1266_v19 = vsel %vm1001_vm11, %v1248_v15, 0.0 }
 0x393   :  { %v1142_v21 = vadd.f32 %v7385_v8, %v8227_v60  ;;  %1267 = vadd.xlane.f32.xlu0 %v1266_v19  ;;  %v1136_v22 = vpop.f32.mrb[21].mxu1  ;;  %v1230_v23 = vsel %vm1198_vm2, %v1132_v11, %v1214_v17  ;;  %v1263_v31 = vsel %vm1001_vm11, %v1247_v20, 0.0 }
 0x394   :  { %v1137_v24 = vadd.f32 %v1136_v22, %v8227_v60  ;;  %v1250_v25 = vmul.f32 %v8236_v4, %v1230_v23  ;;  %v1229_v26 = vsel %vm1197_vm3, %v1127_v14, %v1213_v18 }
 0x395   :  { %vm1200_vm5 = vcmp.gt.f32.partialorder %v1142_v21, 0.0  ;;  %v1216_v27 = vmul.f32 0.01, %v1142_v21  ;;  %v1249_v33 = vmul.f32 %v8236_v4, %v1229_v26 }
 0x396   :  { %v1215_v28 = vmul.f32 0.01, %v1137_v24  ;;  %v7388_v29 = vpop.f32.mrb[22].mxu1  ;;  %v1272_v30 = vsel %vm1001_vm11, %v1250_v25, 0.0  ;;  %vm1199_vm6 = vcmp.gt.f32.partialorder %v1137_v24, 0.0 }
 0x397   :  { %1273 = vadd.xlane.f32.xlu1 %v1272_v30  ;;  %1264 = vadd.xlane.f32.xlu0 %v1263_v31  ;;  %v1146_v34 = vpop.f32.mrb[23].mxu1  ;;  %v1232_v35 = vsel %vm1200_vm5, %v1142_v21, %v1216_v27  ;;  %v1269_v38 = vsel %vm1001_vm11, %v1249_v33, 0.0  ;;  %v1152_v48 = vadd.f32 %v7388_v29, %v8227_v60  ;;  %vm1396_vm5 = vcmask 1041409  }
 0x398   :  { %v1147_v36 = vadd.f32 %v1146_v34, %v8227_v60  ;;  %v1252_v39 = vmul.f32 %v8236_v4, %v1232_v35  ;;  %v1231_v40 = vsel %vm1199_vm6, %v1137_v24, %v1215_v28  ;;  %vm1398_vm6 = vcmask 1042434  }
 0x399   :  { %v1251_v47 = vmul.f32 %v8236_v4, %v1231_v40  ;;  %v1218_v6 = vmul.f32 0.01, %v1152_v48  ;;  %vm1202_vm13 = vcmp.gt.f32.partialorder %v1152_v48, 0.0 }
 0x39a   :  { %v7391_v37 = vpop.f32.mrb[24].mxu1  ;;  %v1217_v42 = vmul.f32 0.01, %v1147_v36  ;;  %vm1201_vm7 = vcmp.gt.f32.partialorder %v1147_v36, 0.0  ;;  %v1278_v51 = vsel %vm1001_vm11, %v1252_v39, 0.0 }
 0x39b   :  { %v1162_v43 = vadd.f32 %v7391_v37, %v8227_v60  ;;  %1270 = vadd.xlane.f32.xlu1 %v1269_v38  ;;  %v1156_v44 = vpop.f32.mrb[25].mxu1  ;;  %v1275_v62 = vsel %vm1001_vm11, %v1251_v47, 0.0  ;;  %v1234_v26 = vsel %vm1202_vm13, %v1152_v48, %v1218_v6  ;;  %v8291_v47 = vld [vmem:[%s9361_s0 + $0x8] sm:$0xff] }
 0x39c   :  { %v1157_v45 = vadd.f32 %v1156_v44, %v8227_v60  ;;  %v1233_v56 = vsel %vm1201_vm7, %v1147_v36, %v1217_v42  ;;  %v1254_v33 = vmul.f32 %v8236_v4, %v1234_v26  ;;  %vm1400_vm7 = vcmask 1043459  }
 0x39d   :  { %vm1204_vm8 = vcmp.gt.f32.partialorder %v1162_v43, 0.0  ;;  %v1220_v46 = vmul.f32 0.01, %v1162_v43  ;;  %v1253_v7 = vmul.f32 %v8236_v4, %v1233_v56 }
 0x39e   :  { %v7394_v49 = vpop.f32.mrb[26].mxu1  ;;  %v1219_v52 = vmul.f32 0.01, %v1157_v45  ;;  %vm1203_vm9 = vcmp.gt.f32.partialorder %v1157_v45, 0.0 }
 0x39f   :  { %v1172_v53 = vadd.f32 %v7394_v49, %v8227_v60  ;;  %1279 = vadd.xlane.f32.xlu1 %v1278_v51  ;;  %v1166_v54 = vpop.f32.mrb[27].mxu1  ;;  %v1236_v55 = vsel %vm1204_vm8, %v1162_v43, %v1220_v46  ;;  %v1281_v19 = vsel %vm1001_vm11, %v1253_v7, 0.0  ;;  %v1526_v46 = vld [vmem:[#allocation2 + $0x38] sm:$0x3f]  ;;  %v8296_v51 = vand.u32 127, %v44_v0 }
 0x3a0   :  { %v1167_v57 = vadd.f32 %v1166_v54, %v8227_v60  ;;  %v1256_v58 = vmul.f32 %v8236_v4, %v1236_v55  ;;  %v1235_v13 = vsel %vm1203_vm9, %v1157_v45, %v1219_v52  ;;  %7406 = vmatprep.subr.msk.mxu1 %vm304_vm0, %v1526_v46  ;;  %vm9389_vm8 = vcmask 1044484  }
 0x3a1   :  { %vm1206_vm10 = vcmp.gt.f32.partialorder %v1172_v53, 0.0  ;;  %v1222_v59 = vmul.f32 0.01, %v1172_v53  ;;  %v1255_v21 = vmul.f32 %v8236_v4, %v1235_v13  ;;  %7407 = vmatpush3.msk.msra.mxu1 %vm304_vm0, %v1526_v46  ;;  %v8300_v54 = vsub.s32 %v8296_v51, %v8016_v3 }
 0x3a2   :  { %vm1205_vm12 = vcmp.gt.f32.partialorder %v1167_v57, 0.0  ;;  %v1221_v63 = vmul.f32 0.01, %v1167_v57  ;;  %v7397_v1 = vpop.f32.mrb[28].mxu1  ;;  %v1290_v2 = vsel %vm1001_vm11, %v1256_v58, 0.0  ;;  %7409 = vmatmul.mubr.msk.f32.vlgmr.msra.gmra.mrb[32].mxu1 %vm255_vm1, %v8291_v47  ;;  %vm9368_vm9 = vcmask 1045509  }
 0x3a3   :  { %v1182_v9 = vadd.f32 %v7397_v1, %v8227_v60  ;;  %1276 = vadd.xlane.f32.xlu1 %v1275_v62  ;;  %1291 = vadd.xlane.f32.xlu0 %v1290_v2  ;;  %v1176_v11 = vpop.f32.mrb[29].mxu1  ;;  %v1238_v12 = vsel %vm1206_vm10, %v1172_v53, %v1222_v59  ;;  %v1287_v30 = vsel %vm1001_vm11, %v1255_v21, 0.0  ;;  %vm9367_vm10 = vcmask 1046534  }
 0x3a4   :  { %v1177_v14 = vadd.f32 %v1176_v11, %v8227_v60  ;;  %v1258_v15 = vmul.f32 %v8236_v4, %v1238_v12  ;;  %v1237_v16 = vsel %vm1205_vm12, %v1167_v57, %v1221_v63  ;;  %vm9366_vm12 = vcmask 1047559  }
 0x3a5   :  { %vm1208_vm14 = vcmp.gt.f32.partialorder %v1182_v9, 0.0  ;;  %v1224_v17 = vmul.f32 0.01, %v1182_v9  ;;  %v1257_v20 = vmul.f32 %v8236_v4, %v1237_v16  ;;  %vm8320_vm13 = vcmp.ne.s32.totalorder %v8016_v3, %v8296_v51 }
 0x3a6   :  { %v7400_v18 = vpop.f32.mrb[30].mxu1  ;;  %v1296_v8 = vsel %vm1001_vm11, %v1258_v15, 0.0  ;;  %v1223_v22 = vmul.f32 0.01, %v1177_v14  ;;  %vm1207_vm15 = vcmp.gt.f32.partialorder %v1177_v14, 0.0 }
 0x3a7   :  { %v1192_v23 = vadd.f32 %v7400_v18, %v8227_v60  ;;  %1297 = vadd.xlane.f32.xlu0 %v1296_v8  ;;  %v1186_v24 = vpop.f32.mrb[31].mxu1  ;;  %1282 = vadd.xlane.f32.xlu1 %v1281_v19  ;;  %v1240_v25 = vsel %vm1208_vm14, %v1182_v9, %v1224_v17  ;;  %v1293_v29 = vsel %vm1001_vm11, %v1257_v20, 0.0  ;;  %vm7976_vm14 = vmmov 0  }
 0x3a8   :  { %v1187_v27 = vadd.f32 %v1186_v24, %v8227_v60  ;;  %v1260_v31 = vmul.f32 %v8236_v4, %v1240_v25  ;;  %v1239_v35 = vsel %vm1207_vm15, %v1177_v14, %v1223_v22  ;;  %v1284_v60 = vsel %vm1001_vm11, %v1254_v33, 0.0 }
 0x3a9   :  { %vm1210_vm2 = vcmp.gt.f32.partialorder %v1192_v23, 0.0  ;;  %v1226_v28 = vmul.f32 0.01, %v1192_v23  ;;  %v1259_v38 = vmul.f32 %v8236_v4, %v1239_v35  ;;  %vm1775_vm15 = vcmask 1043456  }
 0x3aa   :  { %v1225_v34 = vmul.f32 0.01, %v1187_v27  ;;  %vm1209_vm3 = vcmp.gt.f32.partialorder %v1187_v27, 0.0  ;;  %v1302_v37 = vsel %vm1001_vm11, %v1260_v31, 0.0 }
 0x3ab   :  { %1294 = vadd.xlane.f32.xlu0 %v1293_v29  ;;  %1288 = vadd.xlane.f32.xlu1 %v1287_v30  ;;  %v1242_v36 = vsel %vm1210_vm2, %v1192_v23, %v1226_v28  ;;  %v1299_v42 = vsel %vm1001_vm11, %v1259_v38, 0.0 }
 0x3ac   :  { %v1262_v39 = vmul.f32 %v8236_v4, %v1242_v36  ;;  %v1241_v40 = vsel %vm1209_vm3, %v1187_v27, %v1225_v34  ;;  %vm1768_vm3 = vcmask 31744  }
 0x3ad   :  { %v1261_v44 = vmul.f32 %v8236_v4, %v1241_v40 }
 0x3ae   :  { %v1308_v43 = vsel %vm1001_vm11, %v1262_v39, 0.0 }
 0x3af   :  { %1303 = vadd.xlane.f32.xlu0 %v1302_v37  ;;  %1285 = vadd.xlane.f32.xlu1 %v1284_v60  ;;  %v1305_v45 = vsel %vm1001_vm11, %v1261_v44, 0.0  ;;  %v1443_v44 = vld [vmem:[#allocation2 + $0x30] sm:$0x3f] }
 0x3b0   :  { %7401 = vmatprep.subr.msk.mxu0 %vm304_vm0, %v1443_v44 }
 0x3b1   :  { %7402 = vmatpush3.msk.msra.mxu0 %vm304_vm0, %v1443_v44 }
 0x3b2   :  { %7404 = vmatmul.mubr.msk.f32.vlgmr.msra.gmra.mrb[32].mxu0 %vm255_vm1, %v8291_v47 }
 0x3b3   :  { %1300 = vadd.xlane.f32.xlu0 %v1299_v42  ;;  %1309 = vadd.xlane.f32.xlu1 %v1308_v43 }
 0x3b7   :  { %1306 = vadd.xlane.f32.xlu0 %v1305_v45 }
 0x420   :  { %v1268_v4 = vpop.xlane.xlu0 %1267 }
 0x421   :  { %v1339_v59 = vrot.slane %v1268_v4, %v8300_v54 }
 0x424   :  { %v1274_v48 = vpop.xlane.xlu1 %1273  ;;  %v1265_v52 = vpop.xlane.xlu0 %1264 }
 0x425   :  { %v1335_v57 = vrot.slane %v1265_v52, %v8300_v54  ;;  %v1347_v7 = vrot.slane %v1274_v48, %v8300_v54 }
 0x427   :  { %v1397_v0 = vsel %vm1396_vm5, %v1339_v59, %v1335_v57 }
 0x428   :  { %v1271_v49 = vpop.xlane.xlu1 %1270 }
 0x429   :  { %v1343_v58 = vrot.slane %v1271_v49, %v8300_v54 }
 0x42b   :  { %v1399_v1 = vsel %vm1398_vm6, %v1343_v58, %v1397_v0 }
 0x42c   :  { %v1280_v53 = vpop.xlane.xlu1 %1279  ;;  %v1401_v11 = vsel %vm1400_vm7, %v1347_v7, %v1399_v1 }
 0x42d   :  { %v1355_v16 = vrot.slane %v1280_v53, %v8300_v54 }
 0x430   :  { %v1277_v55 = vpop.xlane.xlu1 %1276  ;;  %v1292_v56 = vpop.xlane.xlu0 %1291 }
 0x431   :  { %v1351_v2 = vrot.slane %v1277_v55, %v8300_v54  ;;  %v1371_v14 = vrot.slane %v1292_v56, %v8300_v54 }
 0x433   :  { %v1403_v13 = vsel %vm9389_vm8, %v1351_v2, %v1401_v11 }
 0x434   :  { %v1298_v62 = vpop.xlane.xlu0 %1297  ;;  %v1283_v63 = vpop.xlane.xlu1 %1282  ;;  %v1405_v22 = vsel %vm9368_vm9, %v1355_v16, %v1403_v13  ;;  %v1766_v13 = vld [vmem:[#allocation2 + $0x48] sm:$0x3f]  ;;  %v7919_v16 = vld [vmem:[#allocation2 + $0x40] sm:$0xff] }
 0x435   :  { %v1359_v15 = vrot.slane %v1283_v63, %v8300_v54  ;;  %v1379_v26 = vrot.slane %v1298_v62, %v8300_v54  ;;  %v9385_v62 = vmov 0.0  }
 0x436   :  { %7411 = vmatprep.subr.mxu0 %v9385_v62  ;;  %7416 = vmatprep.subr.mxu1 %v9385_v62 }
 0x437   :  { %v1407_v23 = vsel %vm9367_vm10, %v1359_v15, %v1405_v22  ;;  %7413 = vmatprep.mubr.msk.f32.mxu0 %vm7976_vm14, %v9385_v62  ;;  %7418 = vmatprep.mubr.msk.f32.mxu1 %vm7976_vm14, %v9385_v62  ;;  %v8364_v15 = vsub.s32 5, %v8016_v3 }
 0x438   :  { %v1295_v6 = vpop.xlane.xlu0 %1294  ;;  %v1289_v9 = vpop.xlane.xlu1 %1288 }
 0x439   :  { %v1367_v12 = vrot.slane %v1289_v9, %v8300_v54  ;;  %v1375_v17 = vrot.slane %v1295_v6, %v8300_v54 }
 0x43b   :  { %v1410_v18 = vsel %vm1396_vm5, %v1371_v14, %v1367_v12  ;;  %v1767_v12 = vld [vmem:[#allocation2 + $0x50] sm:$0xf]  ;;  %v2437_v14 = vld [vmem:[#allocation2 + $0x68] sm:$0xf] }
 0x43c   :  { %v1304_v8 = vpop.xlane.xlu0 %1303  ;;  %v1286_v19 = vpop.xlane.xlu1 %1285  ;;  %v1411_v24 = vsel %vm1398_vm6, %v1375_v17, %v1410_v18  ;;  %v1756_v17 = vrot.slane %v7919_v16, %v8364_v15 }
 0x43d   :  { %v1363_v20 = vrot.slane %v1286_v19, %v8300_v54  ;;  %v1412_v31 = vsel %vm1400_vm7, %v1379_v26, %v1411_v24  ;;  %v1387_v35 = vrot.slane %v1304_v8, %v8300_v54 }
 0x43f   :  { %v1409_v25 = vsel %vm9366_vm12, %v1363_v20, %v1407_v23 }
 0x440   :  { %v1301_v27 = vpop.xlane.xlu0 %1300  ;;  %v1419_v28 = vsel %vm8320_vm13, %v1409_v25, -1e+30  ;;  %v1310_v34 = vpop.xlane.xlu1 %1309 }
 0x441   :  { %v1383_v29 = vrot.slane %v1301_v27, %v8300_v54  ;;  %v1421_v30 = vsel %vm1001_vm11, %v1419_v28, -inf  ;;  %v1395_v60 = vrot.slane %v1310_v34, %v8300_v54 }
 0x442   :  { %1422 = vmax.xlane.f32.xlu0 %v1421_v30 }
 0x443   :  { %v1413_v33 = vsel %vm9389_vm8, %v1383_v29, %v1412_v31 }
 0x444   :  { %v1307_v36 = vpop.xlane.xlu0 %1306  ;;  %v1414_v38 = vsel %vm9368_vm9, %v1387_v35, %v1413_v33 }
 0x445   :  { %v1391_v37 = vrot.slane %v1307_v36, %v8300_v54 }
 0x447   :  { %v1415_v39 = vsel %vm9367_vm10, %v1391_v37, %v1414_v38  ;;  %vm1950_vm10 = vcmask 80896  }
 0x448   :  { %v1416_v40 = vsel %vm9366_vm12, %v1395_v60, %v1415_v39 }
 0x449   :  { %v1420_v42 = vsel %vm8320_vm13, %v1416_v40, -1e+30 }
 0x44a   :  { %v1424_v43 = vsel %vm1001_vm11, %v1420_v42, -inf }
 0x44b   :  { %1425 = vmax.xlane.f32.xlu1 %v1424_v43 }
 0x475   :  { %v7410_v58 = vpop.f32.mrb[32].mxu1 }
 0x476   :  { %v1596_v59 = vpop.f32.mrb[33].mxu1  ;;  %7417 = vmatpush3.msra.mxu1 %v7410_v58 }
 0x477   :  { %7412 = vmatpush3.msra.mxu0 %v1596_v59  ;;  %7431 = vmatprep.subr.msk.mxu1 %vm1775_vm15, %v2437_v14 }
 0x478   :  { %7421 = vmatprep.subr.msk.mxu0 %vm1775_vm15, %v1767_v12 }
 0x485   :  { %v7405_v63 = vpop.f32.mrb[32].mxu0 }
 0x486   :  { %v1517_v0 = vpop.f32.mrb[33].mxu0 }
 0x4cf   :  { %v1423_v45 = vpop.xlane.xlu0 %1422 }
 0x4d0   :  { %v1427_v46 = vsub.f32 %v1419_v28, %v1423_v45 }
 0x4d2   :  { %v1429_v48 = vmul.f32 1.442695, %v1427_v46 }
 0x4d4   :  { %7890 = vpow2.f32 %v1429_v48 }
 0x4d8   :  { %v1426_v4 = vpop.xlane.xlu1 %1425 }
 0x4d9   :  { %v1428_v49 = vsub.f32 %v1420_v42, %v1426_v4 }
 0x4db   :  { %v1431_v52 = vmul.f32 1.442695, %v1428_v49 }
 0x4dd   :  { %7892 = vpow2.f32 %v1431_v52 }
 0x4de   :  { %v7891_v53 = vpop.eup %7890 }
 0x4df   :  { %v1433_v55 = vsel %vm1001_vm11, %v7891_v53, 0.0 }
 0x4e0   :  { %1434 = vadd.xlane.f32.xlu0 %v1433_v55 }
 0x4e7   :  { %v7893_v56 = vpop.eup %7892 }
 0x4e8   :  { %v1436_v57 = vsel %vm1001_vm11, %v7893_v56, 0.0 }
 0x4e9   :  { %1437 = vadd.xlane.f32.xlu1 %v1436_v57 }
 0x56d   :  { %v1435_v1 = vpop.xlane.xlu0 %1434 }
 0x56e   :  { %7894 = vrcp.f32 %v1435_v1 }
 0x576   :  { %v1438_v2 = vpop.xlane.xlu1 %1437 }
 0x577   :  { %7896 = vrcp.f32 %v1438_v2 }
 0x578   :  { %v7895_v7 = vpop.eup %7894 }
 0x579   :  { %v1441_v6 = vmul.f32 %v7895_v7, %v7891_v53 }
 0x57b   :  { %7414 = vmatmul.mubr.msk.f32.vlgmr.msra.gmra.mrb[34].mxu0 %vm1001_vm11, %v1441_v6 }
 0x57c   :  { %7422 = vmatpush3.msk.msra.mxu0 %vm1775_vm15, %v1767_v12 }
 0x57d   :  { %7426 = vmatprep.subr.msk.mxu0 %vm304_vm0, %v1766_v13 }
 0x581   :  { %v7897_v9 = vpop.eup %7896 }
 0x582   :  { %v1442_v11 = vmul.f32 %v7897_v9, %v7893_v56 }
 0x584   :  { %7419 = vmatmul.mubr.msk.f32.vlgmr.msra.gmra.mrb[34].mxu1 %vm1001_vm11, %v1442_v11 }
 0x585   :  { %7432 = vmatpush3.msk.msra.mxu1 %vm1775_vm15, %v2437_v14 }
 0x64e   :  { %v1674_v18 = vpop.f32.mrb[34].mxu0 }
 0x64f   :  { %v1751_v8 = vadd.f32 %v1674_v18, %v1517_v0  ;;  %v7415_v19 = vpop.f32.mrb[35].mxu0 }
 0x651   :  { %v1757_v20 = vadd.f32 %v1756_v17, %v1751_v8 }
 0x653   :  { %vm1759_vm2 = vcmp.gt.f32.partialorder %v1757_v20, 0.0  ;;  %v1761_v22 = vmul.f32 0.01, %v1757_v20 }
 0x655   :  { %v8367_v23 = vsel %vm1759_vm2, %v1757_v20, %v1761_v22 }
 0x656   :  { %7423 = vmatprep.mubr.msk.f32.mxu0 %vm1768_vm3, %v8367_v23  ;;  %v2234_v24 = vrot.slane %v8367_v23, %v8019_v5  ;;  %v2227_v3 = vcombine.high %v8367_v23, %v8367_v23 }
 0x657   :  { %v1747_v25 = vpop.f32.mrb[34].mxu1 }
 0x658   :  { %v1752_v26 = vadd.f32 %v7405_v63, %v1747_v25  ;;  %v7420_v27 = vpop.f32.mrb[35].mxu1  ;;  %v2242_v28 = vcombine.high %v2234_v24, %v2234_v24  ;;  %v2250_v29 = vrot.slane %v2234_v24, %v8019_v5  ;;  %v2241_v30 = vrot.slane %v2227_v3, %v8019_v5  ;;  %v8413_v63 = vld [vmem:[%s9361_s0] sm:$0xff] }
 0x65a   :  { %v1758_v31 = vadd.f32 %v1756_v17, %v1752_v26  ;;  %v2328_v33 = vrot.slane %v2250_v29, %v8035_v10  ;;  %v2264_v34 = vrot.slane %v2242_v28, %v8019_v5  ;;  %v2272_v35 = vcombine.high %v2250_v29, %v2250_v29 }
 0x65b   :  { %v2257_v36 = vrot.slane %v2241_v30, %v8019_v5  ;;  %v2243_v37 = vcombine.high %v2241_v30, %v2241_v30 }
 0x65c   :  { %vm1760_vm2 = vcmp.gt.f32.partialorder %v1758_v31, 0.0  ;;  %v1762_v60 = vmul.f32 0.01, %v1758_v31  ;;  %v8381_v38 = vsub.f32 %v2328_v33, %v8367_v23  ;;  %v2332_v39 = vrot.slane %v2264_v34, %v8035_v10 }
 0x65d   :  { %v2336_v40 = vrot.slane %v2272_v35, %v8035_v10  ;;  %v2274_v42 = vcombine.high %v2264_v34, %v2264_v34  ;;  %v2344_v43 = vrot.slane %v2257_v36, %v8035_v10  ;;  %v2271_v44 = vrot.slane %v2243_v37, %v8019_v5 }
 0x65e   :  { %v8387_v45 = vsel %vm1760_vm2, %v1758_v31, %v1762_v60  ;;  %v9384_v46 = vand.u32 2147483647, %v8381_v38  ;;  %v8391_v48 = vsub.f32 %v2332_v39, %v8367_v23  ;;  %v2273_v4 = vcombine.high %v2257_v36, %v2257_v36 }
 0x65f   :  { %7424 = vmatmul.mubr.msk.f32.vlgmr.msra.gmra.mrb[36].mxu0 %vm1768_vm3, %v8387_v45  ;;  %v2407_v49 = vsub.f32 %v2336_v40, %v8367_v23  ;;  %v2340_v52 = vrot.slane %v2274_v42, %v8035_v10  ;;  %v2348_v53 = vrot.slane %v2271_v44, %v8035_v10  ;;  %v8404_v56 = vsub.f32 %v2344_v43, %v8367_v23 }
 0x660   :  { %7427 = vmatpush3.msk.msra.mxu0 %vm304_vm0, %v1766_v13  ;;  %7433 = vmatprep.mubr.msk.f32.mxu1 %vm1768_vm3, %v9384_v46  ;;  %v9383_v55 = vand.u32 2147483647, %v8391_v48  ;;  %v2275_v57 = vcombine.high %v2271_v44, %v2271_v44  ;;  %v2283_v58 = vrot.slane %v8387_v45, %v8019_v5  ;;  %v2352_v1 = vrot.slane %v2273_v4, %v8035_v10 }
 0x661   :  { %v8408_v59 = vand.u32 2147483647, %v2407_v49  ;;  %7428 = vmatprep.mubr.msk.f32.mxu0 %vm255_vm1, %v8413_v63  ;;  %v2408_v0 = vsub.f32 %v2340_v52, %v8367_v23  ;;  %v8426_v6 = vsub.f32 %v2348_v53, %v8367_v23  ;;  %v2276_v9 = vcombine.high %v8387_v45, %v8387_v45 }
 0x662   :  { %7434 = vmatmul.mubr.msk.f32.vlgmr.msra.gmra.mrb[36].mxu1 %vm1768_vm3, %v9383_v55  ;;  %v2299_v2 = vrot.slane %v2283_v58, %v8019_v5  ;;  %v2291_v7 = vcombine.high %v2283_v58, %v2283_v58  ;;  %v9382_v12 = vand.u32 2147483647, %v8404_v56  ;;  %v2356_v13 = vrot.slane %v2275_v57, %v8035_v10 }
 0x663   :  { %7436 = vmatprep.mubr.msk.f32.mxu1 %vm1768_vm3, %v8408_v59  ;;  %v8430_v11 = vand.u32 2147483647, %v2408_v0  ;;  %v2411_v16 = vsub.f32 %v2352_v1, %v8367_v23  ;;  %v2290_v8 = vrot.slane %v2276_v9, %v8019_v5  ;;  %v9381_v19 = vand.u32 2147483647, %v8426_v6  ;;  %v1765_v9 = vld [vmem:[#allocation2 + $0x58] sm:$0xff] }
 0x664   :  { %v2313_v14 = vrot.slane %v2291_v7, %v8019_v5  ;;  %v2360_v17 = vrot.slane %v2299_v2, %v8035_v10  ;;  %v2321_v18 = vcombine.high %v2299_v2, %v2299_v2  ;;  %v2412_v20 = vsub.f32 %v2356_v13, %v8367_v23 }
 0x665   :  { %v2292_v3 = vcombine.high %v2290_v8, %v2290_v8  ;;  %v8448_v25 = vand.u32 2147483647, %v2411_v16  ;;  %v2306_v28 = vrot.slane %v2290_v8, %v8019_v5  ;;  %v1935_v13 = vrot.slane %v1765_v9, %v8035_v10 }
 0x666   :  { %7437 = vmatmul.mubr.msk.f32.gmra.mrb[38].mxu1 %vm1768_vm3, %v8430_v11  ;;  %v2364_v22 = vrot.slane %v2313_v14, %v8035_v10  ;;  %v2323_v24 = vcombine.high %v2313_v14, %v2313_v14  ;;  %v8451_v26 = vsub.f32 %v2360_v17, %v8387_v45  ;;  %v2368_v27 = vrot.slane %v2321_v18, %v8035_v10 }
 0x667   :  { %7429 = vmatmul.mubr.msk.f32.vlgmr.msra.gmra.mrb[36].mxu0 %vm255_vm1, %v8291_v47  ;;  %7439 = vmatprep.mubr.msk.f32.mxu1 %vm1768_vm3, %v9382_v12  ;;  %v8460_v29 = vand.u32 2147483647, %v2412_v20  ;;  %v2320_v33 = vrot.slane %v2292_v3, %v8019_v5  ;;  %v2376_v36 = vrot.slane %v2306_v28, %v8035_v10  ;;  %v2322_v37 = vcombine.high %v2306_v28, %v2306_v28 }
 0x668   :  { %v8463_v30 = vsub.f32 %v2364_v22, %v8387_v45  ;;  %v2372_v31 = vrot.slane %v2323_v24, %v8035_v10  ;;  %v9380_v34 = vand.u32 2147483647, %v8451_v26  ;;  %v2415_v35 = vsub.f32 %v2368_v27, %v8387_v45 }
 0x669   :  { %v2380_v40 = vrot.slane %v2320_v33, %v8035_v10  ;;  %v2324_v42 = vcombine.high %v2320_v33, %v2320_v33  ;;  %v8481_v44 = vsub.f32 %v2376_v36, %v8387_v45  ;;  %v2384_v4 = vrot.slane %v2322_v37, %v8035_v10 }
 0x66a   :  { %7440 = vmatmul.mubr.msk.f32.gmra.mrb[40].mxu1 %vm1768_vm3, %v9381_v19  ;;  %v9379_v60 = vand.u32 2147483647, %v8463_v30  ;;  %v2416_v39 = vsub.f32 %v2372_v31, %v8387_v45  ;;  %v8478_v43 = vand.u32 2147483647, %v2415_v35  ;;  %v1947_v8 = vrot.slane %v1765_v9, %v8141_v32  ;;  %v36_v35 = vld [vmem:[%s9363_s2] sm:$0x3] }
 0x66b   :  { %7442 = vmatprep.mubr.msk.f32.mxu1 %vm1768_vm3, %v8448_v25  ;;  %v8492_v52 = vsub.f32 %v2380_v40, %v8387_v45  ;;  %v2388_v53 = vrot.slane %v2324_v42, %v8035_v10  ;;  %v9378_v57 = vand.u32 2147483647, %v8481_v44  ;;  %v2419_v58 = vsub.f32 %v2384_v4, %v8387_v45 }
 0x66c   :  { %v8489_v49 = vand.u32 2147483647, %v2416_v39  ;;  %vm1957_vm9 = vcmp.gt.f32.partialorder %v36_v35, 0.0 }
 0x66d   :  { %v9377_v0 = vand.u32 2147483647, %v8492_v52  ;;  %v2420_v1 = vsub.f32 %v2388_v53, %v8387_v45  ;;  %v8504_v2 = vand.u32 2147483647, %v2419_v58 }
 0x66e   :  { %7443 = vmatmul.mubr.msk.f32.gmra.mrb[42].mxu1 %vm1768_vm3, %v8460_v29 }
 0x66f   :  { %7445 = vmatprep.mubr.msk.f32.mxu1 %vm1768_vm3, %v9380_v34  ;;  %v8511_v7 = vand.u32 2147483647, %v2420_v1 }
 0x672   :  { %7446 = vmatmul.mubr.msk.f32.gmra.mrb[44].mxu1 %vm1768_vm3, %v9379_v60 }
 0x673   :  { %7448 = vmatprep.mubr.msk.f32.mxu1 %vm1768_vm3, %v8478_v43 }
 0x676   :  { %7449 = vmatmul.mubr.msk.f32.gmra.mrb[46].mxu1 %vm1768_vm3, %v8489_v49 }
 0x677   :  { %7451 = vmatprep.mubr.msk.f32.mxu1 %vm1768_vm3, %v9378_v57 }
 0x67a   :  { %7452 = vmatmul.mubr.msk.f32.gmra.mrb[48].mxu1 %vm1768_vm3, %v9377_v0 }
 0x67b   :  { %7454 = vmatprep.mubr.msk.f32.mxu1 %vm1768_vm3, %v8504_v2 }
 0x67e   :  { %7455 = vmatmul.mubr.msk.f32.gmra.mrb[50].mxu1 %vm1768_vm3, %v8511_v7 }
 0x73a   :  { %v7430_v14 = vpop.f32.mrb[36].mxu0 }
 0x73b   :  { %v1937_v16 = vadd.f32 %v7430_v14, %v1935_v13  ;;  %v1923_v17 = vpop.f32.mrb[37].mxu0 }
 0x73c   :  { %v1936_v18 = vadd.f32 %v1935_v13, %v1923_v17 }
 0x73d   :  { %vm1939_vm2 = vcmp.gt.f32.partialorder %v1937_v16, 0.0  ;;  %v1941_v20 = vmul.f32 0.01, %v1937_v16 }
 0x73e   :  { %vm1938_vm12 = vcmp.gt.f32.partialorder %v1936_v18, 0.0  ;;  %v1940_v22 = vmul.f32 0.01, %v1936_v18 }
 0x73f   :  { %v1943_v24 = vsel %vm1939_vm2, %v1937_v16, %v1941_v20  ;;  %vm1971_vm2 = vcmask 58368  }
 0x740   :  { %v1949_v3 = vmul.f32 %v1947_v8, %v1943_v24  ;;  %v1942_v27 = vsel %vm1938_vm12, %v1936_v18, %v1940_v22  ;;  %v1984_v22 = vcvt.s32.f32 %v8296_v51  ;;  %v34_v51 = vld [vmem:[%s9362_s1] sm:$0xff] }
 0x741   :  { %v1948_v28 = vmul.f32 %v1947_v8, %v1942_v27 }
 0x742   :  { %v1954_v31 = vsel %vm1950_vm10, %v1949_v3, 0.0 }
 0x743   :  { %1955 = vadd.xlane.f32.xlu1 %v1954_v31  ;;  %v1951_v33 = vsel %vm1950_vm10, %v1948_v28, 0.0  ;;  %v2226_v28 = vld [vmem:[#allocation2 + $0x60] sm:$0x3f] }
 0x744   :  { %1952 = vadd.xlane.f32.xlu0 %v1951_v33  ;;  %7457 = vmatprep.subr.msk.mxu1 %vm304_vm0, %v2226_v28 }
 0x745   :  { %7458 = vmatpush3.msk.msra.mxu1 %vm304_vm0, %v2226_v28 }
 0x7d0   :  { %v1956_v36 = vpop.xlane.xlu1 %1955 }
 0x7d1   :  { %v1967_v37 = vrot.slane %v1956_v36, %v8300_v54  ;;  %v1953_v39 = vpop.xlane.xlu0 %1952 }
 0x7d2   :  { %v1963_v40 = vrot.slane %v1953_v39, %v8300_v54 }
 0x7d4   :  { %v1968_v42 = vsel %vm1396_vm5, %v1967_v37, %v1963_v40  ;;  %v35_v37 = vld [vmem:[%s9362_s1 + $0x8] sm:$0xff]  ;;  %s7977_s1 = smov [#allocation5]  }
 0x7d5   :  { %v1970_v4 = vsel %vm1957_vm9, %v1968_v42, -1e+30  ;;  %s6675_s14 = sshll.u32 %s7977_s1, 4  ;;  %s6676_s14 = int_to_ptr.vmem [resolvable:$true] %s6675_s14 }
 0x7d6   :  { %v1972_v53 = vsel %vm1971_vm2, %v1970_v4, -inf  ;;  %s7945_s15 = scalar_lea.vmem %s6676_s14, 32  ;;  %p7950_p9 = scmp.lt.s32.totalorder %s6676_s14, %s6676_s14 }
 0x7d7   :  { %1973 = vmax.xlane.f32.xlu0 %v1972_v53  ;;  %p7946_p8 = scmp.ne.s32.totalorder %s6676_s14, %s7945_s15  ;;  %p7951_p10 = scmp.lt.s32.totalorder %s7945_s15, %s7945_s15 }
 0x7d9   :  { %p7952_p11 = por %p7951_p10, %p7950_p9 }
 0x7db   :  { %p7953_p12 = pnand %p7952_p11, %p7946_p8 }
 0x864   :  { %v1974_v58 = vpop.xlane.xlu0 %1973 }
 0x865   :  { %v1975_v1 = vsub.f32 %v1970_v4, %v1974_v58 }
 0x867   :  { %v1976_v9 = vmul.f32 1.442695, %v1975_v1 }
 0x869   :  { %7898 = vpow2.f32 %v1976_v9 }
 0x873   :  { %v7899_v13 = vpop.eup %7898 }
 0x874   :  { %v1978_v14 = vsel %vm1971_vm2, %v7899_v13, 0.0 }
 0x875   :  { %1979 = vadd.xlane.f32.xlu1 %v1978_v14 }
 0x902   :  { %v1980_v16 = vpop.xlane.xlu1 %1979 }
 0x903   :  { %7900 = vrcp.f32 %v1980_v16 }
 0x90d   :  { %v7901_v17 = vpop.eup %7900 }
 0x90e   :  { %v1982_v18 = vmul.f32 %v7901_v17, %v7899_v13 }
 0x910   :  { %v1983_v8 = vmul.f32 %v1982_v18, %v36_v35 }
 0x912   :  { %v1985_v20 = vsel %vm1971_vm2, %v1983_v8, -inf }
 0x913   :  { %1986 = vmax.xlane.f32.xlu0 %v1985_v20 }
 0x9a0   :  { %v1987_v24 = vpop.xlane.xlu0 %1986 }
 0x9a1   :  { %vm1988_vm9 = vcmp.eq.f32.partialorder %v1983_v8, %v1987_v24 }
 0x9a2   :  { %v1989_v3 = vsel %vm1988_vm9, %v1984_v22, 8.0 }
 0x9a3   :  { %v1990_v27 = vsel %vm1971_vm2, %v1989_v3, inf }
 0x9a4   :  { %1991 = vmin.xlane.f32.xlu1 %v1990_v27 }
 0xa31   :  { %v1992_v31 = vpop.xlane.xlu1 %1991 }
 0xa32   :  { %vm1993_vm10 = vcmp.eq.f32.partialorder %v1984_v22, %v1992_v31 }
 0xa33   :  { %v1994_v33 = vsel %vm1993_vm10, %v1983_v8, 0.0 }
 0xa34   :  { %v2005_v35 = vrot.slane %v1994_v33, %v8141_v32  ;;  %v1998_v36 = vrot.slane %v1994_v33, %v8035_v10 }
 0xa36   :  { %2007 = vbcast.lane.b32.xlu1 %v2005_v35, 256  ;;  %2000 = vbcast.lane.b32.xlu0 %v1998_v36, 256 }
 0xaa8   :  { %v2008_v39 = vpop.permute.xlu1 %2007  ;;  %v2001_v40 = vpop.permute.xlu0 %2000 }
 0xaa9   :  { %v2009_v42 = vmul.f32 %v2001_v40, %v34_v51  ;;  %v2010_v4 = vmul.f32 %v2008_v39, %v35_v37 }
 0xaab   :  { %v8539_v53 = vadd.f32 %v8413_v63, %v2009_v42  ;;  %v8546_v9 = vadd.f32 %v8291_v47, %v2010_v4 }
 0xaad   :  { %v2023_v58 = vrot.slane %v8539_v53, %v8019_v5  ;;  %v2016_v1 = vcombine.high %v8539_v53, %v8539_v53  ;;  %9403 = vst [vmem:[#allocation13_spill] sm:$0xff] %v8546_v9  ;;  %v2072_v22 = vrot.slane %v8546_v9, %v8019_v5  ;;  %v2065_v42 = vcombine.high %v8546_v9, %v8546_v9 }
 0xaaf   :  { %v2031_v13 = vcombine.high %v2023_v58, %v2023_v58  ;;  %v2039_v14 = vrot.slane %v2023_v58, %v8019_v5  ;;  %v2030_v16 = vrot.slane %v2016_v1, %v8019_v5  ;;  %v2080_v40 = vcombine.high %v2072_v22, %v2072_v22 }
 0xab1   :  { %v2053_v17 = vrot.slane %v2031_v13, %v8019_v5  ;;  %v2117_v18 = vrot.slane %v2039_v14, %v8035_v10  ;;  %v2061_v63 = vcombine.high %v2039_v14, %v2039_v14  ;;  %v2046_v8 = vrot.slane %v2030_v16, %v8019_v5 }
 0xab2   :  { %v2032_v20 = vcombine.high %v2030_v16, %v2030_v16 }
 0xab3   :  { %v8556_v24 = vsub.f32 %v2117_v18, %v8539_v53  ;;  %v2121_v47 = vrot.slane %v2053_v17, %v8035_v10  ;;  %v2125_v3 = vrot.slane %v2061_v63, %v8035_v10  ;;  %v2063_v27 = vcombine.high %v2053_v17, %v2053_v17 }
 0xab4   :  { %v2133_v28 = vrot.slane %v2046_v8, %v8035_v10  ;;  %v2060_v31 = vrot.slane %v2032_v20, %v8019_v5  ;;  %v2062_v33 = vcombine.high %v2046_v8, %v2046_v8  ;;  %v2088_v17 = vrot.slane %v2072_v22, %v8019_v5 }
 0xab5   :  { %v9376_v35 = vand.u32 2147483647, %v8556_v24  ;;  %v8564_v36 = vsub.f32 %v2121_v47, %v8539_v53  ;;  %v2196_v51 = vsub.f32 %v2125_v3, %v8539_v53  ;;  %v2129_v37 = vrot.slane %v2063_v27, %v8035_v10 }
 0xab6   :  { %v2137_v39 = vrot.slane %v2060_v31, %v8035_v10  ;;  %v2064_v13 = vcombine.high %v2060_v31, %v2060_v31  ;;  %v8579_v14 = vsub.f32 %v2133_v28, %v8539_v53  ;;  %v2141_v16 = vrot.slane %v2062_v33, %v8035_v10 }
 0xab7   :  { %7459 = vmatprep.mubr.msk.f32.mxu1 %vm255_vm1, %v9376_v35  ;;  %v9374_v4 = vand.u32 2147483647, %v8564_v36  ;;  %v8575_v58 = vand.u32 2147483647, %v2196_v51  ;;  %v2197_v1 = vsub.f32 %v2129_v37, %v8539_v53  ;;  %v2102_v18 = vrot.slane %v2080_v40, %v8019_v5 }
 0xab8   :  { %v8592_v8 = vsub.f32 %v2137_v39, %v8539_v53  ;;  %v2145_v20 = vrot.slane %v2064_v13, %v8035_v10  ;;  %v2079_v47 = vrot.slane %v2065_v42, %v8019_v5  ;;  %v9373_v22 = vand.u32 2147483647, %v8579_v14 }
 0xab9   :  { %7460 = vmatmul.mubr.msk.f32.vlgmr.msra.gmra.mrb[36].mxu1 %vm255_vm1, %v9374_v4  ;;  %v8589_v63 = vand.u32 2147483647, %v2197_v1  ;;  %v2200_v3 = vsub.f32 %v2141_v16, %v8539_v53  ;;  %v2149_v27 = vrot.slane %v2088_v17, %v8035_v10  ;;  %v2110_v28 = vcombine.high %v2088_v17, %v2088_v17  ;;  %v8674_v4 = vld [vmem:[#allocation2 + $0xb8] sm:$0xff] }
 0xaba   :  { %7462 = vmatprep.mubr.msk.f32.mxu1 %vm255_vm1, %v8575_v58  ;;  %v2153_v31 = vrot.slane %v2102_v18, %v8035_v10  ;;  %v9369_v33 = vand.u32 2147483647, %v8592_v8  ;;  %v2201_v51 = vsub.f32 %v2145_v20, %v8539_v53  ;;  %v2112_v37 = vcombine.high %v2102_v18, %v2102_v18 }
 0xabb   :  { %v2081_v39 = vcombine.high %v2079_v47, %v2079_v47  ;;  %v8607_v40 = vand.u32 2147483647, %v2200_v3  ;;  %v8610_v42 = vsub.f32 %v2149_v27, %v8546_v9  ;;  %v2157_v1 = vrot.slane %v2110_v28, %v8035_v10 }
 0xabc   :  { %v2095_v13 = vrot.slane %v2079_v47, %v8019_v5  ;;  %v8619_v16 = vand.u32 2147483647, %v2201_v51  ;;  %v8622_v17 = vsub.f32 %v2153_v31, %v8546_v9  ;;  %v2161_v18 = vrot.slane %v2112_v37, %v8035_v10 }
 0xabd   :  { %7463 = vmatmul.mubr.msk.f32.gmra.mrb[38].mxu1 %vm255_vm1, %v8589_v63  ;;  %v2109_v20 = vrot.slane %v2081_v39, %v8019_v5  ;;  %v9370_v3 = vand.u32 2147483647, %v8610_v42  ;;  %v2204_v47 = vsub.f32 %v2157_v1, %v8546_v9 }
 0xabe   :  { %7465 = vmatprep.mubr.msk.f32.mxu1 %vm255_vm1, %v9373_v22  ;;  %v2165_v27 = vrot.slane %v2095_v13, %v8035_v10  ;;  %v2111_v28 = vcombine.high %v2095_v13, %v2095_v13  ;;  %v9371_v31 = vand.u32 2147483647, %v8622_v17  ;;  %v2205_v51 = vsub.f32 %v2161_v18, %v8546_v9 }
 0xabf   :  { %v2169_v37 = vrot.slane %v2109_v20, %v8035_v10  ;;  %v2113_v39 = vcombine.high %v2109_v20, %v2109_v20 }
 0xac0   :  { %v8640_v1 = vsub.f32 %v2165_v27, %v8546_v9  ;;  %v2173_v13 = vrot.slane %v2111_v28, %v8035_v10 }
 0xac1   :  { %7466 = vmatmul.mubr.msk.f32.gmra.mrb[40].mxu1 %vm255_vm1, %v9369_v33  ;;  %v8637_v33 = vand.u32 2147483647, %v2204_v47  ;;  %v8651_v18 = vsub.f32 %v2169_v37, %v8546_v9  ;;  %v2177_v20 = vrot.slane %v2113_v39, %v8035_v10  ;;  %v2898_v39 = vld [vmem:[#allocation2 + $0x70] sm:$0xff] }
 0xac2   :  { %7468 = vmatprep.mubr.msk.f32.mxu1 %vm255_vm1, %v8607_v40  ;;  %v9372_v47 = vand.u32 2147483647, %v8640_v1  ;;  %v2208_v27 = vsub.f32 %v2173_v13, %v8546_v9  ;;  %v2899_v13 = vld [vmem:[#allocation2 + $0x78] sm:$0xff] }
 0xac3   :  { %v9375_v28 = vand.u32 2147483647, %v8651_v18 }
 0xac5   :  { %7469 = vmatmul.mubr.msk.f32.gmra.mrb[42].mxu1 %vm255_vm1, %v8619_v16 }
 0xac6   :  { %7471 = vmatprep.mubr.msk.f32.mxu1 %vm255_vm1, %v9370_v3  ;;  %v8648_v3 = vand.u32 2147483647, %v2205_v51  ;;  %v2209_v51 = vsub.f32 %v2177_v20, %v8546_v9  ;;  %v3145_v20 = vld [vmem:[#allocation2 + $0x80] sm:$0xff] }
 0xac8   :  { %v8670_v37 = vand.u32 2147483647, %v2209_v51 }
 0xac9   :  { %7472 = vmatmul.mubr.msk.f32.gmra.mrb[44].mxu1 %vm255_vm1, %v9371_v31  ;;  %v8663_v31 = vand.u32 2147483647, %v2208_v27  ;;  %v3146_v27 = vld [vmem:[#allocation2 + $0x88] sm:$0xff] }
 0xaca   :  { %7474 = vmatprep.mubr.msk.f32.mxu1 %vm255_vm1, %v8637_v33  ;;  %v7807_v22 = vpack.c.bf16 %v3146_v27, %v3145_v20 }
 0xacd   :  { %7475 = vmatmul.mubr.msk.f32.gmra.mrb[46].mxu1 %vm255_vm1, %v8648_v3 }
 0xace   :  { %7477 = vmatprep.mubr.msk.f32.mxu1 %vm255_vm1, %v9372_v47  ;;  %v7803_v47 = vpack.c.bf16 %v2899_v13, %v2898_v39 }
 0xad0   :  { %7804 = vmatprep.subr.bf16.mxu0 %v7803_v47 }
 0xad1   :  { %7478 = vmatmul.mubr.msk.f32.gmra.mrb[48].mxu1 %vm255_vm1, %v9375_v28  ;;  %7806 = vmatpush3.bf16.msra.mxu0 %v7803_v47  ;;  %v8678_v28 = vrot.slane %v8674_v4, %v8035_v10 }
 0xad2   :  { %7480 = vmatprep.mubr.msk.f32.mxu1 %vm255_vm1, %v8663_v31  ;;  %7808 = vmatprep.subr.bf16.mxu0 %v7807_v22 }
 0xad5   :  { %7481 = vmatmul.mubr.msk.f32.gmra.mrb[50].mxu1 %vm255_vm1, %v8670_v37 }
 0xb8c   :  { %v7461_v51 = vpop.f32.mrb[36].mxu1 }
 0xb8d   :  { %v2835_v35 = vadd.f32 %v7461_v51, %v8678_v28  ;;  %v2751_v0 = vpop.f32.mrb[37].mxu1 }
 0xb8e   :  { %v2834_v57 = vadd.f32 %v8678_v28, %v2751_v0 }
 0xb8f   :  { %v2867_v60 = vmul.f32 0.01, %v2835_v35  ;;  %vm2851_vm12 = vcmp.gt.f32.partialorder %v2835_v35, 0.0 }
 0xb90   :  { %vm2850_vm2 = vcmp.gt.f32.partialorder %v2834_v57, 0.0  ;;  %v2866_v47 = vmul.f32 0.01, %v2834_v57  ;;  %v7464_v39 = vpop.f32.mrb[38].mxu1 }
 0xb91   :  { %v2837_v13 = vadd.f32 %v7464_v39, %v8678_v28  ;;  %v2761_v20 = vpop.f32.mrb[39].mxu1  ;;  %v2883_v19 = vsel %vm2851_vm12, %v2835_v35, %v2867_v60 }
 0xb92   :  { %v2836_v27 = vadd.f32 %v8678_v28, %v2761_v20  ;;  %v2882_v34 = vsel %vm2850_vm2, %v2834_v57, %v2866_v47 }
 0xb93   :  { %v2869_v12 = vmul.f32 0.01, %v2837_v13  ;;  %7487 = vmatprep.mubr.msk.f32.mxu0 %vm507_vm4, %v2882_v34  ;;  %vm2853_vm9 = vcmp.gt.f32.partialorder %v2837_v13, 0.0 }
 0xb94   :  { %vm2852_vm10 = vcmp.gt.f32.partialorder %v2836_v27, 0.0  ;;  %v2868_v51 = vmul.f32 0.01, %v2836_v27  ;;  %v7467_v55 = vpop.f32.mrb[40].mxu1  ;;  %7488 = vmatmul.mubr.msk.f32.vlgmr.msra.gmra.mrb[38].mxu0 %vm507_vm4, %v2883_v19 }
 0xb95   :  { %v2839_v0 = vadd.f32 %v7467_v55, %v8678_v28  ;;  %v2771_v46 = vpop.f32.mrb[41].mxu1  ;;  %7810 = vmatpush3.bf16.msra.mxu0 %v7807_v22  ;;  %v2885_v60 = vsel %vm2853_vm9, %v2837_v13, %v2869_v12 }
 0xb96   :  { %v2838_v39 = vadd.f32 %v8678_v28, %v2771_v46  ;;  %v2884_v62 = vsel %vm2852_vm10, %v2836_v27, %v2868_v51 }
 0xb97   :  { %v2871_v10 = vmul.f32 0.01, %v2839_v0  ;;  %7490 = vmatprep.mubr.msk.f32.mxu0 %vm507_vm4, %v2884_v62  ;;  %vm2855_vm12 = vcmp.gt.f32.partialorder %v2839_v0, 0.0 }
 0xb98   :  { %vm2854_vm2 = vcmp.gt.f32.partialorder %v2838_v39, 0.0  ;;  %v2870_v34 = vmul.f32 0.01, %v2838_v39  ;;  %v7470_v57 = vpop.f32.mrb[42].mxu1  ;;  %7491 = vmatmul.mubr.msk.f32.gmra.mrb[40].mxu0 %vm507_vm4, %v2885_v60 }
 0xb99   :  { %v2841_v35 = vadd.f32 %v7470_v57, %v8678_v28  ;;  %v2781_v19 = vpop.f32.mrb[43].mxu1  ;;  %v2887_v46 = vsel %vm2855_vm12, %v2839_v0, %v2871_v10 }
 0xb9a   :  { %v2840_v55 = vadd.f32 %v8678_v28, %v2781_v19  ;;  %v2886_v47 = vsel %vm2854_vm2, %v2838_v39, %v2870_v34 }
 0xb9b   :  { %v2873_v22 = vmul.f32 0.01, %v2841_v35  ;;  %7493 = vmatprep.mubr.msk.f32.mxu0 %vm507_vm4, %v2886_v47  ;;  %vm2857_vm10 = vcmp.gt.f32.partialorder %v2841_v35, 0.0 }
 0xb9c   :  { %vm2856_vm8 = vcmp.gt.f32.partialorder %v2840_v55, 0.0  ;;  %v2872_v62 = vmul.f32 0.01, %v2840_v55  ;;  %v7473_v12 = vpop.f32.mrb[44].mxu1  ;;  %7494 = vmatmul.mubr.msk.f32.gmra.mrb[42].mxu0 %vm507_vm4, %v2887_v46 }
 0xb9d   :  { %v2843_v13 = vadd.f32 %v7473_v12, %v8678_v28  ;;  %v2791_v20 = vpop.f32.mrb[45].mxu1  ;;  %v2889_v39 = vsel %vm2857_vm10, %v2841_v35, %v2873_v22 }
 0xb9e   :  { %v2842_v27 = vadd.f32 %v8678_v28, %v2791_v20  ;;  %v2888_v51 = vsel %vm2856_vm8, %v2840_v55, %v2872_v62 }
 0xb9f   :  { %v2875_v60 = vmul.f32 0.01, %v2843_v13  ;;  %7496 = vmatprep.mubr.msk.f32.mxu0 %vm507_vm4, %v2888_v51  ;;  %vm2859_vm9 = vcmp.gt.f32.partialorder %v2843_v13, 0.0 }
 0xba0   :  { %vm2858_vm2 = vcmp.gt.f32.partialorder %v2842_v27, 0.0  ;;  %v2874_v34 = vmul.f32 0.01, %v2842_v27  ;;  %v7476_v10 = vpop.f32.mrb[46].mxu1  ;;  %7497 = vmatmul.mubr.msk.f32.gmra.mrb[44].mxu0 %vm507_vm4, %v2889_v39 }
 0xba1   :  { %v2845_v0 = vadd.f32 %v7476_v10, %v8678_v28  ;;  %v2801_v57 = vpop.f32.mrb[47].mxu1  ;;  %v2891_v55 = vsel %vm2859_vm9, %v2843_v13, %v2875_v60 }
 0xba2   :  { %v2844_v19 = vadd.f32 %v8678_v28, %v2801_v57  ;;  %v2890_v47 = vsel %vm2858_vm2, %v2842_v27, %v2874_v34 }
 0xba3   :  { %v2877_v46 = vmul.f32 0.01, %v2845_v0  ;;  %7499 = vmatprep.mubr.msk.f32.mxu0 %vm507_vm4, %v2890_v47  ;;  %vm2861_vm8 = vcmp.gt.f32.partialorder %v2845_v0, 0.0 }
 0xba4   :  { %vm2860_vm12 = vcmp.gt.f32.partialorder %v2844_v19, 0.0  ;;  %v2876_v62 = vmul.f32 0.01, %v2844_v19  ;;  %v7479_v35 = vpop.f32.mrb[48].mxu1  ;;  %7500 = vmatmul.mubr.msk.f32.gmra.mrb[46].mxu0 %vm507_vm4, %v2891_v55 }
 0xba5   :  { %v2847_v22 = vadd.f32 %v7479_v35, %v8678_v28  ;;  %v2811_v12 = vpop.f32.mrb[49].mxu1  ;;  %v2893_v27 = vsel %vm2861_vm8, %v2845_v0, %v2877_v46  ;;  %v3828_v35 = vld [vmem:[#allocation2 + $0xa8] sm:$0xf] }
 0xba6   :  { %v2846_v20 = vadd.f32 %v8678_v28, %v2811_v12  ;;  %v2892_v51 = vsel %vm2860_vm12, %v2844_v19, %v2876_v62  ;;  %7565 = vmatprep.subr.msk.mxu0 %vm1775_vm15, %v3828_v35 }
 0xba7   :  { %v2879_v39 = vmul.f32 0.01, %v2847_v22  ;;  %7502 = vmatprep.mubr.msk.f32.mxu0 %vm507_vm4, %v2892_v51  ;;  %vm2863_vm10 = vcmp.gt.f32.partialorder %v2847_v22, 0.0 }
 0xba8   :  { %vm2862_vm2 = vcmp.gt.f32.partialorder %v2846_v20, 0.0  ;;  %v2878_v34 = vmul.f32 0.01, %v2846_v20  ;;  %v7482_v13 = vpop.f32.mrb[50].mxu1  ;;  %7503 = vmatmul.mubr.msk.f32.gmra.mrb[48].mxu0 %vm507_vm4, %v2893_v27 }
 0xba9   :  { %v2849_v60 = vadd.f32 %v7482_v13, %v8678_v28  ;;  %v2821_v10 = vpop.f32.mrb[51].mxu1  ;;  %v2895_v19 = vsel %vm2863_vm10, %v2847_v22, %v2879_v39  ;;  %v8715_v22 = vrot.slane %v8674_v4, %v8141_v32 }
 0xbaa   :  { %v2848_v57 = vadd.f32 %v8678_v28, %v2821_v10  ;;  %v2894_v47 = vsel %vm2862_vm2, %v2846_v20, %v2878_v34  ;;  %v3392_v28 = vld [vmem:[#allocation2 + $0x90] sm:$0xff] }
 0xbab   :  { %v2881_v55 = vmul.f32 0.01, %v2849_v60  ;;  %7505 = vmatprep.mubr.msk.f32.mxu0 %vm507_vm4, %v2894_v47  ;;  %vm2865_vm9 = vcmp.gt.f32.partialorder %v2849_v60, 0.0  ;;  %7539 = vmatprep.subr.mxu1 %v3392_v28 }
 0xbac   :  { %vm2864_vm12 = vcmp.gt.f32.partialorder %v2848_v57, 0.0  ;;  %v2880_v62 = vmul.f32 0.01, %v2848_v57  ;;  %7506 = vmatmul.mubr.msk.f32.gmra.mrb[50].mxu0 %vm507_vm4, %v2895_v19  ;;  %7540 = vmatpush3.msra.mxu1 %v3392_v28 }
 0xbad   :  { %v2897_v46 = vsel %vm2865_vm9, %v2849_v60, %v2881_v55 }
 0xbae   :  { %v2896_v0 = vsel %vm2864_vm12, %v2848_v57, %v2880_v62  ;;  %v8722_v62 = vld [vmem:[#allocation2 + $0xb0] sm:$0xf] }
 0xbaf   :  { %7508 = vmatprep.mubr.msk.f32.mxu0 %vm507_vm4, %v2896_v0 }
 0xbb0   :  { %7509 = vmatmul.mubr.msk.f32.gmra.mrb[52].mxu0 %vm507_vm4, %v2897_v46 }
 0xc67   :  { %v7489_v12 = vpop.f32.mrb[38].mxu0 }
 0xc68   :  { %v3024_v20 = vadd.f32 %v7489_v12, %v8715_v22  ;;  %v3018_v51 = vpop.f32.mrb[39].mxu0 }
 0xc69   :  { %v3019_v39 = vadd.f32 %v3018_v51, %v8715_v22 }
 0xc6a   :  { %v3114_v27 = vmul.f32 0.01, %v3024_v20  ;;  %vm3098_vm8 = vcmp.gt.f32.partialorder %v3024_v20, 0.0 }
 0xc6b   :  { %vm3097_vm10 = vcmp.gt.f32.partialorder %v3019_v39, 0.0  ;;  %v3113_v34 = vmul.f32 0.01, %v3019_v39  ;;  %v7492_v13 = vpop.f32.mrb[40].mxu0 }
 0xc6c   :  { %v3034_v60 = vadd.f32 %v7492_v13, %v8715_v22  ;;  %v3028_v10 = vpop.f32.mrb[41].mxu0  ;;  %v3130_v55 = vsel %vm3098_vm8, %v3024_v20, %v3114_v27 }
 0xc6d   :  { %v3029_v57 = vadd.f32 %v3028_v10, %v8715_v22  ;;  %v3129_v47 = vsel %vm3097_vm10, %v3019_v39, %v3113_v34 }
 0xc6e   :  { %v3116_v19 = vmul.f32 0.01, %v3034_v60  ;;  %7515 = vmatprep.mubr.msk.f32.mxu0 %vm507_vm4, %v3129_v47  ;;  %vm3100_vm2 = vcmp.gt.f32.partialorder %v3034_v60, 0.0 }
 0xc6f   :  { %vm3099_vm9 = vcmp.gt.f32.partialorder %v3029_v57, 0.0  ;;  %v3115_v0 = vmul.f32 0.01, %v3029_v57  ;;  %v7495_v46 = vpop.f32.mrb[42].mxu0  ;;  %7516 = vmatmul.mubr.msk.f32.vlgmr.msra.gmra.mrb[54].mxu0 %vm507_vm4, %v3130_v55 }
 0xc70   :  { %v3044_v28 = vadd.f32 %v7495_v46, %v8715_v22  ;;  %v3038_v12 = vpop.f32.mrb[43].mxu0  ;;  %7566 = vmatpush3.msk.msra.mxu0 %vm1775_vm15, %v3828_v35  ;;  %v3132_v27 = vsel %vm3100_vm2, %v3034_v60, %v3116_v19 }
 0xc71   :  { %v3039_v51 = vadd.f32 %v3038_v12, %v8715_v22  ;;  %v3131_v39 = vsel %vm3099_vm9, %v3029_v57, %v3115_v0  ;;  %7570 = vmatprep.subr.msk.mxu0 %vm1775_vm15, %v8722_v62 }
 0xc72   :  { %v3118_v20 = vmul.f32 0.01, %v3044_v28  ;;  %7518 = vmatprep.mubr.msk.f32.mxu0 %vm507_vm4, %v3131_v39  ;;  %vm3102_vm12 = vcmp.gt.f32.partialorder %v3044_v28, 0.0 }
 0xc73   :  { %vm3101_vm8 = vcmp.gt.f32.partialorder %v3039_v51, 0.0  ;;  %v3117_v34 = vmul.f32 0.01, %v3039_v51  ;;  %v7498_v13 = vpop.f32.mrb[44].mxu0  ;;  %7519 = vmatmul.mubr.msk.f32.gmra.mrb[56].mxu0 %vm507_vm4, %v3132_v27 }
 0xc74   :  { %v3054_v10 = vadd.f32 %v7498_v13, %v8715_v22  ;;  %v3048_v47 = vpop.f32.mrb[45].mxu0  ;;  %v3134_v0 = vsel %vm3102_vm12, %v3044_v28, %v3118_v20 }
 0xc75   :  { %v3049_v35 = vadd.f32 %v3048_v47, %v8715_v22  ;;  %v3133_v55 = vsel %vm3101_vm8, %v3039_v51, %v3117_v34 }
 0xc76   :  { %v3120_v57 = vmul.f32 0.01, %v3054_v10  ;;  %7521 = vmatprep.mubr.msk.f32.mxu0 %vm507_vm4, %v3133_v55  ;;  %vm3104_vm10 = vcmp.gt.f32.partialorder %v3054_v10, 0.0 }
 0xc77   :  { %vm3103_vm9 = vcmp.gt.f32.partialorder %v3049_v35, 0.0  ;;  %v3119_v46 = vmul.f32 0.01, %v3049_v35  ;;  %v7501_v60 = vpop.f32.mrb[46].mxu0  ;;  %7522 = vmatmul.mubr.msk.f32.gmra.mrb[58].mxu0 %vm507_vm4, %v3134_v0 }
 0xc78   :  { %v3064_v19 = vadd.f32 %v7501_v60, %v8715_v22  ;;  %v3058_v12 = vpop.f32.mrb[47].mxu0  ;;  %v3136_v51 = vsel %vm3104_vm10, %v3054_v10, %v3120_v57 }
 0xc79   :  { %v3059_v39 = vadd.f32 %v3058_v12, %v8715_v22  ;;  %v3135_v27 = vsel %vm3103_vm9, %v3049_v35, %v3119_v46 }
 0xc7a   :  { %v3122_v13 = vmul.f32 0.01, %v3064_v19  ;;  %7524 = vmatprep.mubr.msk.f32.mxu0 %vm507_vm4, %v3135_v27  ;;  %vm3106_vm2 = vcmp.gt.f32.partialorder %v3064_v19, 0.0 }
 0xc7b   :  { %vm3105_vm8 = vcmp.gt.f32.partialorder %v3059_v39, 0.0  ;;  %v3121_v34 = vmul.f32 0.01, %v3059_v39  ;;  %v7504_v28 = vpop.f32.mrb[48].mxu0  ;;  %7525 = vmatmul.mubr.msk.f32.gmra.mrb[60].mxu0 %vm507_vm4, %v3136_v51 }
 0xc7c   :  { %v3074_v20 = vadd.f32 %v7504_v28, %v8715_v22  ;;  %v3068_v47 = vpop.f32.mrb[49].mxu0  ;;  %v3138_v35 = vsel %vm3106_vm2, %v3064_v19, %v3122_v13 }
 0xc7d   :  { %v3069_v55 = vadd.f32 %v3068_v47, %v8715_v22  ;;  %v3137_v0 = vsel %vm3105_vm8, %v3059_v39, %v3121_v34 }
 0xc7e   :  { %v3124_v60 = vmul.f32 0.01, %v3074_v20  ;;  %7527 = vmatprep.mubr.msk.f32.mxu0 %vm507_vm4, %v3137_v0  ;;  %vm3108_vm12 = vcmp.gt.f32.partialorder %v3074_v20, 0.0 }
 0xc7f   :  { %vm3107_vm9 = vcmp.gt.f32.partialorder %v3069_v55, 0.0  ;;  %v3123_v46 = vmul.f32 0.01, %v3069_v55  ;;  %v7507_v10 = vpop.f32.mrb[50].mxu0  ;;  %7528 = vmatmul.mubr.msk.f32.gmra.mrb[62].mxu0 %vm507_vm4, %v3138_v35 }
 0xc80   :  { %v3084_v57 = vadd.f32 %v7507_v10, %v8715_v22  ;;  %v3078_v12 = vpop.f32.mrb[51].mxu0  ;;  %v3140_v39 = vsel %vm3108_vm12, %v3074_v20, %v3124_v60 }
 0xc81   :  { %v3079_v27 = vadd.f32 %v3078_v12, %v8715_v22  ;;  %v3139_v51 = vsel %vm3107_vm9, %v3069_v55, %v3123_v46  ;;  %v8781_v12 = vrot.slane %v8674_v4, %v8182_v41 }
 0xc82   :  { %v3126_v28 = vmul.f32 0.01, %v3084_v57  ;;  %7530 = vmatprep.mubr.msk.f32.mxu0 %vm507_vm4, %v3139_v51  ;;  %vm3110_vm10 = vcmp.gt.f32.partialorder %v3084_v57, 0.0 }
 0xc83   :  { %vm3109_vm8 = vcmp.gt.f32.partialorder %v3079_v27, 0.0  ;;  %v3125_v34 = vmul.f32 0.01, %v3079_v27  ;;  %v7510_v19 = vpop.f32.mrb[52].mxu0  ;;  %7531 = vmatmul.mubr.msk.f32.gmra.mrb[64].mxu0 %vm507_vm4, %v3140_v39 }
 0xc84   :  { %v3094_v13 = vadd.f32 %v7510_v19, %v8715_v22  ;;  %v3088_v47 = vpop.f32.mrb[53].mxu0  ;;  %v3142_v55 = vsel %vm3110_vm10, %v3084_v57, %v3126_v28  ;;  %v3827_v57 = vld [vmem:[#allocation2 + $0xa0] sm:$0x3f] }
 0xc85   :  { %v3089_v0 = vadd.f32 %v3088_v47, %v8715_v22  ;;  %v3141_v35 = vsel %vm3109_vm8, %v3079_v27, %v3125_v34  ;;  %v3826_v22 = vld [vmem:[#allocation2 + $0x98] sm:$0x3f] }
 0xc86   :  { %v3128_v10 = vmul.f32 0.01, %v3094_v13  ;;  %7533 = vmatprep.mubr.msk.f32.mxu0 %vm507_vm4, %v3141_v35  ;;  %vm3112_vm2 = vcmp.gt.f32.partialorder %v3094_v13, 0.0 }
 0xc87   :  { %vm3111_vm9 = vcmp.gt.f32.partialorder %v3089_v0, 0.0  ;;  %v3127_v46 = vmul.f32 0.01, %v3089_v0  ;;  %7534 = vmatmul.mubr.msk.f32.gmra.mrb[66].mxu0 %vm507_vm4, %v3142_v55 }
 0xc88   :  { %v3144_v60 = vsel %vm3112_vm2, %v3094_v13, %v3128_v10 }
 0xc89   :  { %v3143_v20 = vsel %vm3111_vm9, %v3089_v0, %v3127_v46 }
 0xc8a   :  { %7536 = vmatprep.mubr.msk.f32.mxu0 %vm507_vm4, %v3143_v20 }
 0xc8b   :  { %7537 = vmatmul.mubr.msk.f32.gmra.mrb[68].mxu0 %vm507_vm4, %v3144_v60 }
 0xc8c   :  { %7567 = vmatprep.mubr.msk.f32.mxu0 %vm1768_vm3, %v8367_v23 }
 0xc8f   :  { %7568 = vmatmul.mubr.msk.f32.vlgmr.msra.gmra.mrb[70].mxu0 %vm1768_vm3, %v8387_v45 }
 0xc90   :  { %7572 = vmatprep.mubr.msk.f32.mxu0 %vm1768_vm3, %v8367_v23  ;;  %7571 = vmatpush3.msk.msra.mxu0 %vm1775_vm15, %v8722_v62  ;;  %v9404_v62 = vmov 0.0  }
 0xc91   :  { %7575 = vmatprep.subr.msk.mxu0 %vm304_vm0, %v3826_v22 }
 0xc93   :  { %7573 = vmatmul.mubr.msk.f32.vlgmr.msra.gmra.mrb[72].mxu0 %vm1768_vm3, %v8387_v45 }
 0xc94   :  { %7577 = vmatprep.mubr.msk.f32.mxu0 %vm255_vm1, %v8539_v53  ;;  %7576 = vmatpush3.msk.msra.mxu0 %vm304_vm0, %v3826_v22 }
 0xc95   :  { %7580 = vmatprep.subr.msk.mxu0 %vm304_vm0, %v3827_v57 }
 0xc97   :  { %7578 = vmatmul.mubr.msk.f32.vlgmr.msra.gmra.mrb[70].mxu0 %vm255_vm1, %v8546_v9 }
 0xc98   :  { %7582 = vmatprep.mubr.msk.f32.mxu0 %vm255_vm1, %v8539_v53  ;;  %7581 = vmatpush3.msk.msra.mxu0 %vm304_vm0, %v3827_v57 }
 0xc99   :  { %7585 = vmatprep.subr.mxu0 %v9404_v62 }
 0xc9b   :  { %7583 = vmatmul.mubr.msk.f32.vlgmr.msra.gmra.mrb[72].mxu0 %vm255_vm1, %v8546_v9 }
 0xc9c   :  { %7587 = vmatprep.mubr.msk.f32.mxu0 %vm7976_vm14, %v9404_v62 }
 0xd42   :  { %v7517_v27 = vpop.f32.mrb[54].mxu0 }
 0xd43   :  { %v3271_v51 = vadd.f32 %v7517_v27, %v8781_v12  ;;  %v3265_v28 = vpop.f32.mrb[55].mxu0 }
 0xd44   :  { %v3266_v39 = vadd.f32 %v3265_v28, %v8781_v12 }
 0xd45   :  { %v3361_v34 = vmul.f32 0.01, %v3271_v51  ;;  %vm3345_vm12 = vcmp.gt.f32.partialorder %v3271_v51, 0.0 }
 0xd46   :  { %vm3344_vm10 = vcmp.gt.f32.partialorder %v3266_v39, 0.0  ;;  %v3360_v19 = vmul.f32 0.01, %v3266_v39  ;;  %v7520_v13 = vpop.f32.mrb[56].mxu0 }
 0xd47   :  { %v3281_v47 = vadd.f32 %v7520_v13, %v8781_v12  ;;  %v3275_v0 = vpop.f32.mrb[57].mxu0  ;;  %v3377_v55 = vsel %vm3345_vm12, %v3271_v51, %v3361_v34 }
 0xd48   :  { %v3276_v35 = vadd.f32 %v3275_v0, %v8781_v12  ;;  %v3376_v10 = vsel %vm3344_vm10, %v3266_v39, %v3360_v19 }
 0xd49   :  { %v3363_v46 = vmul.f32 0.01, %v3281_v47  ;;  %7541 = vmatprep.mubr.msk.f32.mxu1 %vm1001_vm11, %v3376_v10  ;;  %vm3347_vm8 = vcmp.gt.f32.partialorder %v3281_v47, 0.0 }
 0xd4a   :  { %vm3346_vm2 = vcmp.gt.f32.partialorder %v3276_v35, 0.0  ;;  %v3362_v20 = vmul.f32 0.01, %v3276_v35  ;;  %v7523_v60 = vpop.f32.mrb[58].mxu0  ;;  %7542 = vmatmul.mubr.msk.f32.vlgmr.msra.gmra.mrb[52].mxu1 %vm1001_vm11, %v3377_v55 }
 0xd4b   :  { %v3291_v22 = vadd.f32 %v7523_v60, %v8781_v12  ;;  %v3285_v57 = vpop.f32.mrb[59].mxu0  ;;  %v3379_v39 = vsel %vm3347_vm8, %v3281_v47, %v3363_v46 }
 0xd4c   :  { %v3286_v27 = vadd.f32 %v3285_v57, %v8781_v12  ;;  %v3378_v28 = vsel %vm3346_vm2, %v3276_v35, %v3362_v20 }
 0xd4d   :  { %v3365_v13 = vmul.f32 0.01, %v3291_v22  ;;  %7544 = vmatprep.mubr.msk.f32.mxu1 %vm1001_vm11, %v3378_v28  ;;  %vm3349_vm9 = vcmp.gt.f32.partialorder %v3291_v22, 0.0 }
 0xd4e   :  { %vm3348_vm12 = vcmp.gt.f32.partialorder %v3286_v27, 0.0  ;;  %v3364_v51 = vmul.f32 0.01, %v3286_v27  ;;  %v7526_v34 = vpop.f32.mrb[60].mxu0  ;;  %7545 = vmatmul.mubr.msk.f32.gmra.mrb[54].mxu1 %vm1001_vm11, %v3379_v39 }
 0xd4f   :  { %v3301_v19 = vadd.f32 %v7526_v34, %v8781_v12  ;;  %v3295_v0 = vpop.f32.mrb[61].mxu0  ;;  %v3381_v35 = vsel %vm3349_vm9, %v3291_v22, %v3365_v13 }
 0xd50   :  { %v3296_v10 = vadd.f32 %v3295_v0, %v8781_v12  ;;  %v3380_v55 = vsel %vm3348_vm12, %v3286_v27, %v3364_v51 }
 0xd51   :  { %v3367_v60 = vmul.f32 0.01, %v3301_v19  ;;  %7547 = vmatprep.mubr.msk.f32.mxu1 %vm1001_vm11, %v3380_v55  ;;  %vm3351_vm10 = vcmp.gt.f32.partialorder %v3301_v19, 0.0 }
 0xd52   :  { %vm3350_vm2 = vcmp.gt.f32.partialorder %v3296_v10, 0.0  ;;  %v3366_v20 = vmul.f32 0.01, %v3296_v10  ;;  %v7529_v47 = vpop.f32.mrb[62].mxu0  ;;  %7548 = vmatmul.mubr.msk.f32.gmra.mrb[56].mxu1 %vm1001_vm11, %v3381_v35 }
 0xd53   :  { %v3311_v46 = vadd.f32 %v7529_v47, %v8781_v12  ;;  %v3305_v57 = vpop.f32.mrb[63].mxu0  ;;  %v3383_v27 = vsel %vm3351_vm10, %v3301_v19, %v3367_v60 }
 0xd54   :  { %v3306_v28 = vadd.f32 %v3305_v57, %v8781_v12  ;;  %v3382_v39 = vsel %vm3350_vm2, %v3296_v10, %v3366_v20 }
 0xd55   :  { %v3369_v34 = vmul.f32 0.01, %v3311_v46  ;;  %7550 = vmatprep.mubr.msk.f32.mxu1 %vm1001_vm11, %v3382_v39  ;;  %vm3353_vm8 = vcmp.gt.f32.partialorder %v3311_v46, 0.0 }
 0xd56   :  { %vm3352_vm12 = vcmp.gt.f32.partialorder %v3306_v28, 0.0  ;;  %v3368_v51 = vmul.f32 0.01, %v3306_v28  ;;  %v7532_v22 = vpop.f32.mrb[64].mxu0  ;;  %7551 = vmatmul.mubr.msk.f32.gmra.mrb[58].mxu1 %vm1001_vm11, %v3383_v27 }
 0xd57   :  { %v3321_v13 = vadd.f32 %v7532_v22, %v8781_v12  ;;  %v3315_v0 = vpop.f32.mrb[65].mxu0  ;;  %v3385_v10 = vsel %vm3353_vm8, %v3311_v46, %v3369_v34 }
 0xd58   :  { %v3316_v55 = vadd.f32 %v3315_v0, %v8781_v12  ;;  %v3384_v35 = vsel %vm3352_vm12, %v3306_v28, %v3368_v51 }
 0xd59   :  { %v3371_v47 = vmul.f32 0.01, %v3321_v13  ;;  %7553 = vmatprep.mubr.msk.f32.mxu1 %vm1001_vm11, %v3384_v35  ;;  %vm3355_vm9 = vcmp.gt.f32.partialorder %v3321_v13, 0.0 }
 0xd5a   :  { %vm3354_vm2 = vcmp.gt.f32.partialorder %v3316_v55, 0.0  ;;  %v3370_v20 = vmul.f32 0.01, %v3316_v55  ;;  %v7535_v19 = vpop.f32.mrb[66].mxu0  ;;  %7554 = vmatmul.mubr.msk.f32.gmra.mrb[60].mxu1 %vm1001_vm11, %v3385_v10 }
 0xd5b   :  { %v3331_v60 = vadd.f32 %v7535_v19, %v8781_v12  ;;  %v3325_v57 = vpop.f32.mrb[67].mxu0  ;;  %v3387_v28 = vsel %vm3355_vm9, %v3321_v13, %v3371_v47 }
 0xd5c   :  { %v3326_v39 = vadd.f32 %v3325_v57, %v8781_v12  ;;  %v3386_v27 = vsel %vm3354_vm2, %v3316_v55, %v3370_v20 }
 0xd5d   :  { %v3373_v22 = vmul.f32 0.01, %v3331_v60  ;;  %7556 = vmatprep.mubr.msk.f32.mxu1 %vm1001_vm11, %v3386_v27  ;;  %vm3357_vm10 = vcmp.gt.f32.partialorder %v3331_v60, 0.0 }
 0xd5e   :  { %vm3356_vm12 = vcmp.gt.f32.partialorder %v3326_v39, 0.0  ;;  %v3372_v51 = vmul.f32 0.01, %v3326_v39  ;;  %v7538_v46 = vpop.f32.mrb[68].mxu0  ;;  %7557 = vmatmul.mubr.msk.f32.gmra.mrb[62].mxu1 %vm1001_vm11, %v3387_v28 }
 0xd5f   :  { %v3341_v34 = vadd.f32 %v7538_v46, %v8781_v12  ;;  %v3335_v0 = vpop.f32.mrb[69].mxu0  ;;  %v3389_v55 = vsel %vm3357_vm10, %v3331_v60, %v3373_v22  ;;  %v8824_v60 = vrot.slane %v8674_v4, %v8223_v50 }
 0xd60   :  { %v3336_v35 = vadd.f32 %v3335_v0, %v8781_v12  ;;  %v3388_v10 = vsel %vm3356_vm12, %v3326_v39, %v3372_v51 }
 0xd61   :  { %v3375_v19 = vmul.f32 0.01, %v3341_v34  ;;  %7559 = vmatprep.mubr.msk.f32.mxu1 %vm1001_vm11, %v3388_v10  ;;  %vm3359_vm8 = vcmp.gt.f32.partialorder %v3341_v34, 0.0 }
 0xd62   :  { %vm3358_vm2 = vcmp.gt.f32.partialorder %v3336_v35, 0.0  ;;  %v3374_v20 = vmul.f32 0.01, %v3336_v35  ;;  %7560 = vmatmul.mubr.msk.f32.gmra.mrb[64].mxu1 %vm1001_vm11, %v3389_v55 }
 0xd63   :  { %v3391_v47 = vsel %vm3359_vm8, %v3341_v34, %v3375_v19  ;;  %v8830_v34 = vrot.slane %v8674_v4, %v8230_v61 }
 0xd64   :  { %v3390_v13 = vsel %vm3358_vm2, %v3336_v35, %v3374_v20 }
 0xd65   :  { %7562 = vmatprep.mubr.msk.f32.mxu1 %vm1001_vm11, %v3390_v13 }
 0xd66   :  { %7563 = vmatmul.mubr.msk.f32.gmra.mrb[66].mxu1 %vm1001_vm11, %v3391_v47 }
 0xd6a   :  { %v8815_v57 = vpop.f32.mrb[70].mxu0 }
 0xd6b   :  { %v8817_v27 = vpop.f32.mrb[71].mxu0 }
 0xd6e   :  { %v8819_v12 = vpop.f32.mrb[72].mxu0 }
 0xd6f   :  { %v4137_v39 = vpop.f32.mrb[73].mxu0 }
 0xd70   :  { %7586 = vmatpush3.msra.mxu0 %v4137_v39 }
 0xd71   :  { %7590 = vmatprep.subr.mxu0 %v9404_v62 }
 0xe1d   :  { %v7543_v22 = vpop.f32.mrb[52].mxu1 }
 0xe1e   :  { %v3517_v28 = vadd.f32 %v7543_v22, %v8824_v60  ;;  %v3511_v51 = vpop.f32.mrb[53].mxu1 }
 0xe1f   :  { %v3512_v46 = vadd.f32 %v3511_v51, %v8824_v60 }
 0xe20   :  { %vm3591_vm9 = vcmp.gt.f32.partialorder %v3517_v28, 0.0  ;;  %v3607_v0 = vmul.f32 0.01, %v3517_v28 }
 0xe21   :  { %vm3590_vm10 = vcmp.gt.f32.partialorder %v3512_v46, 0.0  ;;  %v3606_v35 = vmul.f32 0.01, %v3512_v46  ;;  %v7546_v10 = vpop.f32.mrb[54].mxu1 }
 0xe22   :  { %v3527_v19 = vadd.f32 %v7546_v10, %v8824_v60  ;;  %v3521_v55 = vpop.f32.mrb[55].mxu1  ;;  %v3623_v20 = vsel %vm3591_vm9, %v3517_v28, %v3607_v0 }
 0xe23   :  { %v3522_v13 = vadd.f32 %v3521_v55, %v8824_v60  ;;  %v3643_v47 = vmul.f32 %v8830_v34, %v3623_v20  ;;  %v3622_v39 = vsel %vm3590_vm10, %v3512_v46, %v3606_v35 }
 0xe24   :  { %vm3593_vm12 = vcmp.gt.f32.partialorder %v3527_v19, 0.0  ;;  %v3609_v22 = vmul.f32 0.01, %v3527_v19  ;;  %v3642_v51 = vmul.f32 %v8830_v34, %v3622_v39 }
 0xe25   :  { %vm3592_vm8 = vcmp.gt.f32.partialorder %v3522_v13, 0.0  ;;  %v3608_v4 = vmul.f32 0.01, %v3522_v13  ;;  %v7549_v61 = vpop.f32.mrb[56].mxu1  ;;  %v3661_v50 = vsel %vm1001_vm11, %v3643_v47, 0.0 }
 0xe26   :  { %v3537_v41 = vadd.f32 %v7549_v61, %v8824_v60  ;;  %3662 = vadd.xlane.f32.xlu0 %v3661_v50  ;;  %v3531_v10 = vpop.f32.mrb[57].mxu1  ;;  %v3658_v28 = vsel %vm1001_vm11, %v3642_v51, 0.0  ;;  %v3625_v0 = vsel %vm3593_vm12, %v3527_v19, %v3609_v22 }
 0xe27   :  { %v3532_v55 = vadd.f32 %v3531_v10, %v8824_v60  ;;  %3659 = vadd.xlane.f32.xlu1 %v3658_v28  ;;  %v3624_v46 = vsel %vm3592_vm8, %v3522_v13, %v3608_v4  ;;  %v3645_v35 = vmul.f32 %v8830_v34, %v3625_v0 }
 0xe28   :  { %vm3595_vm2 = vcmp.gt.f32.partialorder %v3537_v41, 0.0  ;;  %v3611_v20 = vmul.f32 0.01, %v3537_v41  ;;  %v3644_v39 = vmul.f32 %v8830_v34, %v3624_v46 }
 0xe29   :  { %vm3594_vm9 = vcmp.gt.f32.partialorder %v3532_v55, 0.0  ;;  %v3610_v32 = vmul.f32 0.01, %v3532_v55  ;;  %v7552_v47 = vpop.f32.mrb[58].mxu1  ;;  %v3667_v61 = vsel %vm1001_vm11, %v3645_v35, 0.0 }
 0xe2a   :  { %v3547_v50 = vadd.f32 %v7552_v47, %v8824_v60  ;;  %v3541_v9 = vpop.f32.mrb[59].mxu1  ;;  %v3664_v19 = vsel %vm1001_vm11, %v3644_v39, 0.0  ;;  %v3627_v22 = vsel %vm3595_vm2, %v3537_v41, %v3611_v20 }
 0xe2b   :  { %v3542_v51 = vadd.f32 %v3541_v9, %v8824_v60  ;;  %3665 = vadd.xlane.f32.xlu0 %v3664_v19  ;;  %3668 = vadd.xlane.f32.xlu1 %v3667_v61  ;;  %v3626_v13 = vsel %vm3594_vm9, %v3532_v55, %v3610_v32  ;;  %v3647_v4 = vmul.f32 %v8830_v34, %v3627_v22 }
 0xe2c   :  { %vm3597_vm10 = vcmp.gt.f32.partialorder %v3547_v50, 0.0  ;;  %v3613_v10 = vmul.f32 0.01, %v3547_v50  ;;  %v3646_v28 = vmul.f32 %v8830_v34, %v3626_v13 }
 0xe2d   :  { %vm3596_vm12 = vcmp.gt.f32.partialorder %v3542_v51, 0.0  ;;  %v3612_v0 = vmul.f32 0.01, %v3542_v51  ;;  %v7555_v46 = vpop.f32.mrb[60].mxu1  ;;  %v3673_v35 = vsel %vm1001_vm11, %v3647_v4, 0.0 }
 0xe2e   :  { %v3557_v47 = vadd.f32 %v7555_v46, %v8824_v60  ;;  %v3551_v39 = vpop.f32.mrb[61].mxu1  ;;  %v3670_v41 = vsel %vm1001_vm11, %v3646_v28, 0.0  ;;  %v3629_v9 = vsel %vm3597_vm10, %v3547_v50, %v3613_v10 }
 0xe2f   :  { %v3552_v20 = vadd.f32 %v3551_v39, %v8824_v60  ;;  %3671 = vadd.xlane.f32.xlu0 %v3670_v41  ;;  %3674 = vadd.xlane.f32.xlu1 %v3673_v35  ;;  %v3628_v32 = vsel %vm3596_vm12, %v3542_v51, %v3612_v0  ;;  %v3649_v55 = vmul.f32 %v8830_v34, %v3629_v9 }
 0xe30   :  { %vm3599_vm8 = vcmp.gt.f32.partialorder %v3557_v47, 0.0  ;;  %v3615_v61 = vmul.f32 0.01, %v3557_v47  ;;  %v3648_v19 = vmul.f32 %v8830_v34, %v3628_v32 }
 0xe31   :  { %vm3598_vm2 = vcmp.gt.f32.partialorder %v3552_v20, 0.0  ;;  %v3614_v22 = vmul.f32 0.01, %v3552_v20  ;;  %v7558_v13 = vpop.f32.mrb[62].mxu1  ;;  %v3679_v4 = vsel %vm1001_vm11, %v3649_v55, 0.0 }
 0xe32   :  { %v3567_v46 = vadd.f32 %v7558_v13, %v8824_v60  ;;  %v3561_v28 = vpop.f32.mrb[63].mxu1  ;;  %v3676_v50 = vsel %vm1001_vm11, %v3648_v19, 0.0  ;;  %v3631_v10 = vsel %vm3599_vm8, %v3557_v47, %v3615_v61 }
 0xe33   :  { %v3562_v35 = vadd.f32 %v3561_v28, %v8824_v60  ;;  %3677 = vadd.xlane.f32.xlu0 %v3676_v50  ;;  %3680 = vadd.xlane.f32.xlu1 %v3679_v4  ;;  %v3630_v51 = vsel %vm3598_vm2, %v3552_v20, %v3614_v22  ;;  %v3651_v0 = vmul.f32 %v8830_v34, %v3631_v10 }
 0xe34   :  { %vm3601_vm9 = vcmp.gt.f32.partialorder %v3567_v46, 0.0  ;;  %v3617_v39 = vmul.f32 0.01, %v3567_v46  ;;  %v3650_v41 = vmul.f32 %v8830_v34, %v3630_v51 }
 0xe35   :  { %vm3600_vm10 = vcmp.gt.f32.partialorder %v3562_v35, 0.0  ;;  %v3616_v9 = vmul.f32 0.01, %v3562_v35  ;;  %v7561_v32 = vpop.f32.mrb[64].mxu1  ;;  %v3685_v55 = vsel %vm1001_vm11, %v3651_v0, 0.0 }
 0xe36   :  { %v3577_v13 = vadd.f32 %v7561_v32, %v8824_v60  ;;  %v3571_v19 = vpop.f32.mrb[65].mxu1  ;;  %v3682_v47 = vsel %vm1001_vm11, %v3650_v41, 0.0  ;;  %v3633_v61 = vsel %vm3601_vm9, %v3567_v46, %v3617_v39 }
 0xe37   :  { %v3572_v4 = vadd.f32 %v3571_v19, %v8824_v60  ;;  %3683 = vadd.xlane.f32.xlu0 %v3682_v47  ;;  %3686 = vadd.xlane.f32.xlu1 %v3685_v55  ;;  %v3632_v20 = vsel %vm3600_vm10, %v3562_v35, %v3616_v9  ;;  %v3653_v22 = vmul.f32 %v8830_v34, %v3633_v61  ;;  %vm9405_vm10 = vcmask 1044484  }
 0xe38   :  { %vm3603_vm12 = vcmp.gt.f32.partialorder %v3577_v13, 0.0  ;;  %v3619_v28 = vmul.f32 0.01, %v3577_v13  ;;  %v3652_v50 = vmul.f32 %v8830_v34, %v3632_v20 }
 0xe39   :  { %vm3602_vm8 = vcmp.gt.f32.partialorder %v3572_v4, 0.0  ;;  %v3618_v10 = vmul.f32 0.01, %v3572_v4  ;;  %v7564_v51 = vpop.f32.mrb[66].mxu1  ;;  %v3691_v0 = vsel %vm1001_vm11, %v3653_v22, 0.0 }
 0xe3a   :  { %v3587_v32 = vadd.f32 %v7564_v51, %v8824_v60  ;;  %v3581_v41 = vpop.f32.mrb[67].mxu1  ;;  %v3688_v46 = vsel %vm1001_vm11, %v3652_v50, 0.0  ;;  %v3635_v39 = vsel %vm3603_vm12, %v3577_v13, %v3619_v28  ;;  %vm9406_vm12 = vcmask 1045509  }
 0xe3b   :  { %v3582_v55 = vadd.f32 %v3581_v41, %v8824_v60  ;;  %3689 = vadd.xlane.f32.xlu0 %v3688_v46  ;;  %3692 = vadd.xlane.f32.xlu1 %v3691_v0  ;;  %v3634_v35 = vsel %vm3602_vm8, %v3572_v4, %v3618_v10  ;;  %v3655_v9 = vmul.f32 %v8830_v34, %v3635_v39  ;;  %vm9407_vm8 = vcmask 1046534  }
 0xe3c   :  { %vm3605_vm2 = vcmp.gt.f32.partialorder %v3587_v32, 0.0  ;;  %v3621_v19 = vmul.f32 0.01, %v3587_v32  ;;  %v3654_v47 = vmul.f32 %v8830_v34, %v3634_v35 }
 0xe3d   :  { %vm3604_vm9 = vcmp.gt.f32.partialorder %v3582_v55, 0.0  ;;  %v3620_v61 = vmul.f32 0.01, %v3582_v55  ;;  %v3697_v20 = vsel %vm1001_vm11, %v3655_v9, 0.0 }
 0xe3e   :  { %v3694_v22 = vsel %vm1001_vm11, %v3654_v47, 0.0  ;;  %v3637_v51 = vsel %vm3605_vm2, %v3587_v32, %v3621_v19  ;;  %vm9408_vm2 = vcmask 1047559  }
 0xe3f   :  { %3695 = vadd.xlane.f32.xlu0 %v3694_v22  ;;  %3698 = vadd.xlane.f32.xlu1 %v3697_v20  ;;  %v3657_v60 = vmul.f32 %v8830_v34, %v3637_v51  ;;  %v3636_v13 = vsel %vm3604_vm9, %v3582_v55, %v3620_v61  ;;  %vm9409_vm9 = vmmov %vm9405_vm10 }
 0xe40   :  { %v3656_v4 = vmul.f32 %v8830_v34, %v3636_v13 }
 0xe41   :  { %v3703_v28 = vsel %vm1001_vm11, %v3657_v60, 0.0 }
 0xe42   :  { %v3700_v50 = vsel %vm1001_vm11, %v3656_v4, 0.0 }
 0xe43   :  { %3704 = vadd.xlane.f32.xlu1 %v3703_v28  ;;  %3701 = vadd.xlane.f32.xlu0 %v3700_v50 }
 0xeb3   :  { %v3663_v10 = vpop.xlane.xlu0 %3662 }
 0xeb4   :  { %v3660_v0 = vpop.xlane.xlu1 %3659  ;;  %v3729_v41 = vrot.slane %v3663_v10, %v8300_v54 }
 0xeb5   :  { %v3725_v46 = vrot.slane %v3660_v0, %v8300_v54 }
 0xeb7   :  { %v3786_v55 = vsel %vm1396_vm5, %v3729_v41, %v3725_v46 }
 0xeb8   :  { %v3666_v32 = vpop.xlane.xlu0 %3665  ;;  %v3669_v39 = vpop.xlane.xlu1 %3668 }
 0xeb9   :  { %v3733_v35 = vrot.slane %v3666_v32, %v8300_v54  ;;  %v3737_v34 = vrot.slane %v3669_v39, %v8300_v54 }
 0xebb   :  { %v3787_v9 = vsel %vm1398_vm6, %v3733_v35, %v3786_v55 }
 0xebc   :  { %v3672_v19 = vpop.xlane.xlu0 %3671  ;;  %v3675_v47 = vpop.xlane.xlu1 %3674  ;;  %v3788_v20 = vsel %vm1400_vm7, %v3737_v34, %v3787_v9 }
 0xebd   :  { %v3741_v61 = vrot.slane %v3672_v19, %v8300_v54  ;;  %v3745_v22 = vrot.slane %v3675_v47, %v8300_v54 }
 0xebf   :  { %v3789_v51 = vsel %vm9405_vm10, %v3741_v61, %v3788_v20  ;;  %vm9410_vm10 = vmmov %vm9406_vm12 }
 0xec0   :  { %v3678_v60 = vpop.xlane.xlu0 %3677  ;;  %v3681_v13 = vpop.xlane.xlu1 %3680  ;;  %v3790_v50 = vsel %vm9406_vm12, %v3745_v22, %v3789_v51  ;;  %vm9411_vm12 = vmmov %vm9407_vm8 }
 0xec1   :  { %v3749_v4 = vrot.slane %v3678_v60, %v8300_v54  ;;  %v3753_v28 = vrot.slane %v3681_v13, %v8300_v54 }
 0xec3   :  { %v3791_v10 = vsel %vm9407_vm8, %v3749_v4, %v3790_v50  ;;  %vm9412_vm8 = vmmov %vm9408_vm2 }
 0xec4   :  { %v3684_v0 = vpop.xlane.xlu0 %3683  ;;  %v3687_v41 = vpop.xlane.xlu1 %3686  ;;  %v3792_v46 = vsel %vm9408_vm2, %v3753_v28, %v3791_v10 }
 0xec5   :  { %v3802_v32 = vsel %vm8320_vm13, %v3792_v46, -1e+30  ;;  %v3757_v39 = vrot.slane %v3684_v0, %v8300_v54  ;;  %v3761_v35 = vrot.slane %v3687_v41, %v8300_v54 }
 0xec6   :  { %v3804_v55 = vsel %vm1001_vm11, %v3802_v32, -inf }
 0xec7   :  { %3805 = vmax.xlane.f32.xlu0 %v3804_v55  ;;  %v3793_v47 = vsel %vm1396_vm5, %v3761_v35, %v3757_v39 }
 0xec8   :  { %v3690_v34 = vpop.xlane.xlu0 %3689  ;;  %v3693_v9 = vpop.xlane.xlu1 %3692 }
 0xec9   :  { %v3765_v19 = vrot.slane %v3690_v34, %v8300_v54  ;;  %v3769_v61 = vrot.slane %v3693_v9, %v8300_v54 }
 0xecb   :  { %v3794_v20 = vsel %vm1398_vm6, %v3765_v19, %v3793_v47 }
 0xecc   :  { %v3696_v22 = vpop.xlane.xlu0 %3695  ;;  %v3699_v51 = vpop.xlane.xlu1 %3698  ;;  %v3795_v13 = vsel %vm1400_vm7, %v3769_v61, %v3794_v20 }
 0xecd   :  { %v3773_v60 = vrot.slane %v3696_v22, %v8300_v54  ;;  %v3777_v4 = vrot.slane %v3699_v51, %v8300_v54 }
 0xecf   :  { %v3796_v28 = vsel %vm9409_vm9, %v3773_v60, %v3795_v13 }
 0xed0   :  { %v3705_v50 = vpop.xlane.xlu1 %3704  ;;  %v3702_v10 = vpop.xlane.xlu0 %3701  ;;  %v3797_v46 = vsel %vm9410_vm10, %v3777_v4, %v3796_v28 }
 0xed1   :  { %v3785_v0 = vrot.slane %v3705_v50, %v8300_v54  ;;  %v3781_v41 = vrot.slane %v3702_v10, %v8300_v54 }
 0xed3   :  { %v3798_v39 = vsel %vm9411_vm12, %v3781_v41, %v3797_v46 }
 0xed4   :  { %v3799_v35 = vsel %vm9412_vm8, %v3785_v0, %v3798_v39  ;;  %v4308_v0 = vld [vmem:[#allocation2 + $0xc8] sm:$0xf]  ;;  %v4307_v39 = vld [vmem:[#allocation2 + $0xc0] sm:$0x3f] }
 0xed5   :  { %v3803_v55 = vsel %vm8320_vm13, %v3799_v35, -1e+30  ;;  %v9413_v35 = vand.u32 2147483647, %v8381_v38  ;;  %v9415_v38 = vand.u32 2147483647, %v8404_v56 }
 0xed6   :  { %v3807_v34 = vsel %vm1001_vm11, %v3803_v55, -inf  ;;  %v9419_v56 = vand.u32 2147483647, %v8481_v44  ;;  %v9427_v44 = vand.u32 2147483647, %v8640_v1 }
 0xed7   :  { %3808 = vmax.xlane.f32.xlu1 %v3807_v34  ;;  %v9416_v34 = vand.u32 2147483647, %v8426_v6  ;;  %v9420_v6 = vand.u32 2147483647, %v8492_v52  ;;  %v6028_v52 = vld [vmem:[#allocation2 + $0x110] sm:$0xf] }
 0xf54   :  { %v3806_v9 = vpop.xlane.xlu0 %3805 }
 0xf55   :  { %v3810_v19 = vsub.f32 %v3802_v32, %v3806_v9 }
 0xf57   :  { %v3812_v47 = vmul.f32 1.442695, %v3810_v19 }
 0xf59   :  { %7902 = vpow2.f32 %v3812_v47 }
 0xf63   :  { %v7903_v61 = vpop.eup %7902 }
 0xf64   :  { %v3809_v20 = vpop.xlane.xlu1 %3808  ;;  %v3816_v22 = vsel %vm1001_vm11, %v7903_v61, 0.0 }
 0xf65   :  { %v3811_v51 = vsub.f32 %v3803_v55, %v3809_v20  ;;  %3817 = vadd.xlane.f32.xlu0 %v3816_v22  ;;  %v9414_v55 = vand.u32 2147483647, %v8391_v48  ;;  %v9417_v48 = vand.u32 2147483647, %v8451_v26  ;;  %v9423_v26 = vand.u32 2147483647, %v8579_v14 }
 0xf67   :  { %v3814_v60 = vmul.f32 1.442695, %v3811_v51 }
 0xf69   :  { %7904 = vpow2.f32 %v3814_v60 }
 0xf73   :  { %v7905_v13 = vpop.eup %7904 }
 0xf74   :  { %v3819_v4 = vsel %vm1001_vm11, %v7905_v13, 0.0 }
 0xf75   :  { %3820 = vadd.xlane.f32.xlu1 %v3819_v4 }
 0xff2   :  { %v3818_v28 = vpop.xlane.xlu0 %3817 }
 0xff3   :  { %7906 = vrcp.f32 %v3818_v28 }
 0xffd   :  { %v7907_v50 = vpop.eup %7906 }
 0xffe   :  { %v3824_v10 = vmul.f32 %v7907_v50, %v7903_v61 }
0x1000   :  { %7588 = vmatmul.mubr.msk.f32.vlgmr.msra.gmra.mrb[74].mxu0 %vm1001_vm11, %v3824_v10 }
0x1001   :  { %7591 = vmatpush3.msra.mxu0 %v8819_v12  ;;  %7592 = vmatprep.mubr.msk.f32.mxu0 %vm7976_vm14, %v9404_v62  ;;  %v4817_v12 = vld [vmem:[#allocation2 + $0xd0] sm:$0xf] }
0x1002   :  { %v3821_v32 = vpop.xlane.xlu1 %3820  ;;  %7595 = vmatprep.subr.msk.mxu0 %vm1775_vm15, %v4308_v0 }
0x1003   :  { %7908 = vrcp.f32 %v3821_v32 }
0x100d   :  { %v7909_v41 = vpop.eup %7908 }
0x100e   :  { %v3825_v46 = vmul.f32 %v7909_v41, %v7905_v13 }
0x1010   :  { %7593 = vmatmul.mubr.msk.f32.vlgmr.msra.gmra.mrb[76].mxu0 %vm1001_vm11, %v3825_v46 }
0x1011   :  { %7597 = vmatprep.mubr.msk.f32.mxu0 %vm1768_vm3, %v9413_v35  ;;  %7596 = vmatpush3.msk.msra.mxu0 %vm1775_vm15, %v4308_v0 }
0x1012   :  { %7621 = vmatprep.subr.msk.mxu0 %vm304_vm0, %v4307_v39 }
0x1014   :  { %7598 = vmatmul.mubr.msk.f32.vlgmr.msra.gmra.mrb[78].mxu0 %vm1768_vm3, %v9414_v55 }
0x1015   :  { %7600 = vmatprep.mubr.msk.f32.mxu0 %vm1768_vm3, %v8408_v59  ;;  %7622 = vmatpush3.msk.msra.mxu0 %vm304_vm0, %v4307_v39  ;;  %v9418_v59 = vand.u32 2147483647, %v8463_v30  ;;  %v9425_v30 = vand.u32 2147483647, %v8610_v42 }
0x1016   :  { %7647 = vmatprep.subr.msk.mxu0 %vm1775_vm15, %v4817_v12 }
0x1018   :  { %7601 = vmatmul.mubr.msk.f32.gmra.mrb[80].mxu0 %vm1768_vm3, %v8430_v11  ;;  %v9421_v11 = vand.u32 2147483647, %v8556_v24 }
0x1019   :  { %7603 = vmatprep.mubr.msk.f32.mxu0 %vm1768_vm3, %v9415_v38 }
0x101c   :  { %7604 = vmatmul.mubr.msk.f32.gmra.mrb[82].mxu0 %vm1768_vm3, %v9416_v34 }
0x101d   :  { %7606 = vmatprep.mubr.msk.f32.mxu0 %vm1768_vm3, %v8448_v25  ;;  %v9422_v25 = vand.u32 2147483647, %v8564_v36  ;;  %v7921_v36 = vld [vmem:[#allocation2 + $0xb8] sm:$0xff] }
0x1020   :  { %7607 = vmatmul.mubr.msk.f32.gmra.mrb[84].mxu0 %vm1768_vm3, %v8460_v29  ;;  %v9424_v29 = vand.u32 2147483647, %v8592_v8 }
0x1021   :  { %7609 = vmatprep.mubr.msk.f32.mxu0 %vm1768_vm3, %v9417_v48 }
0x1024   :  { %7610 = vmatmul.mubr.msk.f32.gmra.mrb[86].mxu0 %vm1768_vm3, %v9418_v59 }
0x1025   :  { %7612 = vmatprep.mubr.msk.f32.mxu0 %vm1768_vm3, %v8478_v43  ;;  %v9426_v43 = vand.u32 2147483647, %v8622_v17 }
0x1028   :  { %7613 = vmatmul.mubr.msk.f32.gmra.mrb[88].mxu0 %vm1768_vm3, %v8489_v49  ;;  %v9428_v49 = vand.u32 2147483647, %v8651_v18 }
0x1029   :  { %7615 = vmatprep.mubr.msk.f32.mxu0 %vm1768_vm3, %v9419_v56  ;;  %v9035_v56 = vld [vmem:[#allocation2 + $0x100] sm:$0x3f] }
0x102c   :  { %7616 = vmatmul.mubr.msk.f32.gmra.mrb[90].mxu0 %vm1768_vm3, %v9420_v6 }
0x102d   :  { %7618 = vmatprep.mubr.msk.f32.mxu0 %vm1768_vm3, %v8504_v2  ;;  %v5098_v2 = vld [vmem:[#allocation2 + $0xd8] sm:$0xff] }
0x1030   :  { %7619 = vmatmul.mubr.msk.f32.gmra.mrb[92].mxu0 %vm1768_vm3, %v8511_v7  ;;  %v5099_v7 = vld [vmem:[#allocation2 + $0xe0] sm:$0xff] }
0x1031   :  { %7623 = vmatprep.mubr.msk.f32.mxu0 %vm255_vm1, %v9421_v11  ;;  %v7811_v24 = vpack.c.bf16 %v5099_v7, %v5098_v2 }
0x1033   :  { %7812 = vmatprep.subr.bf16.mxu1 %v7811_v24 }
0x1034   :  { %7624 = vmatmul.mubr.msk.f32.vlgmr.msra.gmra.mrb[78].mxu0 %vm255_vm1, %v9422_v25  ;;  %7814 = vmatpush3.bf16.msra.mxu1 %v7811_v24 }
0x1035   :  { %7626 = vmatprep.mubr.msk.f32.mxu0 %vm255_vm1, %v8575_v58  ;;  %7648 = vmatpush3.msk.msra.mxu0 %vm1775_vm15, %v4817_v12  ;;  %v4297_v58 = vrot.slane %v7921_v36, %v8364_v15 }
0x1036   :  { %7755 = vmatprep.subr.msk.mxu0 %vm1775_vm15, %v6028_v52 }
0x1038   :  { %7627 = vmatmul.mubr.msk.f32.gmra.mrb[80].mxu0 %vm255_vm1, %v8589_v63 }
0x1039   :  { %7629 = vmatprep.mubr.msk.f32.mxu0 %vm255_vm1, %v9423_v26 }
0x103c   :  { %7630 = vmatmul.mubr.msk.f32.gmra.mrb[82].mxu0 %vm255_vm1, %v9424_v29 }
0x103d   :  { %7632 = vmatprep.mubr.msk.f32.mxu0 %vm255_vm1, %v8607_v40 }
0x1040   :  { %7633 = vmatmul.mubr.msk.f32.gmra.mrb[84].mxu0 %vm255_vm1, %v8619_v16 }
0x1041   :  { %7635 = vmatprep.mubr.msk.f32.mxu0 %vm255_vm1, %v9425_v30 }
0x1044   :  { %7636 = vmatmul.mubr.msk.f32.gmra.mrb[86].mxu0 %vm255_vm1, %v9426_v43 }
0x1045   :  { %7638 = vmatprep.mubr.msk.f32.mxu0 %vm255_vm1, %v8637_v33 }
0x1048   :  { %7639 = vmatmul.mubr.msk.f32.gmra.mrb[88].mxu0 %vm255_vm1, %v8648_v3 }
0x1049   :  { %7641 = vmatprep.mubr.msk.f32.mxu0 %vm255_vm1, %v9427_v44 }
0x104c   :  { %7642 = vmatmul.mubr.msk.f32.gmra.mrb[90].mxu0 %vm255_vm1, %v9428_v49 }
0x104d   :  { %7644 = vmatprep.mubr.msk.f32.mxu0 %vm255_vm1, %v8663_v31 }
0x1050   :  { %7645 = vmatmul.mubr.msk.f32.gmra.mrb[92].mxu0 %vm255_vm1, %v8670_v37  ;;  %v9429_v37 = vld [vmem:[#allocation8_spill] sm:$0xff] }
0x10d3   :  { %v4215_v14 = vpop.f32.mrb[74].mxu0 }
0x10d4   :  { %v4292_v63 = vadd.f32 %v4215_v14, %v8817_v27  ;;  %v7589_v8 = vpop.f32.mrb[75].mxu0 }
0x10d6   :  { %v4298_v33 = vadd.f32 %v4297_v58, %v4292_v63 }
0x10d8   :  { %vm4300_vm2 = vcmp.gt.f32.partialorder %v4298_v33, 0.0  ;;  %v4302_v40 = vmul.f32 0.01, %v4298_v33 }
0x10da   :  { %v9010_v42 = vsel %vm4300_vm2, %v4298_v33, %v4302_v40 }
0x10db   :  { %v4614_v16 = vrot.slane %v9010_v42, %v8019_v5  ;;  %v4607_v17 = vcombine.high %v9010_v42, %v9010_v42 }
0x10dd   :  { %v4622_v3 = vcombine.high %v4614_v16, %v4614_v16  ;;  %v4630_v31 = vrot.slane %v4614_v16, %v8019_v5  ;;  %v4621_v1 = vrot.slane %v4607_v17, %v8019_v5 }
0x10df   :  { %v4644_v18 = vrot.slane %v4622_v3, %v8019_v5  ;;  %v4708_v27 = vrot.slane %v4630_v31, %v9429_v37  ;;  %v4652_v9 = vcombine.high %v4630_v31, %v4630_v31  ;;  %v4637_v19 = vrot.slane %v4621_v1, %v8019_v5 }
0x10e0   :  { %v4623_v47 = vcombine.high %v4621_v1, %v4621_v1 }
0x10e1   :  { %v4785_v61 = vsub.f32 %v4708_v27, %v9010_v42  ;;  %v4712_v20 = vrot.slane %v4644_v18, %v9429_v37  ;;  %v4716_v22 = vrot.slane %v4652_v9, %v9429_v37  ;;  %v4654_v51 = vcombine.high %v4644_v18, %v4644_v18 }
0x10e2   :  { %v4724_v60 = vrot.slane %v4637_v19, %v9429_v37  ;;  %v4651_v13 = vrot.slane %v4623_v47, %v8019_v5  ;;  %v4653_v4 = vcombine.high %v4637_v19, %v4637_v19 }
0x10e3   :  { %v4288_v28 = vpop.f32.mrb[76].mxu0  ;;  %v4801_v50 = vand.u32 2147483647, %v4785_v61  ;;  %v4786_v10 = vsub.f32 %v4712_v20, %v9010_v42  ;;  %v4787_v0 = vsub.f32 %v4716_v22, %v9010_v42  ;;  %v4720_v32 = vrot.slane %v4654_v51, %v9429_v37 }
0x10e4   :  { %v4293_v41 = vadd.f32 %v8815_v57, %v4288_v28  ;;  %v7594_v46 = vpop.f32.mrb[77].mxu0  ;;  %v4728_v39 = vrot.slane %v4651_v13, %v9429_v37  ;;  %v4655_v38 = vcombine.high %v4651_v13, %v4651_v13  ;;  %v4789_v48 = vsub.f32 %v4724_v60, %v9010_v42 }
0x10e5   :  { %7649 = vmatprep.mubr.msk.f32.mxu0 %vm1768_vm3, %v4801_v50  ;;  %v4802_v35 = vand.u32 2147483647, %v4786_v10  ;;  %v4803_v12 = vand.u32 2147483647, %v4787_v0  ;;  %v4788_v55 = vsub.f32 %v4720_v32, %v9010_v42  ;;  %v4732_v59 = vrot.slane %v4653_v4, %v9429_v37 }
0x10e6   :  { %v4299_v34 = vadd.f32 %v4297_v58, %v4293_v41  ;;  %v4736_v6 = vrot.slane %v4655_v38, %v9429_v37  ;;  %v4790_v25 = vsub.f32 %v4728_v39, %v9010_v42  ;;  %v4805_v29 = vand.u32 2147483647, %v4789_v48  ;;  %v5345_v38 = vld [vmem:[#allocation2 + $0xe8] sm:$0xff] }
0x10e7   :  { %7650 = vmatmul.mubr.msk.f32.vlgmr.msra.gmra.mrb[78].mxu0 %vm1768_vm3, %v4802_v35  ;;  %v4804_v11 = vand.u32 2147483647, %v4788_v55  ;;  %v4791_v30 = vsub.f32 %v4732_v59, %v9010_v42  ;;  %v9430_v55 = vld [vmem:[#allocation13_spill] sm:$0xff]  ;;  %v9105_v59 = vld [vmem:[#allocation2 + $0x130] sm:$0xff] }
0x10e8   :  { %vm4301_vm9 = vcmp.gt.f32.partialorder %v4299_v34, 0.0  ;;  %v4303_v57 = vmul.f32 0.01, %v4299_v34  ;;  %7652 = vmatprep.mubr.msk.f32.mxu0 %vm1768_vm3, %v4803_v12  ;;  %7756 = vmatpush3.msk.msra.mxu0 %vm1775_vm15, %v6028_v52  ;;  %v4792_v49 = vsub.f32 %v4736_v6, %v9010_v42  ;;  %v4806_v52 = vand.u32 2147483647, %v4790_v25 }
0x10e9   :  { %7765 = vmatprep.subr.msk.mxu0 %vm304_vm0, %v9035_v56  ;;  %v4807_v36 = vand.u32 2147483647, %v4791_v30  ;;  %v6342_v12 = vld [vmem:[#allocation2 + $0x120] sm:$0xf] }
0x10ea   :  { %v9044_v26 = vsel %vm4301_vm9, %v4299_v34, %v4303_v57  ;;  %v4808_v33 = vand.u32 2147483647, %v4792_v49  ;;  %v5346_v34 = vld [vmem:[#allocation2 + $0xf0] sm:$0xff] }
0x10eb   :  { %7653 = vmatmul.mubr.msk.f32.gmra.mrb[80].mxu0 %vm1768_vm3, %v4804_v11  ;;  %v4663_v43 = vrot.slane %v9044_v26, %v8019_v5  ;;  %v4656_v44 = vcombine.high %v9044_v26, %v9044_v26  ;;  %v7815_v48 = vpack.c.bf16 %v5346_v34, %v5345_v38 }
0x10ec   :  { %7655 = vmatprep.mubr.msk.f32.mxu0 %vm1768_vm3, %v4805_v29 }
0x10ed   :  { %v4679_v2 = vrot.slane %v4663_v43, %v8019_v5  ;;  %v4671_v7 = vcombine.high %v4663_v43, %v4663_v43  ;;  %v4670_v24 = vrot.slane %v4656_v44, %v8019_v5  ;;  %7816 = vmatprep.subr.bf16.mxu1 %v7815_v48 }
0x10ef   :  { %7656 = vmatmul.mubr.msk.f32.gmra.mrb[82].mxu0 %vm1768_vm3, %v4806_v52  ;;  %v4740_v58 = vrot.slane %v4679_v2, %v9429_v37  ;;  %v4693_v14 = vrot.slane %v4671_v7, %v8019_v5  ;;  %v4701_v63 = vcombine.high %v4679_v2, %v4679_v2  ;;  %v4686_v8 = vrot.slane %v4670_v24, %v8019_v5 }
0x10f0   :  { %7658 = vmatprep.mubr.msk.f32.mxu0 %vm1768_vm3, %v4807_v36  ;;  %v4672_v40 = vcombine.high %v4670_v24, %v4670_v24 }
0x10f1   :  { %v4793_v16 = vsub.f32 %v4740_v58, %v9044_v26  ;;  %v4744_v17 = vrot.slane %v4693_v14, %v9429_v37  ;;  %v4748_v3 = vrot.slane %v4701_v63, %v9429_v37  ;;  %v4703_v31 = vcombine.high %v4693_v14, %v4693_v14 }
0x10f2   :  { %v4756_v1 = vrot.slane %v4686_v8, %v9429_v37  ;;  %v4700_v18 = vrot.slane %v4672_v40, %v8019_v5  ;;  %v4702_v27 = vcombine.high %v4686_v8, %v4686_v8 }
0x10f3   :  { %7659 = vmatmul.mubr.msk.f32.gmra.mrb[84].mxu0 %vm1768_vm3, %v4808_v33  ;;  %v4809_v9 = vand.u32 2147483647, %v4793_v16  ;;  %v4794_v19 = vsub.f32 %v4744_v17, %v9044_v26  ;;  %v4795_v47 = vsub.f32 %v4748_v3, %v9044_v26  ;;  %v4752_v61 = vrot.slane %v4703_v31, %v9429_v37 }
0x10f4   :  { %v4760_v20 = vrot.slane %v4700_v18, %v9429_v37  ;;  %v4704_v13 = vcombine.high %v4700_v18, %v4700_v18  ;;  %v4797_v5 = vsub.f32 %v4756_v1, %v9044_v26  ;;  %v4764_v4 = vrot.slane %v4702_v27, %v9429_v37 }
0x10f5   :  { %7661 = vmatprep.mubr.msk.f32.mxu0 %vm1768_vm3, %v4809_v9  ;;  %v4810_v22 = vand.u32 2147483647, %v4794_v19  ;;  %v4811_v51 = vand.u32 2147483647, %v4795_v47  ;;  %v4796_v60 = vsub.f32 %v4752_v61, %v9044_v26 }
0x10f6   :  { %v4798_v50 = vsub.f32 %v4760_v20, %v9044_v26  ;;  %v4768_v10 = vrot.slane %v4704_v13, %v9429_v37  ;;  %v4813_v0 = vand.u32 2147483647, %v4797_v5  ;;  %v4799_v32 = vsub.f32 %v4764_v4, %v9044_v26 }
0x10f7   :  { %7662 = vmatmul.mubr.msk.f32.gmra.mrb[86].mxu0 %vm1768_vm3, %v4810_v22  ;;  %v4812_v28 = vand.u32 2147483647, %v4796_v60 }
0x10f8   :  { %7664 = vmatprep.mubr.msk.f32.mxu0 %vm1768_vm3, %v4811_v51  ;;  %v4814_v41 = vand.u32 2147483647, %v4798_v50  ;;  %v4800_v46 = vsub.f32 %v4768_v10, %v9044_v26  ;;  %v4815_v39 = vand.u32 2147483647, %v4799_v32 }
0x10fa   :  { %v4816_v35 = vand.u32 2147483647, %v4800_v46 }
0x10fb   :  { %7665 = vmatmul.mubr.msk.f32.gmra.mrb[88].mxu0 %vm1768_vm3, %v4812_v28 }
0x10fc   :  { %7667 = vmatprep.mubr.msk.f32.mxu0 %vm1768_vm3, %v4813_v0 }
0x10ff   :  { %7668 = vmatmul.mubr.msk.f32.gmra.mrb[90].mxu0 %vm1768_vm3, %v4814_v41 }
0x1100   :  { %7670 = vmatprep.mubr.msk.f32.mxu0 %vm1768_vm3, %v4815_v39 }
0x1103   :  { %7671 = vmatmul.mubr.msk.f32.gmra.mrb[92].mxu0 %vm1768_vm3, %v4816_v35 }
0x1104   :  { %7757 = vmatprep.mubr.msk.f32.mxu0 %vm1768_vm3, %v8367_v23 }
0x1107   :  { %7758 = vmatmul.mubr.msk.f32.vlgmr.msra.gmra.mrb[94].mxu0 %vm1768_vm3, %v8387_v45 }
0x1108   :  { %7767 = vmatprep.mubr.msk.f32.mxu0 %vm255_vm1, %v8539_v53  ;;  %7766 = vmatpush3.msk.msra.mxu0 %vm304_vm0, %v9035_v56  ;;  %v9109_v56 = vrot.slane %v9105_v59, %v9429_v37 }
0x1109   :  { %7775 = vmatprep.subr.msk.mxu0 %vm1775_vm15, %v6342_v12 }
0x110f   :  { %7768 = vmatmul.mubr.msk.f32.vlgmr.msra.gmra.mrb[94].mxu0 %vm255_vm1, %v9430_v55 }
0x1110   :  { %7777 = vmatprep.mubr.msk.f32.mxu0 %vm1768_vm3, %v9010_v42  ;;  %7776 = vmatpush3.msk.msra.mxu0 %vm1775_vm15, %v6342_v12 }
0x1111   :  { %7785 = vmatprep.subr.mxu0 %v9404_v62 }
0x1117   :  { %7778 = vmatmul.mubr.msk.f32.vlgmr.msra.gmra.mrb[94].mxu0 %vm1768_vm3, %v9044_v26 }
0x1118   :  { %7787 = vmatprep.mubr.msk.f32.mxu0 %vm7976_vm14, %v9404_v62 }
0x11ba   :  { %v7651_v57 = vpop.f32.mrb[78].mxu0 }
0x11bb   :  { %v5035_v6 = vadd.f32 %v7651_v57, %v9109_v56  ;;  %v4935_v11 = vpop.f32.mrb[79].mxu0 }
0x11bc   :  { %v5034_v25 = vadd.f32 %v9109_v56, %v4935_v11 }
0x11bd   :  { %v5067_v29 = vmul.f32 0.01, %v5035_v6  ;;  %vm5051_vm10 = vcmp.gt.f32.partialorder %v5035_v6, 0.0 }
0x11be   :  { %vm5050_vm12 = vcmp.gt.f32.partialorder %v5034_v25, 0.0  ;;  %v5066_v30 = vmul.f32 0.01, %v5034_v25  ;;  %v7654_v43 = vpop.f32.mrb[80].mxu0 }
0x11bf   :  { %v5037_v44 = vadd.f32 %v7654_v43, %v9109_v56  ;;  %v4945_v49 = vpop.f32.mrb[81].mxu0  ;;  %v5083_v7 = vsel %vm5051_vm10, %v5035_v6, %v5067_v29 }
0x11c0   :  { %v5036_v52 = vadd.f32 %v9109_v56, %v4945_v49  ;;  %v5082_v2 = vsel %vm5050_vm12, %v5034_v25, %v5066_v30 }
0x11c1   :  { %v5069_v37 = vmul.f32 0.01, %v5037_v44  ;;  %7677 = vmatprep.mubr.msk.f32.mxu1 %vm507_vm4, %v5082_v2  ;;  %vm5053_vm8 = vcmp.gt.f32.partialorder %v5037_v44, 0.0 }
0x11c2   :  { %vm5052_vm2 = vcmp.gt.f32.partialorder %v5036_v52, 0.0  ;;  %v5068_v24 = vmul.f32 0.01, %v5036_v52  ;;  %v7657_v36 = vpop.f32.mrb[82].mxu0  ;;  %7678 = vmatmul.mubr.msk.f32.vlgmr.msra.gmra.mrb[68].mxu1 %vm507_vm4, %v5083_v7 }
0x11c3   :  { %v5039_v58 = vadd.f32 %v7657_v36, %v9109_v56  ;;  %v4955_v14 = vpop.f32.mrb[83].mxu0  ;;  %7818 = vmatpush3.bf16.msra.mxu1 %v7815_v48  ;;  %v5085_v40 = vsel %vm5053_vm8, %v5037_v44, %v5069_v37  ;;  %v9431_v36 = vld [vmem:[#allocation9_spill] sm:$0xff] }
0x11c4   :  { %v5038_v63 = vadd.f32 %v9109_v56, %v4955_v14  ;;  %v5084_v8 = vsel %vm5052_vm2, %v5036_v52, %v5068_v24 }
0x11c5   :  { %v5071_v33 = vmul.f32 0.01, %v5039_v58  ;;  %7680 = vmatprep.mubr.msk.f32.mxu1 %vm507_vm4, %v5084_v8  ;;  %vm5055_vm9 = vcmp.gt.f32.partialorder %v5039_v58, 0.0 }
0x11c6   :  { %vm5054_vm10 = vcmp.gt.f32.partialorder %v5038_v63, 0.0  ;;  %v5070_v16 = vmul.f32 0.01, %v5038_v63  ;;  %v7660_v17 = vpop.f32.mrb[84].mxu0  ;;  %7681 = vmatmul.mubr.msk.f32.gmra.mrb[70].mxu1 %vm507_vm4, %v5085_v40 }
0x11c7   :  { %v5041_v3 = vadd.f32 %v7660_v17, %v9109_v56  ;;  %v4965_v31 = vpop.f32.mrb[85].mxu0  ;;  %v5087_v9 = vsel %vm5055_vm9, %v5039_v58, %v5071_v33  ;;  %v9149_v58 = vrot.slane %v9105_v59, %v9431_v36 }
0x11c8   :  { %v5040_v1 = vadd.f32 %v9109_v56, %v4965_v31  ;;  %v5086_v18 = vsel %vm5054_vm10, %v5038_v63, %v5070_v16 }
0x11c9   :  { %v5073_v27 = vmul.f32 0.01, %v5041_v3  ;;  %7683 = vmatprep.mubr.msk.f32.mxu1 %vm507_vm4, %v5086_v18  ;;  %vm5057_vm12 = vcmp.gt.f32.partialorder %v5041_v3, 0.0 }
0x11ca   :  { %vm5056_vm2 = vcmp.gt.f32.partialorder %v5040_v1, 0.0  ;;  %v5072_v19 = vmul.f32 0.01, %v5040_v1  ;;  %v7663_v47 = vpop.f32.mrb[86].mxu0  ;;  %7684 = vmatmul.mubr.msk.f32.gmra.mrb[72].mxu1 %vm507_vm4, %v5087_v9 }
0x11cb   :  { %v5043_v61 = vadd.f32 %v7663_v47, %v9109_v56  ;;  %v4975_v20 = vpop.f32.mrb[87].mxu0  ;;  %v5089_v13 = vsel %vm5057_vm12, %v5041_v3, %v5073_v27 }
0x11cc   :  { %v5042_v22 = vadd.f32 %v9109_v56, %v4975_v20  ;;  %v5088_v51 = vsel %vm5056_vm2, %v5040_v1, %v5072_v19 }
0x11cd   :  { %v5075_v60 = vmul.f32 0.01, %v5043_v61  ;;  %7686 = vmatprep.mubr.msk.f32.mxu1 %vm507_vm4, %v5088_v51  ;;  %vm5059_vm8 = vcmp.gt.f32.partialorder %v5043_v61, 0.0 }
0x11ce   :  { %vm5058_vm10 = vcmp.gt.f32.partialorder %v5042_v22, 0.0  ;;  %v5074_v5 = vmul.f32 0.01, %v5042_v22  ;;  %v7666_v4 = vpop.f32.mrb[88].mxu0  ;;  %7687 = vmatmul.mubr.msk.f32.gmra.mrb[74].mxu1 %vm507_vm4, %v5089_v13 }
0x11cf   :  { %v5045_v28 = vadd.f32 %v7666_v4, %v9109_v56  ;;  %v4985_v50 = vpop.f32.mrb[89].mxu0  ;;  %v5091_v41 = vsel %vm5059_vm8, %v5043_v61, %v5075_v60 }
0x11d0   :  { %v5044_v10 = vadd.f32 %v9109_v56, %v4985_v50  ;;  %v5090_v0 = vsel %vm5058_vm10, %v5042_v22, %v5074_v5 }
0x11d1   :  { %v5077_v32 = vmul.f32 0.01, %v5045_v28  ;;  %7689 = vmatprep.mubr.msk.f32.mxu1 %vm507_vm4, %v5090_v0  ;;  %vm5061_vm9 = vcmp.gt.f32.partialorder %v5045_v28, 0.0 }
0x11d2   :  { %vm5060_vm2 = vcmp.gt.f32.partialorder %v5044_v10, 0.0  ;;  %v5076_v46 = vmul.f32 0.01, %v5044_v10  ;;  %v7669_v39 = vpop.f32.mrb[90].mxu0  ;;  %7690 = vmatmul.mubr.msk.f32.gmra.mrb[76].mxu1 %vm507_vm4, %v5091_v41 }
0x11d3   :  { %v5047_v35 = vadd.f32 %v7669_v39, %v9109_v56  ;;  %v4995_v12 = vpop.f32.mrb[91].mxu0  ;;  %v5093_v57 = vsel %vm5061_vm9, %v5045_v28, %v5077_v32 }
0x11d4   :  { %v5046_v38 = vadd.f32 %v9109_v56, %v4995_v12  ;;  %v5092_v34 = vsel %vm5060_vm2, %v5044_v10, %v5076_v46 }
0x11d5   :  { %v5079_v48 = vmul.f32 0.01, %v5047_v35  ;;  %7692 = vmatprep.mubr.msk.f32.mxu1 %vm507_vm4, %v5092_v34  ;;  %vm5063_vm12 = vcmp.gt.f32.partialorder %v5047_v35, 0.0 }
0x11d6   :  { %vm5062_vm10 = vcmp.gt.f32.partialorder %v5046_v38, 0.0  ;;  %v5078_v6 = vmul.f32 0.01, %v5046_v38  ;;  %v7672_v11 = vpop.f32.mrb[92].mxu0  ;;  %7693 = vmatmul.mubr.msk.f32.gmra.mrb[78].mxu1 %vm507_vm4, %v5093_v57 }
0x11d7   :  { %v5049_v25 = vadd.f32 %v7672_v11, %v9109_v56  ;;  %v5005_v29 = vpop.f32.mrb[93].mxu0  ;;  %v5095_v49 = vsel %vm5063_vm12, %v5047_v35, %v5079_v48 }
0x11d8   :  { %v5048_v30 = vadd.f32 %v9109_v56, %v5005_v29  ;;  %v5094_v43 = vsel %vm5062_vm10, %v5046_v38, %v5078_v6  ;;  %v5592_v56 = vld [vmem:[#allocation2 + $0xf8] sm:$0xff] }
0x11d9   :  { %v5081_v44 = vmul.f32 0.01, %v5049_v25  ;;  %7695 = vmatprep.mubr.msk.f32.mxu1 %vm507_vm4, %v5094_v43  ;;  %vm5065_vm8 = vcmp.gt.f32.partialorder %v5049_v25, 0.0  ;;  %7729 = vmatprep.subr.mxu1 %v5592_v56 }
0x11da   :  { %vm5064_vm2 = vcmp.gt.f32.partialorder %v5048_v30, 0.0  ;;  %v5080_v52 = vmul.f32 0.01, %v5048_v30  ;;  %7696 = vmatmul.mubr.msk.f32.gmra.mrb[80].mxu1 %vm507_vm4, %v5095_v49 }
0x11db   :  { %v5097_v7 = vsel %vm5065_vm8, %v5049_v25, %v5081_v44 }
0x11dc   :  { %v5096_v2 = vsel %vm5064_vm2, %v5048_v30, %v5080_v52 }
0x11dd   :  { %7698 = vmatprep.mubr.msk.f32.mxu1 %vm507_vm4, %v5096_v2 }
0x11de   :  { %7699 = vmatmul.mubr.msk.f32.gmra.mrb[82].mxu1 %vm507_vm4, %v5097_v7 }
0x11ea   :  { %v9143_v37 = vpop.f32.mrb[94].mxu0 }
0x11eb   :  { %v9145_v24 = vpop.f32.mrb[95].mxu0 }
0x1295   :  { %v7679_v14 = vpop.f32.mrb[68].mxu1 }
0x1296   :  { %v5224_v63 = vadd.f32 %v7679_v14, %v9149_v58  ;;  %v5218_v8 = vpop.f32.mrb[69].mxu1 }
0x1297   :  { %v5219_v33 = vadd.f32 %v5218_v8, %v9149_v58 }
0x1298   :  { %v5314_v40 = vmul.f32 0.01, %v5224_v63  ;;  %vm5298_vm9 = vcmp.gt.f32.partialorder %v5224_v63, 0.0 }
0x1299   :  { %vm5297_vm12 = vcmp.gt.f32.partialorder %v5219_v33, 0.0  ;;  %v5313_v16 = vmul.f32 0.01, %v5219_v33  ;;  %v7682_v17 = vpop.f32.mrb[70].mxu1 }
0x129a   :  { %v5234_v3 = vadd.f32 %v7682_v17, %v9149_v58  ;;  %v5228_v31 = vpop.f32.mrb[71].mxu1  ;;  %v5330_v27 = vsel %vm5298_vm9, %v5224_v63, %v5314_v40 }
0x129b   :  { %v5229_v1 = vadd.f32 %v5228_v31, %v9149_v58  ;;  %v5329_v18 = vsel %vm5297_vm12, %v5219_v33, %v5313_v16 }
0x129c   :  { %v5316_v9 = vmul.f32 0.01, %v5234_v3  ;;  %7705 = vmatprep.mubr.msk.f32.mxu1 %vm507_vm4, %v5329_v18  ;;  %vm5300_vm10 = vcmp.gt.f32.partialorder %v5234_v3, 0.0 }
0x129d   :  { %vm5299_vm8 = vcmp.gt.f32.partialorder %v5229_v1, 0.0  ;;  %v5315_v19 = vmul.f32 0.01, %v5229_v1  ;;  %v7685_v47 = vpop.f32.mrb[72].mxu1  ;;  %7706 = vmatmul.mubr.msk.f32.vlgmr.msra.gmra.mrb[84].mxu1 %vm507_vm4, %v5330_v27 }
0x129e   :  { %v5244_v61 = vadd.f32 %v7685_v47, %v9149_v58  ;;  %v5238_v20 = vpop.f32.mrb[73].mxu1  ;;  %7730 = vmatpush3.msra.mxu1 %v5592_v56  ;;  %v5332_v13 = vsel %vm5300_vm10, %v5234_v3, %v5316_v9  ;;  %v6107_v47 = vld [vmem:[#allocation2 + $0x118] sm:$0xf] }
0x129f   :  { %v5239_v22 = vadd.f32 %v5238_v20, %v9149_v58  ;;  %v5331_v51 = vsel %vm5299_vm8, %v5229_v1, %v5315_v19  ;;  %7760 = vmatprep.subr.msk.mxu1 %vm1775_vm15, %v6107_v47 }
0x12a0   :  { %v5318_v60 = vmul.f32 0.01, %v5244_v61  ;;  %7708 = vmatprep.mubr.msk.f32.mxu1 %vm507_vm4, %v5331_v51  ;;  %vm5302_vm2 = vcmp.gt.f32.partialorder %v5244_v61, 0.0 }
0x12a1   :  { %vm5301_vm9 = vcmp.gt.f32.partialorder %v5239_v22, 0.0  ;;  %v5317_v5 = vmul.f32 0.01, %v5239_v22  ;;  %v7688_v4 = vpop.f32.mrb[74].mxu1  ;;  %7709 = vmatmul.mubr.msk.f32.gmra.mrb[86].mxu1 %vm507_vm4, %v5332_v13 }
0x12a2   :  { %v5254_v28 = vadd.f32 %v7688_v4, %v9149_v58  ;;  %v5248_v50 = vpop.f32.mrb[75].mxu1  ;;  %v5334_v41 = vsel %vm5302_vm2, %v5244_v61, %v5318_v60 }
0x12a3   :  { %v5249_v10 = vadd.f32 %v5248_v50, %v9149_v58  ;;  %v5333_v0 = vsel %vm5301_vm9, %v5239_v22, %v5317_v5 }
0x12a4   :  { %v5320_v32 = vmul.f32 0.01, %v5254_v28  ;;  %7711 = vmatprep.mubr.msk.f32.mxu1 %vm507_vm4, %v5333_v0  ;;  %vm5304_vm12 = vcmp.gt.f32.partialorder %v5254_v28, 0.0 }
0x12a5   :  { %vm5303_vm8 = vcmp.gt.f32.partialorder %v5249_v10, 0.0  ;;  %v5319_v46 = vmul.f32 0.01, %v5249_v10  ;;  %v7691_v39 = vpop.f32.mrb[76].mxu1  ;;  %7712 = vmatmul.mubr.msk.f32.gmra.mrb[88].mxu1 %vm507_vm4, %v5334_v41 }
0x12a6   :  { %v5264_v35 = vadd.f32 %v7691_v39, %v9149_v58  ;;  %v5258_v12 = vpop.f32.mrb[77].mxu1  ;;  %v5336_v57 = vsel %vm5304_vm12, %v5254_v28, %v5320_v32 }
0x12a7   :  { %v5259_v38 = vadd.f32 %v5258_v12, %v9149_v58  ;;  %v5335_v34 = vsel %vm5303_vm8, %v5249_v10, %v5319_v46  ;;  %v9193_v46 = vld [vmem:[#allocation2 + $0x108] sm:$0x3f] }
0x12a8   :  { %v5322_v48 = vmul.f32 0.01, %v5264_v35  ;;  %7714 = vmatprep.mubr.msk.f32.mxu1 %vm507_vm4, %v5335_v34  ;;  %vm5306_vm10 = vcmp.gt.f32.partialorder %v5264_v35, 0.0 }
0x12a9   :  { %vm5305_vm9 = vcmp.gt.f32.partialorder %v5259_v38, 0.0  ;;  %v5321_v6 = vmul.f32 0.01, %v5259_v38  ;;  %v7694_v11 = vpop.f32.mrb[78].mxu1  ;;  %7715 = vmatmul.mubr.msk.f32.gmra.mrb[90].mxu1 %vm507_vm4, %v5336_v57 }
0x12aa   :  { %v5274_v25 = vadd.f32 %v7694_v11, %v9149_v58  ;;  %v5268_v29 = vpop.f32.mrb[79].mxu1  ;;  %v5338_v49 = vsel %vm5306_vm10, %v5264_v35, %v5322_v48 }
0x12ab   :  { %v5269_v30 = vadd.f32 %v5268_v29, %v9149_v58  ;;  %v5337_v43 = vsel %vm5305_vm9, %v5259_v38, %v5321_v6 }
0x12ac   :  { %v5324_v44 = vmul.f32 0.01, %v5274_v25  ;;  %7717 = vmatprep.mubr.msk.f32.mxu1 %vm507_vm4, %v5337_v43  ;;  %vm5308_vm2 = vcmp.gt.f32.partialorder %v5274_v25, 0.0 }
0x12ad   :  { %vm5307_vm8 = vcmp.gt.f32.partialorder %v5269_v30, 0.0  ;;  %v5323_v52 = vmul.f32 0.01, %v5269_v30  ;;  %v7697_v2 = vpop.f32.mrb[80].mxu1  ;;  %7718 = vmatmul.mubr.msk.f32.gmra.mrb[92].mxu1 %vm507_vm4, %v5338_v49 }
0x12ae   :  { %v5284_v7 = vadd.f32 %v7697_v2, %v9149_v58  ;;  %v5278_v56 = vpop.f32.mrb[81].mxu1  ;;  %v5340_v8 = vsel %vm5308_vm2, %v5274_v25, %v5324_v44 }
0x12af   :  { %v5279_v36 = vadd.f32 %v5278_v56, %v9149_v58  ;;  %v5339_v14 = vsel %vm5307_vm8, %v5269_v30, %v5323_v52 }
0x12b0   :  { %v5326_v63 = vmul.f32 0.01, %v5284_v7  ;;  %7720 = vmatprep.mubr.msk.f32.mxu1 %vm507_vm4, %v5339_v14  ;;  %vm5310_vm12 = vcmp.gt.f32.partialorder %v5284_v7, 0.0 }
0x12b1   :  { %vm5309_vm9 = vcmp.gt.f32.partialorder %v5279_v36, 0.0  ;;  %v5325_v33 = vmul.f32 0.01, %v5279_v36  ;;  %v7700_v40 = vpop.f32.mrb[82].mxu1  ;;  %7721 = vmatmul.mubr.msk.f32.gmra.mrb[94].mxu1 %vm507_vm4, %v5340_v8 }
0x12b2   :  { %v5294_v16 = vadd.f32 %v7700_v40, %v9149_v58  ;;  %v5288_v17 = vpop.f32.mrb[83].mxu1  ;;  %v5342_v18 = vsel %vm5310_vm12, %v5284_v7, %v5326_v63 }
0x12b3   :  { %v5289_v3 = vadd.f32 %v5288_v17, %v9149_v58  ;;  %v5341_v31 = vsel %vm5309_vm9, %v5279_v36, %v5325_v33  ;;  %v9432_v58 = vld [vmem:[#allocation10_spill] sm:$0xff] }
0x12b4   :  { %v5328_v1 = vmul.f32 0.01, %v5294_v16  ;;  %7723 = vmatprep.mubr.msk.f32.mxu1 %vm507_vm4, %v5341_v31  ;;  %vm5312_vm10 = vcmp.gt.f32.partialorder %v5294_v16, 0.0  ;;  %v9186_v61 = vrot.slane %v9105_v59, %v9432_v58 }
0x12b5   :  { %vm5311_vm8 = vcmp.gt.f32.partialorder %v5289_v3, 0.0  ;;  %v5327_v27 = vmul.f32 0.01, %v5289_v3  ;;  %7724 = vmatmul.mubr.msk.f32.gmra.mrb[96].mxu1 %vm507_vm4, %v5342_v18 }
0x12b6   :  { %v5344_v19 = vsel %vm5312_vm10, %v5294_v16, %v5328_v1 }
0x12b7   :  { %v5343_v9 = vsel %vm5311_vm8, %v5289_v3, %v5327_v27 }
0x12b8   :  { %7726 = vmatprep.mubr.msk.f32.mxu1 %vm507_vm4, %v5343_v9 }
0x12b9   :  { %7727 = vmatmul.mubr.msk.f32.gmra.mrb[98].mxu1 %vm507_vm4, %v5344_v19 }
0x1370   :  { %v7707_v20 = vpop.f32.mrb[84].mxu1 }
0x1371   :  { %v5471_v22 = vadd.f32 %v7707_v20, %v9186_v61  ;;  %v5465_v51 = vpop.f32.mrb[85].mxu1 }
0x1372   :  { %v5466_v60 = vadd.f32 %v5465_v51, %v9186_v61 }
0x1373   :  { %v5561_v13 = vmul.f32 0.01, %v5471_v22  ;;  %vm5545_vm2 = vcmp.gt.f32.partialorder %v5471_v22, 0.0 }
0x1374   :  { %vm5544_vm12 = vcmp.gt.f32.partialorder %v5466_v60, 0.0  ;;  %v5560_v5 = vmul.f32 0.01, %v5466_v60  ;;  %v7710_v4 = vpop.f32.mrb[86].mxu1 }
0x1375   :  { %v5481_v28 = vadd.f32 %v7710_v4, %v9186_v61  ;;  %v5475_v50 = vpop.f32.mrb[87].mxu1  ;;  %v5577_v32 = vsel %vm5545_vm2, %v5471_v22, %v5561_v13 }
0x1376   :  { %v5476_v10 = vadd.f32 %v5475_v50, %v9186_v61  ;;  %v5576_v0 = vsel %vm5544_vm12, %v5466_v60, %v5560_v5 }
0x1377   :  { %v5563_v41 = vmul.f32 0.01, %v5481_v28  ;;  %7731 = vmatprep.mubr.msk.f32.mxu1 %vm1001_vm11, %v5576_v0  ;;  %vm5547_vm4 = vcmp.gt.f32.partialorder %v5481_v28, 0.0 }
0x1378   :  { %vm5546_vm9 = vcmp.gt.f32.partialorder %v5476_v10, 0.0  ;;  %v5562_v39 = vmul.f32 0.01, %v5476_v10  ;;  %v7713_v35 = vpop.f32.mrb[88].mxu1  ;;  %7732 = vmatmul.mubr.msk.f32.vlgmr.msra.gmra.mrb[100].mxu1 %vm1001_vm11, %v5577_v32 }
0x1379   :  { %v5491_v12 = vadd.f32 %v7713_v35, %v9186_v61  ;;  %v5485_v38 = vpop.f32.mrb[89].mxu1  ;;  %7761 = vmatpush3.msk.msra.mxu1 %vm1775_vm15, %v6107_v47  ;;  %v5579_v6 = vsel %vm5547_vm4, %v5481_v28, %v5563_v41 }
0x137a   :  { %v5486_v34 = vadd.f32 %v5485_v38, %v9186_v61  ;;  %v5578_v48 = vsel %vm5546_vm9, %v5476_v10, %v5562_v39  ;;  %7770 = vmatprep.subr.msk.mxu1 %vm304_vm0, %v9193_v46 }
0x137b   :  { %v5565_v57 = vmul.f32 0.01, %v5491_v12  ;;  %7734 = vmatprep.mubr.msk.f32.mxu1 %vm1001_vm11, %v5578_v48  ;;  %vm5549_vm10 = vcmp.gt.f32.partialorder %v5491_v12, 0.0 }
0x137c   :  { %vm5548_vm8 = vcmp.gt.f32.partialorder %v5486_v34, 0.0  ;;  %v5564_v11 = vmul.f32 0.01, %v5486_v34  ;;  %v7716_v25 = vpop.f32.mrb[90].mxu1  ;;  %7735 = vmatmul.mubr.msk.f32.gmra.mrb[102].mxu1 %vm1001_vm11, %v5579_v6 }
0x137d   :  { %v5501_v29 = vadd.f32 %v7716_v25, %v9186_v61  ;;  %v5495_v30 = vpop.f32.mrb[91].mxu1  ;;  %v5581_v52 = vsel %vm5549_vm10, %v5491_v12, %v5565_v57  ;;  %v9434_v12 = vld [vmem:[#allocation12_spill] sm:$0xff] }
0x137e   :  { %v5496_v43 = vadd.f32 %v5495_v30, %v9186_v61  ;;  %v5580_v44 = vsel %vm5548_vm8, %v5486_v34, %v5564_v11  ;;  %v9252_v38 = vrot.slane %v9105_v59, %v9434_v12 }
0x137f   :  { %v5567_v49 = vmul.f32 0.01, %v5501_v29  ;;  %7737 = vmatprep.mubr.msk.f32.mxu1 %vm1001_vm11, %v5580_v44  ;;  %vm5551_vm2 = vcmp.gt.f32.partialorder %v5501_v29, 0.0 }
0x1380   :  { %vm5550_vm12 = vcmp.gt.f32.partialorder %v5496_v43, 0.0  ;;  %v5566_v2 = vmul.f32 0.01, %v5496_v43  ;;  %v7719_v7 = vpop.f32.mrb[92].mxu1  ;;  %7738 = vmatmul.mubr.msk.f32.gmra.mrb[104].mxu1 %vm1001_vm11, %v5581_v52 }
0x1381   :  { %v5511_v56 = vadd.f32 %v7719_v7, %v9186_v61  ;;  %v5505_v36 = vpop.f32.mrb[93].mxu1  ;;  %v5583_v33 = vsel %vm5551_vm2, %v5501_v29, %v5567_v49 }
0x1382   :  { %v5506_v14 = vadd.f32 %v5505_v36, %v9186_v61  ;;  %v5582_v63 = vsel %vm5550_vm12, %v5496_v43, %v5566_v2 }
0x1383   :  { %v5569_v8 = vmul.f32 0.01, %v5511_v56  ;;  %7740 = vmatprep.mubr.msk.f32.mxu1 %vm1001_vm11, %v5582_v63  ;;  %vm5553_vm4 = vcmp.gt.f32.partialorder %v5511_v56, 0.0 }
0x1384   :  { %vm5552_vm9 = vcmp.gt.f32.partialorder %v5506_v14, 0.0  ;;  %v5568_v40 = vmul.f32 0.01, %v5506_v14  ;;  %v7722_v16 = vpop.f32.mrb[94].mxu1  ;;  %7741 = vmatmul.mubr.msk.f32.gmra.mrb[106].mxu1 %vm1001_vm11, %v5583_v33 }
0x1385   :  { %v5521_v17 = vadd.f32 %v7722_v16, %v9186_v61  ;;  %v5515_v3 = vpop.f32.mrb[95].mxu1  ;;  %v5585_v27 = vsel %vm5553_vm4, %v5511_v56, %v5569_v8 }
0x1386   :  { %v5516_v31 = vadd.f32 %v5515_v3, %v9186_v61  ;;  %v5584_v1 = vsel %vm5552_vm9, %v5506_v14, %v5568_v40 }
0x1387   :  { %v5571_v18 = vmul.f32 0.01, %v5521_v17  ;;  %7743 = vmatprep.mubr.msk.f32.mxu1 %vm1001_vm11, %v5584_v1  ;;  %vm5555_vm10 = vcmp.gt.f32.partialorder %v5521_v17, 0.0 }
0x1388   :  { %vm5554_vm8 = vcmp.gt.f32.partialorder %v5516_v31, 0.0  ;;  %v5570_v9 = vmul.f32 0.01, %v5516_v31  ;;  %v7725_v19 = vpop.f32.mrb[96].mxu1  ;;  %7744 = vmatmul.mubr.msk.f32.gmra.mrb[108].mxu1 %vm1001_vm11, %v5585_v27 }
0x1389   :  { %v5531_v47 = vadd.f32 %v7725_v19, %v9186_v61  ;;  %v5525_v58 = vpop.f32.mrb[97].mxu1  ;;  %v5587_v60 = vsel %vm5555_vm10, %v5521_v17, %v5571_v18 }
0x138a   :  { %v5526_v20 = vadd.f32 %v5525_v58, %v9186_v61  ;;  %v5586_v22 = vsel %vm5554_vm8, %v5516_v31, %v5570_v9 }
0x138b   :  { %v5573_v51 = vmul.f32 0.01, %v5531_v47  ;;  %7746 = vmatprep.mubr.msk.f32.mxu1 %vm1001_vm11, %v5586_v22  ;;  %vm5557_vm2 = vcmp.gt.f32.partialorder %v5531_v47, 0.0 }
0x138c   :  { %vm5556_vm12 = vcmp.gt.f32.partialorder %v5526_v20, 0.0  ;;  %v5572_v13 = vmul.f32 0.01, %v5526_v20  ;;  %v7728_v5 = vpop.f32.mrb[98].mxu1  ;;  %7747 = vmatmul.mubr.msk.f32.gmra.mrb[110].mxu1 %vm1001_vm11, %v5587_v60 }
0x138d   :  { %v5541_v4 = vadd.f32 %v7728_v5, %v9186_v61  ;;  %v5535_v28 = vpop.f32.mrb[99].mxu1  ;;  %v5589_v32 = vsel %vm5557_vm2, %v5531_v47, %v5573_v51 }
0x138e   :  { %v5536_v50 = vadd.f32 %v5535_v28, %v9186_v61  ;;  %v5588_v10 = vsel %vm5556_vm12, %v5526_v20, %v5572_v13  ;;  %v6425_v61 = vld [vmem:[#allocation2 + $0x128] sm:$0xf] }
0x138f   :  { %v5575_v0 = vmul.f32 0.01, %v5541_v4  ;;  %7749 = vmatprep.mubr.msk.f32.mxu1 %vm1001_vm11, %v5588_v10  ;;  %vm5559_vm4 = vcmp.gt.f32.partialorder %v5541_v4, 0.0 }
0x1390   :  { %vm5558_vm9 = vcmp.gt.f32.partialorder %v5536_v50, 0.0  ;;  %v5574_v41 = vmul.f32 0.01, %v5536_v50  ;;  %7750 = vmatmul.mubr.msk.f32.gmra.mrb[112].mxu1 %vm1001_vm11, %v5589_v32 }
0x1391   :  { %v5591_v35 = vsel %vm5559_vm4, %v5541_v4, %v5575_v0 }
0x1392   :  { %v5590_v39 = vsel %vm5558_vm9, %v5536_v50, %v5574_v41 }
0x1393   :  { %7752 = vmatprep.mubr.msk.f32.mxu1 %vm1001_vm11, %v5590_v39 }
0x1394   :  { %7753 = vmatmul.mubr.msk.f32.gmra.mrb[114].mxu1 %vm1001_vm11, %v5591_v35 }
0x1395   :  { %7762 = vmatprep.mubr.msk.f32.mxu1 %vm1768_vm3, %v8367_v23  ;;  %v9433_v23 = vld [vmem:[#allocation11_spill] sm:$0xff] }
0x1398   :  { %7763 = vmatmul.mubr.msk.f32.vlgmr.msra.gmra.mrb[116].mxu1 %vm1768_vm3, %v8387_v45  ;;  %v9246_v45 = vrot.slane %v9105_v59, %v9433_v23 }
0x1399   :  { %7772 = vmatprep.mubr.msk.f32.mxu1 %vm255_vm1, %v8539_v53  ;;  %7771 = vmatpush3.msk.msra.mxu1 %vm304_vm0, %v9193_v46 }
0x139a   :  { %7780 = vmatprep.subr.msk.mxu1 %vm1775_vm15, %v6425_v61 }
0x13a0   :  { %7773 = vmatmul.mubr.msk.f32.vlgmr.msra.gmra.mrb[116].mxu1 %vm255_vm1, %v9430_v55 }
0x13a1   :  { %7782 = vmatprep.mubr.msk.f32.mxu1 %vm1768_vm3, %v9010_v42  ;;  %7781 = vmatpush3.msk.msra.mxu1 %vm1775_vm15, %v6425_v61 }
0x13a2   :  { %7790 = vmatprep.subr.mxu1 %v9404_v62 }
0x13a8   :  { %7783 = vmatmul.mubr.msk.f32.vlgmr.msra.gmra.mrb[116].mxu1 %vm1768_vm3, %v9044_v26 }
0x13a9   :  { %7792 = vmatprep.mubr.msk.f32.mxu1 %vm7976_vm14, %v9404_v62 }
0x144b   :  { %v7733_v53 = vpop.f32.mrb[100].mxu1 }
0x144c   :  { %v5717_v55 = vadd.f32 %v7733_v53, %v9246_v45  ;;  %v5711_v46 = vpop.f32.mrb[101].mxu1 }
0x144d   :  { %v5712_v42 = vadd.f32 %v5711_v46, %v9246_v45 }
0x144e   :  { %vm5791_vm0 = vcmp.gt.f32.partialorder %v5717_v55, 0.0  ;;  %v5807_v34 = vmul.f32 0.01, %v5717_v55 }
0x144f   :  { %vm5790_vm1 = vcmp.gt.f32.partialorder %v5712_v42, 0.0  ;;  %v5806_v26 = vmul.f32 0.01, %v5712_v42  ;;  %v7736_v48 = vpop.f32.mrb[102].mxu1 }
0x1450   :  { %v5727_v62 = vadd.f32 %v7736_v48, %v9246_v45  ;;  %v5721_v57 = vpop.f32.mrb[103].mxu1  ;;  %v5823_v6 = vsel %vm5791_vm0, %v5717_v55, %v5807_v34 }
0x1451   :  { %v5722_v11 = vadd.f32 %v5721_v57, %v9246_v45  ;;  %v5843_v25 = vmul.f32 %v9252_v38, %v5823_v6  ;;  %v5822_v29 = vsel %vm5790_vm1, %v5712_v42, %v5806_v26 }
0x1452   :  { %vm5793_vm14 = vcmp.gt.f32.partialorder %v5727_v62, 0.0  ;;  %v5809_v30 = vmul.f32 0.01, %v5727_v62  ;;  %v5842_v43 = vmul.f32 %v9252_v38, %v5822_v29 }
0x1453   :  { %vm5792_vm15 = vcmp.gt.f32.partialorder %v5722_v11, 0.0  ;;  %v5808_v59 = vmul.f32 0.01, %v5722_v11  ;;  %v7739_v44 = vpop.f32.mrb[104].mxu1  ;;  %v5861_v49 = vsel %vm1001_vm11, %v5843_v25, 0.0 }
0x1454   :  { %5862 = vadd.xlane.f32.xlu0 %v5861_v49  ;;  %v5731_v52 = vpop.f32.mrb[105].mxu1  ;;  %v5858_v2 = vsel %vm1001_vm11, %v5842_v43, 0.0  ;;  %v5825_v7 = vsel %vm5793_vm14, %v5727_v62, %v5809_v30  ;;  %v5737_v18 = vadd.f32 %v7739_v44, %v9246_v45 }
0x1455   :  { %v5732_v56 = vadd.f32 %v5731_v52, %v9246_v45  ;;  %5859 = vadd.xlane.f32.xlu1 %v5858_v2  ;;  %v5845_v36 = vmul.f32 %v9252_v38, %v5825_v7  ;;  %v5824_v14 = vsel %vm5792_vm15, %v5722_v11, %v5808_v59 }
0x1456   :  { %v5844_v40 = vmul.f32 %v9252_v38, %v5824_v14  ;;  %vm5795_vm2 = vcmp.gt.f32.partialorder %v5737_v18, 0.0  ;;  %v5811_v51 = vmul.f32 0.01, %v5737_v18 }
0x1457   :  { %vm5794_vm3 = vcmp.gt.f32.partialorder %v5732_v56, 0.0  ;;  %v5810_v63 = vmul.f32 0.01, %v5732_v56  ;;  %v9262_v8 = vpop.f32.mrb[106].mxu1  ;;  %v5867_v33 = vsel %vm1001_vm11, %v5845_v36, 0.0 }
0x1458   :  { %5868 = vadd.xlane.f32.xlu0 %v5867_v33  ;;  %v5741_v16 = vpop.f32.mrb[107].mxu1  ;;  %v5864_v31 = vsel %vm1001_vm11, %v5844_v40, 0.0  ;;  %v5827_v46 = vsel %vm5795_vm2, %v5737_v18, %v5811_v51 }
0x1459   :  { %v5826_v17 = vsel %vm5794_vm3, %v5732_v56, %v5810_v63  ;;  %v5742_v4 = vadd.f32 %v5741_v16, %v9246_v45  ;;  %v5847_v59 = vmul.f32 %v9252_v38, %v5827_v46  ;;  %v5747_v56 = vadd.f32 %v9262_v8, %v9246_v45 }
0x145a   :  { %v5846_v1 = vmul.f32 %v9252_v38, %v5826_v17 }
0x145b   :  { %v7745_v3 = vpop.f32.mrb[108].mxu1  ;;  %v5812_v42 = vmul.f32 0.01, %v5742_v4  ;;  %vm5796_vm9 = vcmp.gt.f32.partialorder %v5742_v4, 0.0  ;;  %v5873_v33 = vsel %vm1001_vm11, %v5847_v59, 0.0  ;;  %vm5797_vm3 = vcmp.gt.f32.partialorder %v5747_v56, 0.0 }
0x145c   :  { %v5757_v27 = vadd.f32 %v7745_v3, %v9246_v45  ;;  %v5751_v9 = vpop.f32.mrb[109].mxu1  ;;  %5865 = vadd.xlane.f32.xlu0 %v5864_v31  ;;  %v5870_v22 = vsel %vm1001_vm11, %v5846_v1, 0.0  ;;  %v5813_v31 = vmul.f32 0.01, %v5747_v56 }
0x145d   :  { %v5752_v19 = vadd.f32 %v5751_v9, %v9246_v45  ;;  %v5828_v2 = vsel %vm5796_vm9, %v5742_v4, %v5812_v42 }
0x145e   :  { %vm5799_vm10 = vcmp.gt.f32.partialorder %v5757_v27, 0.0  ;;  %v5815_v47 = vmul.f32 0.01, %v5757_v27  ;;  %v5848_v40 = vmul.f32 %v9252_v38, %v5828_v2 }
0x145f   :  { %vm5798_vm8 = vcmp.gt.f32.partialorder %v5752_v19, 0.0  ;;  %v5814_v58 = vmul.f32 0.01, %v5752_v19  ;;  %v7748_v20 = vpop.f32.mrb[110].mxu1 }
0x1460   :  { %v5767_v60 = vadd.f32 %v7748_v20, %v9246_v45  ;;  %v5761_v13 = vpop.f32.mrb[111].mxu1  ;;  %5871 = vadd.xlane.f32.xlu0 %v5870_v22  ;;  %v5831_v5 = vsel %vm5799_vm10, %v5757_v27, %v5815_v47  ;;  %v5829_v27 = vsel %vm5797_vm3, %v5747_v56, %v5813_v31  ;;  %vm9435_vm10 = vcmask 1044484  }
0x1461   :  { %v5762_v28 = vadd.f32 %v5761_v13, %v9246_v45  ;;  %v5851_v50 = vmul.f32 %v9252_v38, %v5831_v5  ;;  %v5830_v10 = vsel %vm5798_vm8, %v5752_v19, %v5814_v58  ;;  %v5849_v19 = vmul.f32 %v9252_v38, %v5829_v27  ;;  %vm9438_vm2 = vmmov %vm9435_vm10 }
0x1462   :  { %vm5801_vm12 = vcmp.gt.f32.partialorder %v5767_v60, 0.0  ;;  %v5817_v0 = vmul.f32 0.01, %v5767_v60  ;;  %v5850_v32 = vmul.f32 %v9252_v38, %v5830_v10  ;;  %vm9436_vm8 = vcmask 1045509  }
0x1463   :  { %vm5800_vm4 = vcmp.gt.f32.partialorder %v5762_v28, 0.0  ;;  %v5816_v41 = vmul.f32 0.01, %v5762_v28  ;;  %v7751_v39 = vpop.f32.mrb[112].mxu1  ;;  %v5885_v35 = vsel %vm1001_vm11, %v5851_v50, 0.0  ;;  %v5879_v58 = vsel %vm1001_vm11, %v5849_v19, 0.0 }
0x1464   :  { %v5777_v61 = vadd.f32 %v7751_v39, %v9246_v45  ;;  %v5771_v23 = vpop.f32.mrb[113].mxu1  ;;  %5886 = vadd.xlane.f32.xlu1 %v5885_v35  ;;  %v5882_v53 = vsel %vm1001_vm11, %v5850_v32, 0.0  ;;  %v5833_v55 = vsel %vm5801_vm12, %v5767_v60, %v5817_v0  ;;  %vm9439_vm12 = vcmask 1047559  }
0x1465   :  { %v5772_v12 = vadd.f32 %v5771_v23, %v9246_v45  ;;  %5883 = vadd.xlane.f32.xlu0 %v5882_v53  ;;  %v5853_v34 = vmul.f32 %v9252_v38, %v5833_v55  ;;  %v5832_v26 = vsel %vm5800_vm4, %v5762_v28, %v5816_v41  ;;  %vm9440_vm4 = vmmov %vm9436_vm8 }
0x1466   :  { %vm5803_vm0 = vcmp.gt.f32.partialorder %v5777_v61, 0.0  ;;  %v5819_v48 = vmul.f32 0.01, %v5777_v61  ;;  %v5852_v62 = vmul.f32 %v9252_v38, %v5832_v26 }
0x1467   :  { %vm5802_vm1 = vcmp.gt.f32.partialorder %v5772_v12, 0.0  ;;  %v5818_v57 = vmul.f32 0.01, %v5772_v12  ;;  %v7754_v6 = vpop.f32.mrb[114].mxu1  ;;  %v5891_v11 = vsel %vm1001_vm11, %v5853_v34, 0.0 }
0x1468   :  { %v5787_v25 = vadd.f32 %v7754_v6, %v9246_v45  ;;  %5892 = vadd.xlane.f32.xlu1 %v5891_v11  ;;  %v5781_v29 = vpop.f32.mrb[115].mxu1  ;;  %v5888_v30 = vsel %vm1001_vm11, %v5852_v62, 0.0  ;;  %v5835_v43 = vsel %vm5803_vm0, %v5777_v61, %v5819_v48 }
0x1469   :  { %v5782_v44 = vadd.f32 %v5781_v29, %v9246_v45  ;;  %5889 = vadd.xlane.f32.xlu0 %v5888_v30  ;;  %v5855_v49 = vmul.f32 %v9252_v38, %v5835_v43  ;;  %v5834_v52 = vsel %vm5802_vm1, %v5772_v12, %v5818_v57  ;;  %v5876_v45 = vsel %vm1001_vm11, %v5848_v40, 0.0 }
0x146a   :  { %vm5805_vm14 = vcmp.gt.f32.partialorder %v5787_v25, 0.0  ;;  %v5821_v7 = vmul.f32 0.01, %v5787_v25  ;;  %v5854_v14 = vmul.f32 %v9252_v38, %v5834_v52 }
0x146b   :  { %v5897_v36 = vsel %vm1001_vm11, %v5855_v49, 0.0  ;;  %v5820_v63 = vmul.f32 0.01, %v5782_v44  ;;  %vm5804_vm15 = vcmp.gt.f32.partialorder %v5782_v44, 0.0 }
0x146c   :  { %5898 = vadd.xlane.f32.xlu1 %v5897_v36  ;;  %v5837_v16 = vsel %vm5805_vm14, %v5787_v25, %v5821_v7  ;;  %v5894_v17 = vsel %vm1001_vm11, %v5854_v14, 0.0 }
0x146d   :  { %5874 = vadd.xlane.f32.xlu0 %v5873_v33  ;;  %v5857_v3 = vmul.f32 %v9252_v38, %v5837_v16  ;;  %v5836_v8 = vsel %vm5804_vm15, %v5782_v44, %v5820_v63 }
0x146e   :  { %v5856_v18 = vmul.f32 %v9252_v38, %v5836_v8 }
0x146f   :  { %v5903_v1 = vsel %vm1001_vm11, %v5857_v3, 0.0 }
0x1470   :  { %5895 = vadd.xlane.f32.xlu1 %v5894_v17  ;;  %v5900_v9 = vsel %vm1001_vm11, %v5856_v18, 0.0 }
0x1471   :  { %5877 = vadd.xlane.f32.xlu0 %v5876_v45 }
0x1474   :  { %5904 = vadd.xlane.f32.xlu1 %v5903_v1 }
0x1478   :  { %5901 = vadd.xlane.f32.xlu1 %v5900_v9 }
0x147b   :  { %v7784_v47 = vpop.f32.mrb[116].mxu1 }
0x147c   :  { %v6495_v20 = vpop.f32.mrb[117].mxu1  ;;  %7791 = vmatpush3.msra.mxu1 %v7784_v47  ;;  %5880 = vadd.xlane.f32.xlu1 %v5879_v58 }
0x147d   :  { %7786 = vmatpush3.msra.mxu0 %v6495_v20 }
0x14e1   :  { %v5863_v22 = vpop.xlane.xlu0 %5862 }
0x14e2   :  { %v5860_v13 = vpop.xlane.xlu1 %5859  ;;  %v5929_v23 = vrot.slane %v5863_v22, %v8300_v54 }
0x14e3   :  { %v5925_v53 = vrot.slane %v5860_v13, %v8300_v54 }
0x14e5   :  { %v5869_v51 = vpop.xlane.xlu0 %5868  ;;  %v5986_v48 = vsel %vm1396_vm5, %v5929_v23, %v5925_v53 }
0x14e6   :  { %v5937_v30 = vrot.slane %v5869_v51, %v8300_v54 }
0x14e9   :  { %v5866_v60 = vpop.xlane.xlu0 %5865 }
0x14ea   :  { %v5933_v42 = vrot.slane %v5866_v60, %v8300_v54 }
0x14ec   :  { %v5987_v6 = vsel %vm1398_vm6, %v5933_v42, %v5986_v48 }
0x14ed   :  { %v5872_v5 = vpop.xlane.xlu0 %5871  ;;  %v5988_v2 = vsel %vm1400_vm7, %v5937_v30, %v5987_v6 }
0x14ee   :  { %v5941_v11 = vrot.slane %v5872_v5, %v8300_v54 }
0x14f0   :  { %v5989_v56 = vsel %vm9438_vm2, %v5941_v11, %v5988_v2 }
0x14f1   :  { %v5887_v4 = vpop.xlane.xlu1 %5886 }
0x14f2   :  { %v5884_v28 = vpop.xlane.xlu0 %5883  ;;  %v5961_v38 = vrot.slane %v5887_v4, %v8300_v54  ;;  %v7922_v4 = vld [vmem:[#allocation2 + $0x130] sm:$0xff] }
0x14f3   :  { %v5957_v32 = vrot.slane %v5884_v28, %v8300_v54  ;;  %v6659_v28 = vrot.slane %v7922_v4, %v8364_v15 }
0x14f5   :  { %v5893_v50 = vpop.xlane.xlu1 %5892  ;;  %v5993_v61 = vsel %vm1396_vm5, %v5961_v38, %v5957_v32 }
0x14f6   :  { %v5890_v10 = vpop.xlane.xlu0 %5889  ;;  %v5969_v12 = vrot.slane %v5893_v50, %v8300_v54 }
0x14f7   :  { %v5965_v41 = vrot.slane %v5890_v10, %v8300_v54 }
0x14f9   :  { %v5899_v0 = vpop.xlane.xlu1 %5898  ;;  %v5994_v55 = vsel %vm1398_vm6, %v5965_v41, %v5993_v61  ;;  %vm9437_vm6 = vcmask 1046534  }
0x14fa   :  { %v5875_v35 = vpop.xlane.xlu0 %5874  ;;  %v5995_v26 = vsel %vm1400_vm7, %v5969_v12, %v5994_v55  ;;  %v5977_v25 = vrot.slane %v5899_v0, %v8300_v54  ;;  %vm9441_vm9 = vmmov %vm9437_vm6 }
0x14fb   :  { %v5945_v43 = vrot.slane %v5875_v35, %v8300_v54  ;;  %vm9442_vm7 = vmmov %vm9439_vm12 }
0x14fd   :  { %v5896_v39 = vpop.xlane.xlu1 %5895  ;;  %v5990_v63 = vsel %vm9440_vm4, %v5945_v43, %v5989_v56 }
0x14fe   :  { %v5973_v46 = vrot.slane %v5896_v39, %v8300_v54  ;;  %v5878_v57 = vpop.xlane.xlu0 %5877 }
0x14ff   :  { %v5949_v44 = vrot.slane %v5878_v57, %v8300_v54 }
0x1500   :  { %v5996_v62 = vsel %vm9435_vm10, %v5973_v46, %v5995_v26 }
0x1501   :  { %v5905_v34 = vpop.xlane.xlu1 %5904  ;;  %v5997_v52 = vsel %vm9436_vm8, %v5977_v25, %v5996_v62  ;;  %v5991_v17 = vsel %vm9441_vm9, %v5949_v44, %v5990_v63 }
0x1502   :  { %v5985_v49 = vrot.slane %v5905_v34, %v8300_v54 }
0x1505   :  { %v5902_v29 = vpop.xlane.xlu1 %5901 }
0x1506   :  { %v5981_v59 = vrot.slane %v5902_v29, %v8300_v54 }
0x1508   :  { %v5998_v7 = vsel %vm9437_vm6, %v5981_v59, %v5997_v52 }
0x1509   :  { %v5881_v36 = vpop.xlane.xlu1 %5880  ;;  %v5999_v14 = vsel %vm9439_vm12, %v5985_v49, %v5998_v7 }
0x150a   :  { %v5953_v33 = vrot.slane %v5881_v36, %v8300_v54  ;;  %v6003_v40 = vsel %vm8320_vm13, %v5999_v14, -1e+30 }
0x150b   :  { %v6007_v16 = vsel %vm1001_vm11, %v6003_v40, -inf }
0x150c   :  { %6008 = vmax.xlane.f32.xlu0 %v6007_v16  ;;  %v5992_v3 = vsel %vm9442_vm7, %v5953_v33, %v5991_v17 }
0x150d   :  { %v6002_v31 = vsel %vm8320_vm13, %v5992_v3, -1e+30  ;;  %vm6667_vm13 = vcmask 33792  }
0x150e   :  { %v6004_v45 = vsel %vm1001_vm11, %v6002_v31, -inf }
0x150f   :  { %6005 = vmax.xlane.f32.xlu1 %v6004_v45 }
0x1599   :  { %v6009_v8 = vpop.xlane.xlu0 %6008 }
0x159a   :  { %v6011_v1 = vsub.f32 %v6003_v40, %v6009_v8 }
0x159c   :  { %v6014_v18 = vmul.f32 1.442695, %v6011_v1  ;;  %v6006_v54 = vpop.xlane.xlu1 %6005 }
0x159d   :  { %v6010_v27 = vsub.f32 %v6002_v31, %v6006_v54 }
0x159e   :  { %7910 = vpow2.f32 %v6014_v18 }
0x159f   :  { %v6012_v9 = vmul.f32 1.442695, %v6010_v27 }
0x15a1   :  { %7912 = vpow2.f32 %v6012_v9 }
0x15a8   :  { %v7911_v19 = vpop.eup %7910 }
0x15a9   :  { %v6019_v47 = vsel %vm1001_vm11, %v7911_v19, 0.0 }
0x15aa   :  { %6020 = vadd.xlane.f32.xlu0 %v6019_v47 }
0x15ab   :  { %v7913_v58 = vpop.eup %7912 }
0x15ac   :  { %v6016_v20 = vsel %vm1001_vm11, %v7913_v58, 0.0 }
0x15ad   :  { %6017 = vadd.xlane.f32.xlu1 %v6016_v20 }
0x1637   :  { %v6021_v21 = vpop.xlane.xlu0 %6020 }
0x1638   :  { %7914 = vrcp.f32 %v6021_v21 }
0x163a   :  { %v6018_v22 = vpop.xlane.xlu1 %6017 }
0x163b   :  { %7916 = vrcp.f32 %v6018_v22 }
0x1642   :  { %v7915_v51 = vpop.eup %7914 }
0x1643   :  { %v6025_v60 = vmul.f32 %v7915_v51, %v7911_v19 }
0x1645   :  { %v7917_v13 = vpop.eup %7916  ;;  %7793 = vmatmul.mubr.msk.f32.vlgmr.msra.gmra.mrb[118].mxu1 %vm1001_vm11, %v6025_v60 }
0x1646   :  { %v6024_v5 = vmul.f32 %v7917_v13, %v7913_v58 }
0x1648   :  { %7788 = vmatmul.mubr.msk.f32.vlgmr.msra.gmra.mrb[96].mxu0 %vm1001_vm11, %v6024_v5 }
0x1718   :  { %v6650_v50 = vpop.f32.mrb[118].mxu1 }
0x1719   :  { %v6655_v10 = vadd.f32 %v9143_v37, %v6650_v50  ;;  %v7794_v0 = vpop.f32.mrb[119].mxu1 }
0x171b   :  { %v6661_v38 = vadd.f32 %v6659_v28, %v6655_v10  ;;  %v6577_v32 = vpop.f32.mrb[96].mxu0 }
0x171c   :  { %v6654_v41 = vadd.f32 %v6577_v32, %v9145_v24  ;;  %v7789_v39 = vpop.f32.mrb[97].mxu0 }
0x171d   :  { %v6664_v35 = vrot.slane %v6661_v38, 7 }
0x171e   :  { %v6660_v61 = vadd.f32 %v6659_v28, %v6654_v41 }
0x1720   :  { %v6665_v23 = vsel %vm1396_vm5, %v6664_v35, %v6660_v61 }
0x1721   :  { %6668 = vst.msk [vmem:[#allocation5] sm:$0x3] %vm6667_vm13, %v6665_v23 }
0x1722   :  { %7956 = shalt.err (!%p7953_p12)
}
0x1723   :  { %s7957_s18 = scalar_lea.hbm %s9365_s4, 32 }
0x1724   :  { %p7958_p13 = scmp.ne.s32.totalorder %s9365_s4, %s7957_s18  ;;  %p7961_p0 = scmp.lt.u32.totalorder %s7957_s18, %s9365_s4 }
0x1726   :  { %p7963_p1 = pnand %p7961_p0, %p7958_p13 }
0x1728   :  { %7966 = shalt.err (!%p7963_p1)
}
0x1729   :  { %6678 = dma.vmem_to_hbm [thread:$0]  %s6676_s14, 32, %s9365_s4, [#allocation4]  }
0x172a   :  { %7969 = dma.done.wait [#allocation4], 32  }
0x172b   :  { %7970 = vsyncadd [#allocation4], 4294967264 }
0x172c   :  { %6682 = vsyncpa [#allocation3], 1 }
0x172d   :  { %6683 = vsyncpa [#allocation4], 1 }

</bundles_post_ra>
